<compile_context>
chip_gen: v5e
topology: v5e:2x2
jax: 0.10.0
libtpu: 0.0.40
codegen_flags: <defaults>
</compile_context>

<pallas_src>
import functools
import math

import jax
import jax.numpy as jnp
from jax import lax
from jax.experimental import pallas as pl
from jax.experimental.pallas import tpu as pltpu

LANE = 128
SUBLANE = 8


# ---------------------------------------------------------------------------
# Weight mixing (SharedMixQuantChanConv2d path): per-output-channel asymmetric
# min/max quantization at every candidate bit-width, mixed by softmax(alpha/T).
# Tiny tensor (Cout*Cin*KH*KW) -> parameter setup kept in plain JAX.
# ---------------------------------------------------------------------------
def _mix_weight(weight, alpha_weight, wbits, temp):
    sw = jax.nn.softmax(alpha_weight.astype(jnp.float32) / temp)
    cout = weight.shape[0]
    w_flat = weight.reshape(cout, -1)
    ch_range = w_flat.max(axis=1) - w_flat.min(axis=1)
    ch_range = jnp.where(ch_range == 0.0, 1.0, ch_range)     # masked_fill_(eq(0), 1)
    mix = jnp.zeros_like(weight)
    mix_wbit = jnp.float32(0.0)
    for i, bit in enumerate(wbits):
        n_steps = float(2 ** bit - 1)
        s_w = (ch_range / n_steps).reshape(cout, 1, 1, 1)
        q = jnp.round(weight / s_w) * s_w                    # round-half-even == torch.round
        mix = mix + q * sw[i]
        mix_wbit = mix_wbit + sw[i] * bit
    return mix, mix_wbit


# ---------------------------------------------------------------------------
# Fused kernel: mixed PACT activation quantization + conv2d (as KH*KW
# accumulated MXU matmuls over an on-the-fly im2col window in VMEM).
# ---------------------------------------------------------------------------
def _fused_pact_conv_kernel(aq_ref, x_ref, w_ref, o_ref, *,
                            num_abits, KH, KW, stride, TH, W_out,
                            Cin_pad, Cout_pad, n_hb):
    # aq_ref: (3, num_abits) f32 in SMEM, rows = [clip, scale, softmax_w/scale]
    # x_ref : (1, Hp, Wp, Cin_pad)   full padded image, resident across hb axis
    # w_ref : (KH*KW, Cin_pad, Cout_pad)  grid-invariant mixed weight
    # o_ref : (1, TH, W_out, Cout_pad)    lane-dense output block
    th_in = (TH - 1) * stride + KH
    if n_hb == 1:
        xs = x_ref[0]                                        # (Hp, Wp, Cin_pad)
    else:
        row0 = pl.multiple_of(pl.program_id(1) * (TH * stride), TH * stride)
        xs = x_ref[0, pl.ds(row0, th_in), :, :]              # (th_in, Wp, Cin_pad)

    # --- fused MixQuantPaCTActiv (VPU work, hidden under MXU/DMA slack) ------
    # clamp(x, 0, clip_i) -> floor(x * sf_i) -> * (sw_i / sf_i), summed over i.
    xr = jnp.maximum(xs, 0.0)                                # shared lower clamp
    act = jnp.zeros_like(xs)
    for i in range(num_abits):                               # static unroll over abits
        clip_i = aq_ref[0, i]
        sf_i = aq_ref[1, i]
        mixdq_i = aq_ref[2, i]                               # sw_i / sf_i (fused dequant+mix)
        y = jnp.minimum(xr, clip_i)
        act = act + jnp.floor(y * sf_i) * mixdq_i

    # --- conv2d: tap loop unrolled, im2col never leaves VMEM -----------------
    m_rows = TH * W_out
    acc = jnp.zeros((m_rows, Cout_pad), jnp.float32)
    for kh in range(KH):
        for kw in range(KW):
            if stride == 1:
                slab = act[kh:kh + TH, kw:kw + W_out, :]
            else:
                slab = lax.slice(
                    act, (kh, kw, 0),
                    (kh + (TH - 1) * stride + 1,
                     kw + (W_out - 1) * stride + 1, Cin_pad),
                    (stride, stride, 1))
            acc = acc + jnp.dot(slab.reshape(m_rows, Cin_pad),
                                w_ref[kh * KW + kw],
                                preferred_element_type=jnp.float32)

    o_ref[...] = acc.reshape(1, TH, W_out, Cout_pad).astype(o_ref.dtype)


def _pick_th(h_out, w_out, row_target=2048):
    """Largest divisor TH of H_out with TH*W_out <= row_target (at least 1)."""
    best = 1
    for th in range(1, h_out + 1):
        if h_out % th == 0 and th * w_out <= row_target:
            best = th
    return best


# ---------------------------------------------------------------------------
# Full MixActivChanConv2d forward (share_weight=True, gumbel=False, fix_qtz=False,
# bias=False). Returns (out_nchw, w_complexity) like the module.
# ---------------------------------------------------------------------------
def mix_activ_chan_conv2d_forward(x_nchw, params, *, abits, wbits, stride=1,
                                  padding=0, groups=1, temp=1.0, is_hard=False):
    del is_hard  # only used by the gumbel branch
    assert groups == 1  # TODO(synk): grouped conv not implemented
    weight = params["weight"]
    Cout, Cin, KH, KW = weight.shape
    N, C, H, W = x_nchw.shape
    assert C == Cin

    # activation-quant scalars (softmax has NO temp for activations, per module)
    sw_a = jax.nn.softmax(params["alpha_activ"].astype(jnp.float32))
    clip_vals = params["clip_vals"].astype(jnp.float32)
    n_levels = jnp.asarray([float(2 ** b - 1) for b in abits], jnp.float32)
    sf = n_levels / clip_vals
    aq = jnp.stack([clip_vals, sf, sw_a / sf], axis=0)       # (3, len(abits)) -> SMEM

    # weight mixing (per-out-channel min/max quant, softmax(alpha/temp) mixture)
    w_mix, mix_wbit = _mix_weight(weight, params["alpha_weight"], wbits, temp)
    # TODO(synk): quantized-bias (bit=32) path not implemented (module run bias=False).

    # MXU / lane-friendly packing: (KH*KW, Cin_pad, Cout_pad)
    cin_pad = max(SUBLANE, ((Cin + SUBLANE - 1) // SUBLANE) * SUBLANE)
    cout_pad = ((Cout + LANE - 1) // LANE) * LANE
    w_taps = jnp.transpose(w_mix, (2, 3, 1, 0)).reshape(KH * KW, Cin, Cout)
    w_taps = jnp.pad(w_taps, ((0, 0), (0, cin_pad - Cin), (0, cout_pad - Cout)))

    # input layout: NCHW -> NHWC, spatial zero-pad, channel pad to 8.
    # (zero padding quantizes to exactly zero inside the kernel, so padding
    # before the fused quant matches the reference order)
    x_nhwc = jnp.transpose(x_nchw, (0, 2, 3, 1))
    x_pad = jnp.pad(x_nhwc, ((0, 0), (padding, padding), (padding, padding),
                             (0, cin_pad - Cin)))
    Hp, Wp = H + 2 * padding, W + 2 * padding
    H_out = (H + 2 * padding - KH) // stride + 1
    W_out = (W + 2 * padding - KW) // stride + 1

    TH = _pick_th(H_out, W_out)
    n_hb = H_out // TH

    kernel = functools.partial(
        _fused_pact_conv_kernel, num_abits=len(abits), KH=KH, KW=KW,
        stride=stride, TH=TH, W_out=W_out, Cin_pad=cin_pad, Cout_pad=cout_pad,
        n_hb=n_hb)

    flops = 2 * N * H_out * W_out * KH * KW * cin_pad * cout_pad
    bytes_accessed = 4 * (x_pad.size + w_taps.size + N * H_out * W_out * cout_pad)

    out_padded = pl.pallas_call(
        kernel,
        out_shape=jax.ShapeDtypeStruct((N, H_out, W_out, cout_pad), x_nchw.dtype),
        grid=(N, n_hb),
        in_specs=[
            pl.BlockSpec(memory_space=pltpu.MemorySpace.SMEM),            # quant scalars
            # full padded image; index map ignores hb -> stays resident across hb
            pl.BlockSpec((1, Hp, Wp, cin_pad), lambda n, hb: (n, 0, 0, 0)),
            # grid-invariant mixed weight, fetched once.  (Default double-buffer
            # of this invariant operand only costs a few KiB at these sizes.)
            pl.BlockSpec((KH * KW, cin_pad, cout_pad), lambda n, hb: (0, 0, 0)),
        ],
        out_specs=pl.BlockSpec((1, TH, W_out, cout_pad),
                               lambda n, hb: (n, hb, 0, 0)),
        compiler_params=pltpu.CompilerParams(
            dimension_semantics=("parallel", "arbitrary")),
        cost_estimate=pl.CostEstimate(flops=flops, transcendentals=0,
                                      bytes_accessed=bytes_accessed),
    )(aq, x_pad, w_taps)

    out = jnp.transpose(out_padded[..., :Cout], (0, 3, 1, 2))   # back to NCHW
    # TODO(synk): size_product / memory_size buffer .copy_() side effects (used
    # only by complexity_loss / fetch_best_arch) are not materialized here.
    param_size = Cin * Cout * KH * KW / groups * 1e-6
    w_complexity = mix_wbit * param_size
    return out, w_complexity


# ---------------------------------------------------------------------------
# Pure-JAX reference for verification
# ---------------------------------------------------------------------------
def _reference_forward(x, params, *, abits, wbits, stride, padding, groups, temp):
    sw_a = jax.nn.softmax(params["alpha_activ"].astype(jnp.float32))
    act = jnp.zeros_like(x)
    for i, bit in enumerate(abits):
        clip = params["clip_vals"][i]
        sf_i = (2.0 ** bit - 1.0) / clip
        y = jnp.clip(x, 0.0, clip)
        act = act + (jnp.floor(y * sf_i) / sf_i) * sw_a[i]
    w_mix, mix_wbit = _mix_weight(params["weight"], params["alpha_weight"], wbits, temp)
    out = lax.conv_general_dilated(
        act, w_mix, (stride, stride),
        [(padding, padding), (padding, padding)],
        dimension_numbers=("NCHW", "OIHW", "NCHW"),
        feature_group_count=groups)
    Cout, Cin, KH, KW = params["weight"].shape
    w_complexity = mix_wbit * (Cin * Cout * KH * KW / groups * 1e-6)
    return out, w_complexity


if __name__ == "__main__":
    # Module config: MixActivChanConv2d(inplane=4, outplane=8, kernel_size=3,
    #   stride=1, padding=1, groups=1, bias=False), share_weight=True,
    #   gumbel=False, abits=[1, 2], wbits=[1, 2] (defaults), temp=1, is_hard=False.
    inplane, outplane = 4, 8
    kernel_size, stride, padding, groups = 3, 1, 1, 1
    abits = [1, 2]
    wbits = [1, 2]
    temp = 1.0

    key = jax.random.PRNGKey(0)
    kx, kw = jax.random.split(key, 2)

    x = jax.random.normal(kx, (2, inplane, 16, 16), dtype=jnp.float32)

    fan_in = inplane * kernel_size * kernel_size
    bound = 1.0 / math.sqrt(fan_in)
    params = {
        "alpha_activ": jnp.full((len(abits),), 0.01, dtype=jnp.float32),   # init 0.01
        "alpha_weight": jnp.full((len(wbits),), 0.01, dtype=jnp.float32),  # init 0.01
        "clip_vals": jnp.full((len(abits),), 6.0, dtype=jnp.float32),      # PACT init 6
        # single shared conv weight (share_weight=True)
        "weight": jax.random.uniform(
            kw, (outplane, inplane, kernel_size, kernel_size),
            minval=-bound, maxval=bound, dtype=jnp.float32),
    }

    out, w_complexity = mix_activ_chan_conv2d_forward(
        x, params, abits=abits, wbits=wbits, stride=stride, padding=padding,
        groups=groups, temp=temp, is_hard=False)
    out = jax.block_until_ready(out)

    ref_out, ref_wc = _reference_forward(
        x, params, abits=abits, wbits=wbits, stride=stride, padding=padding,
        groups=groups, temp=temp)
    ref_out = jax.block_until_ready(ref_out)

    assert out.shape == (2, outplane, 16, 16)
    assert jnp.allclose(out, ref_out, rtol=1e-4, atol=5e-4), "conv output mismatch"
    assert jnp.allclose(w_complexity, ref_wc, rtol=1e-5, atol=1e-8), "w_complexity mismatch"
    print("KERNEL_OK")
</pallas_src>

<mosaic_0001>
module attributes {stable_mosaic.version = 11 : i64} {
  func.func @_fused_pact_conv_kernel(%arg0: i32, %arg1: i32, %arg2: memref<3x2xf32, #tpu.memory_space<smem>>, %arg3: memref<1x18x18x8xf32, #tpu.memory_space<vmem>>, %arg4: memref<9x8x128xf32, #tpu.memory_space<vmem>>, %arg5: memref<1x16x16x128xf32, #tpu.memory_space<vmem>>) attributes {dimension_semantics = [#tpu.dimension_semantics<parallel>, #tpu.dimension_semantics<arbitrary>], iteration_bounds = array<i64: 2, 1>, scalar_prefetch = 0 : i64, scratch_operands = 0 : i64, tpu.core_type = #tpu.core_type<tc>, window_params = [{transform_indices = @transform_0, window_bounds = array<i64: 3, 2>}, {transform_indices = @transform_1, window_bounds = array<i64: 1, 18, 18, 8>}, {pipeline_mode = #tpu.pipeline_mode<synchronous>, transform_indices = @transform_2, window_bounds = array<i64: 9, 8, 128>}, {transform_indices = @transform_3, window_bounds = array<i64: 1, 16, 16, 128>}]} {
    %c0 = arith.constant 0 : index
    %c0_0 = arith.constant 0 : index
    %c0_1 = arith.constant 0 : index
    %c0_2 = arith.constant 0 : index
    %0 = vector.load %arg3[%c0, %c0_0, %c0_1, %c0_2] : memref<1x18x18x8xf32, #tpu.memory_space<vmem>>, vector<1x18x18x8xf32>
    %1 = vector.shape_cast %0 : vector<1x18x18x8xf32> to vector<18x18x8xf32>
    %cst = arith.constant 0.000000e+00 : f32
    %2 = vector.broadcast %cst : f32 to vector<18x18x8xf32>
    %3 = arith.maximumf %1, %2 : vector<18x18x8xf32>
    %cst_3 = arith.constant 0.000000e+00 : f32
    %4 = vector.broadcast %cst_3 : f32 to vector<18x18x8xf32>
    %c0_4 = arith.constant 0 : index
    %c0_5 = arith.constant 0 : index
    %5 = memref.load %arg2[%c0_4, %c0_5] : memref<3x2xf32, #tpu.memory_space<smem>>
    %c1 = arith.constant 1 : index
    %c0_6 = arith.constant 0 : index
    %6 = memref.load %arg2[%c1, %c0_6] : memref<3x2xf32, #tpu.memory_space<smem>>
    %c2 = arith.constant 2 : index
    %c0_7 = arith.constant 0 : index
    %7 = memref.load %arg2[%c2, %c0_7] : memref<3x2xf32, #tpu.memory_space<smem>>
    %8 = vector.broadcast %5 : f32 to vector<18x18x8xf32>
    %9 = arith.minimumf %3, %8 : vector<18x18x8xf32>
    %10 = vector.broadcast %6 : f32 to vector<18x18x8xf32>
    %11 = arith.mulf %9, %10 : vector<18x18x8xf32>
    %12 = math.floor %11 : vector<18x18x8xf32>
    %13 = vector.broadcast %7 : f32 to vector<18x18x8xf32>
    %14 = arith.mulf %12, %13 : vector<18x18x8xf32>
    %15 = arith.addf %4, %14 : vector<18x18x8xf32>
    %c0_8 = arith.constant 0 : index
    %c1_9 = arith.constant 1 : index
    %16 = memref.load %arg2[%c0_8, %c1_9] : memref<3x2xf32, #tpu.memory_space<smem>>
    %c1_10 = arith.constant 1 : index
    %c1_11 = arith.constant 1 : index
    %17 = memref.load %arg2[%c1_10, %c1_11] : memref<3x2xf32, #tpu.memory_space<smem>>
    %c2_12 = arith.constant 2 : index
    %c1_13 = arith.constant 1 : index
    %18 = memref.load %arg2[%c2_12, %c1_13] : memref<3x2xf32, #tpu.memory_space<smem>>
    %19 = vector.broadcast %16 : f32 to vector<18x18x8xf32>
    %20 = arith.minimumf %3, %19 : vector<18x18x8xf32>
    %21 = vector.broadcast %17 : f32 to vector<18x18x8xf32>
    %22 = arith.mulf %20, %21 : vector<18x18x8xf32>
    %23 = math.floor %22 : vector<18x18x8xf32>
    %24 = vector.broadcast %18 : f32 to vector<18x18x8xf32>
    %25 = arith.mulf %23, %24 : vector<18x18x8xf32>
    %26 = arith.addf %15, %25 : vector<18x18x8xf32>
    %cst_14 = arith.constant 0.000000e+00 : f32
    %27 = vector.broadcast %cst_14 : f32 to vector<256x128xf32>
    %28 = vector.extract_strided_slice %26 {offsets = [0, 0, 0], sizes = [16, 16, 8], strides = [1, 1, 1]} : vector<18x18x8xf32> to vector<16x16x8xf32>
    %29 = vector.shape_cast %28 : vector<16x16x8xf32> to vector<256x8xf32>
    %c0_15 = arith.constant 0 : index
    %c0_16 = arith.constant 0 : index
    %c0_17 = arith.constant 0 : index
    %30 = vector.load %arg4[%c0_15, %c0_16, %c0_17] : memref<9x8x128xf32, #tpu.memory_space<vmem>>, vector<1x8x128xf32>
    %31 = vector.shape_cast %30 : vector<1x8x128xf32> to vector<8x128xf32>
    %cst_18 = arith.constant dense<0.000000e+00> : vector<256x128xf32>
    %32 = tpu.matmul %29, %31, %cst_18 {dimension_numbers = #tpu.dot_dimension_numbers<[1], [0], [0], [1], [0, 0, 1, 1], [], []>} : vector<256x8xf32>, vector<8x128xf32>, vector<256x128xf32> -> vector<256x128xf32>
    %33 = arith.addf %27, %32 : vector<256x128xf32>
    %34 = vector.extract_strided_slice %26 {offsets = [0, 1, 0], sizes = [16, 16, 8], strides = [1, 1, 1]} : vector<18x18x8xf32> to vector<16x16x8xf32>
    %35 = vector.shape_cast %34 : vector<16x16x8xf32> to vector<256x8xf32>
    %c1_19 = arith.constant 1 : index
    %c0_20 = arith.constant 0 : index
    %c0_21 = arith.constant 0 : index
    %36 = vector.load %arg4[%c1_19, %c0_20, %c0_21] : memref<9x8x128xf32, #tpu.memory_space<vmem>>, vector<1x8x128xf32>
    %37 = vector.shape_cast %36 : vector<1x8x128xf32> to vector<8x128xf32>
    %cst_22 = arith.constant dense<0.000000e+00> : vector<256x128xf32>
    %38 = tpu.matmul %35, %37, %cst_22 {dimension_numbers = #tpu.dot_dimension_numbers<[1], [0], [0], [1], [0, 0, 1, 1], [], []>} : vector<256x8xf32>, vector<8x128xf32>, vector<256x128xf32> -> vector<256x128xf32>
    %39 = arith.addf %33, %38 : vector<256x128xf32>
    %40 = vector.extract_strided_slice %26 {offsets = [0, 2, 0], sizes = [16, 16, 8], strides = [1, 1, 1]} : vector<18x18x8xf32> to vector<16x16x8xf32>
    %41 = vector.shape_cast %40 : vector<16x16x8xf32> to vector<256x8xf32>
    %c2_23 = arith.constant 2 : index
    %c0_24 = arith.constant 0 : index
    %c0_25 = arith.constant 0 : index
    %42 = vector.load %arg4[%c2_23, %c0_24, %c0_25] : memref<9x8x128xf32, #tpu.memory_space<vmem>>, vector<1x8x128xf32>
    %43 = vector.shape_cast %42 : vector<1x8x128xf32> to vector<8x128xf32>
    %cst_26 = arith.constant dense<0.000000e+00> : vector<256x128xf32>
    %44 = tpu.matmul %41, %43, %cst_26 {dimension_numbers = #tpu.dot_dimension_numbers<[1], [0], [0], [1], [0, 0, 1, 1], [], []>} : vector<256x8xf32>, vector<8x128xf32>, vector<256x128xf32> -> vector<256x128xf32>
    %45 = arith.addf %39, %44 : vector<256x128xf32>
    %46 = vector.extract_strided_slice %26 {offsets = [1, 0, 0], sizes = [16, 16, 8], strides = [1, 1, 1]} : vector<18x18x8xf32> to vector<16x16x8xf32>
    %47 = vector.shape_cast %46 : vector<16x16x8xf32> to vector<256x8xf32>
    %c3 = arith.constant 3 : index
    %c0_27 = arith.constant 0 : index
    %c0_28 = arith.constant 0 : index
    %48 = vector.load %arg4[%c3, %c0_27, %c0_28] : memref<9x8x128xf32, #tpu.memory_space<vmem>>, vector<1x8x128xf32>
    %49 = vector.shape_cast %48 : vector<1x8x128xf32> to vector<8x128xf32>
    %cst_29 = arith.constant dense<0.000000e+00> : vector<256x128xf32>
    %50 = tpu.matmul %47, %49, %cst_29 {dimension_numbers = #tpu.dot_dimension_numbers<[1], [0], [0], [1], [0, 0, 1, 1], [], []>} : vector<256x8xf32>, vector<8x128xf32>, vector<256x128xf32> -> vector<256x128xf32>
    %51 = arith.addf %45, %50 : vector<256x128xf32>
    %52 = vector.extract_strided_slice %26 {offsets = [1, 1, 0], sizes = [16, 16, 8], strides = [1, 1, 1]} : vector<18x18x8xf32> to vector<16x16x8xf32>
    %53 = vector.shape_cast %52 : vector<16x16x8xf32> to vector<256x8xf32>
    %c4 = arith.constant 4 : index
    %c0_30 = arith.constant 0 : index
    %c0_31 = arith.constant 0 : index
    %54 = vector.load %arg4[%c4, %c0_30, %c0_31] : memref<9x8x128xf32, #tpu.memory_space<vmem>>, vector<1x8x128xf32>
    %55 = vector.shape_cast %54 : vector<1x8x128xf32> to vector<8x128xf32>
    %cst_32 = arith.constant dense<0.000000e+00> : vector<256x128xf32>
    %56 = tpu.matmul %53, %55, %cst_32 {dimension_numbers = #tpu.dot_dimension_numbers<[1], [0], [0], [1], [0, 0, 1, 1], [], []>} : vector<256x8xf32>, vector<8x128xf32>, vector<256x128xf32> -> vector<256x128xf32>
    %57 = arith.addf %51, %56 : vector<256x128xf32>
    %58 = vector.extract_strided_slice %26 {offsets = [1, 2, 0], sizes = [16, 16, 8], strides = [1, 1, 1]} : vector<18x18x8xf32> to vector<16x16x8xf32>
    %59 = vector.shape_cast %58 : vector<16x16x8xf32> to vector<256x8xf32>
    %c5 = arith.constant 5 : index
    %c0_33 = arith.constant 0 : index
    %c0_34 = arith.constant 0 : index
    %60 = vector.load %arg4[%c5, %c0_33, %c0_34] : memref<9x8x128xf32, #tpu.memory_space<vmem>>, vector<1x8x128xf32>
    %61 = vector.shape_cast %60 : vector<1x8x128xf32> to vector<8x128xf32>
    %cst_35 = arith.constant dense<0.000000e+00> : vector<256x128xf32>
    %62 = tpu.matmul %59, %61, %cst_35 {dimension_numbers = #tpu.dot_dimension_numbers<[1], [0], [0], [1], [0, 0, 1, 1], [], []>} : vector<256x8xf32>, vector<8x128xf32>, vector<256x128xf32> -> vector<256x128xf32>
    %63 = arith.addf %57, %62 : vector<256x128xf32>
    %64 = vector.extract_strided_slice %26 {offsets = [2, 0, 0], sizes = [16, 16, 8], strides = [1, 1, 1]} : vector<18x18x8xf32> to vector<16x16x8xf32>
    %65 = vector.shape_cast %64 : vector<16x16x8xf32> to vector<256x8xf32>
    %c6 = arith.constant 6 : index
    %c0_36 = arith.constant 0 : index
    %c0_37 = arith.constant 0 : index
    %66 = vector.load %arg4[%c6, %c0_36, %c0_37] : memref<9x8x128xf32, #tpu.memory_space<vmem>>, vector<1x8x128xf32>
    %67 = vector.shape_cast %66 : vector<1x8x128xf32> to vector<8x128xf32>
    %cst_38 = arith.constant dense<0.000000e+00> : vector<256x128xf32>
    %68 = tpu.matmul %65, %67, %cst_38 {dimension_numbers = #tpu.dot_dimension_numbers<[1], [0], [0], [1], [0, 0, 1, 1], [], []>} : vector<256x8xf32>, vector<8x128xf32>, vector<256x128xf32> -> vector<256x128xf32>
    %69 = arith.addf %63, %68 : vector<256x128xf32>
    %70 = vector.extract_strided_slice %26 {offsets = [2, 1, 0], sizes = [16, 16, 8], strides = [1, 1, 1]} : vector<18x18x8xf32> to vector<16x16x8xf32>
    %71 = vector.shape_cast %70 : vector<16x16x8xf32> to vector<256x8xf32>
    %c7 = arith.constant 7 : index
    %c0_39 = arith.constant 0 : index
    %c0_40 = arith.constant 0 : index
    %72 = vector.load %arg4[%c7, %c0_39, %c0_40] : memref<9x8x128xf32, #tpu.memory_space<vmem>>, vector<1x8x128xf32>
    %73 = vector.shape_cast %72 : vector<1x8x128xf32> to vector<8x128xf32>
    %cst_41 = arith.constant dense<0.000000e+00> : vector<256x128xf32>
    %74 = tpu.matmul %71, %73, %cst_41 {dimension_numbers = #tpu.dot_dimension_numbers<[1], [0], [0], [1], [0, 0, 1, 1], [], []>} : vector<256x8xf32>, vector<8x128xf32>, vector<256x128xf32> -> vector<256x128xf32>
    %75 = arith.addf %69, %74 : vector<256x128xf32>
    %76 = vector.extract_strided_slice %26 {offsets = [2, 2, 0], sizes = [16, 16, 8], strides = [1, 1, 1]} : vector<18x18x8xf32> to vector<16x16x8xf32>
    %77 = vector.shape_cast %76 : vector<16x16x8xf32> to vector<256x8xf32>
    %c8 = arith.constant 8 : index
    %c0_42 = arith.constant 0 : index
    %c0_43 = arith.constant 0 : index
    %78 = vector.load %arg4[%c8, %c0_42, %c0_43] : memref<9x8x128xf32, #tpu.memory_space<vmem>>, vector<1x8x128xf32>
    %79 = vector.shape_cast %78 : vector<1x8x128xf32> to vector<8x128xf32>
    %cst_44 = arith.constant dense<0.000000e+00> : vector<256x128xf32>
    %80 = tpu.matmul %77, %79, %cst_44 {dimension_numbers = #tpu.dot_dimension_numbers<[1], [0], [0], [1], [0, 0, 1, 1], [], []>} : vector<256x8xf32>, vector<8x128xf32>, vector<256x128xf32> -> vector<256x128xf32>
    %81 = arith.addf %75, %80 : vector<256x128xf32>
    %82 = vector.shape_cast %81 : vector<256x128xf32> to vector<1x16x16x128xf32>
    %c0_45 = arith.constant 0 : index
    %c0_46 = arith.constant 0 : index
    %c0_47 = arith.constant 0 : index
    %c0_48 = arith.constant 0 : index
    %83 = vector.load %arg5[%c0_45, %c0_46, %c0_47, %c0_48] : memref<1x16x16x128xf32, #tpu.memory_space<vmem>>, vector<1x16x16x128xf32>
    tpu.vector_store %arg5[%c0_45, %c0_46, %c0_47, %c0_48], %82 {strides = array<i32>} : memref<1x16x16x128xf32, #tpu.memory_space<vmem>>, vector<1x16x16x128xf32>,
    return
  }
  func.func @transform_0(%arg0: i32, %arg1: i32) -> (i32, i32) {
    %c0_i32 = arith.constant 0 : i32
    %c0_i32_0 = arith.constant 0 : i32
    %c0_i32_1 = arith.constant 0 : i32
    return %c0_i32, %c0_i32_0 : i32, i32
  }
  func.func @transform_1(%arg0: i32, %arg1: i32) -> (i32, i32, i32, i32) {
    %c0_i32 = arith.constant 0 : i32
    %c0_i32_0 = arith.constant 0 : i32
    %c0_i32_1 = arith.constant 0 : i32
    %c0_i32_2 = arith.constant 0 : i32
    return %arg0, %c0_i32, %c0_i32_0, %c0_i32_1 : i32, i32, i32, i32
  }
  func.func @transform_2(%arg0: i32, %arg1: i32) -> (i32, i32, i32) {
    %c0_i32 = arith.constant 0 : i32
    %c0_i32_0 = arith.constant 0 : i32
    %c0_i32_1 = arith.constant 0 : i32
    %c0_i32_2 = arith.constant 0 : i32
    return %c0_i32, %c0_i32_0, %c0_i32_1 : i32, i32, i32
  }
  func.func @transform_3(%arg0: i32, %arg1: i32) -> (i32, i32, i32, i32) {
    %c0_i32 = arith.constant 0 : i32
    %c0_i32_0 = arith.constant 0 : i32
    %c0_i32_1 = arith.constant 0 : i32
    return %arg0, %arg1, %c0_i32, %c0_i32_0 : i32, i32, i32, i32
  }
}

</mosaic_0001>

<bundles_post_ra>
// kernel: tpu_custom_call.1
= control target key start
LH: loop header
LB: loop body
LE: loop exit
PB: predicated region body
PF: predicated region fallthrough
CT: control target
= control target key end

     0   :  { %8 = vsyncpa [#allocation4], 0  ;;  %s5079_s0 = inlined_call_operand.vmem [shape: f32[3,2], index: 0, kind: input, shape index: {}]   ;;  %s5080_s1 = inlined_call_operand.vmem [shape: f32[2,18,18,8], index: 1, kind: input, shape index: {}]   ;;  %s5081_s2 = inlined_call_operand.vmem [shape: f32[9,8,128], index: 2, kind: input, shape index: {}]   ;;  %s5082_s3 = inlined_call_operand.hbm [shape: f32[2,16,16,128], index: 3, kind: output, shape index: {}]  }
   0x1   :  { %9 = vsyncpa [#allocation3], 0 }
   0x2   :  { %11 = vsyncpa [#allocation3 + $0x1], 0  ;;  %s3215_s12 = smov 0   ;;  %s3217_s13 = smov 0  }
   0x3   :  { %s3219_s14 = smov 0   ;;  %s3221_s15 = smov 0  }
   0x4   :  { %s3223_s16 = smov 0   ;;  %s3225_s17 = smov 0  }
   0x5 LB: > { %s2705_s18 = sadd.s32 4294967295, %s3190_s17   ;;  %s2706_s19 = sadd.s32 4294967294, %s3190_s17   ;;  %s3190_s17 = sphi %s3225_s17, %s17_s17   ;;  %s3186_s16 = sphi %s3223_s16, %s5482_s16   ;;  %s3182_s15 = sphi %s3221_s15, %s5481_s15   ;;  %s3178_s14 = sphi %s3219_s14, %s5480_s14   ;;  %s3174_s13 = sphi %s3217_s13, %s5479_s13   ;;  %s3170_s12 = sphi %s3215_s12, %s5478_s12  }
   0x6   : > { %s29_s20 = sadd.s32 1, %s3186_s16  ;;  %s106_s21 = sadd.s32 1, %s3178_s14 }
   0x7   : > { %p31_p0 = scmp.ge.s32.totalorder %s29_s20, 2  ;;  %p116_p1 = scmp.ne.s32.totalorder %s3178_s14, %s3174_s13 }
   0x8   : > { %p117_p2 = scmp.eq.s32.totalorder %s2705_s18, 1  ;;  %p122_p3 = scmp.ne.s32.totalorder %s3174_s13, %s3170_s12 }
   0x9   : > { %s5484_s20 = smov (%p31_p0, %s29_s20), 0  ;;  %p123_p5 = scmp.eq.s32.totalorder %s2706_s19, 1 }
   0xa   : > { %p3255_p4 = por %p117_p2, %p116_p1  ;;  %s101_s23 = ssub.s32 %s3186_s16, %s5484_s20 }
   0xb   : > { %p2707_p6 = scmp.ge.s32.totalorder %s3190_s17, 1  ;;  %p104_p7 = scmp.eq.s32.totalorder %s101_s23, 0 }
   0xc   : > { %p3262_p8 = por %p123_p5, %p122_p3  ;;  %p130_p9 = scmp.lt.s32.totalorder %s3190_s17, 3 }
   0xd   : > { %s3268_s25 = scalar_select %p104_p7, %s3178_s14, %s106_s21  }
   0xe   : > { %p131_p10 = pnand %p2707_p6, %p130_p9  ;;  %p3039_p11 = scmp.eq.s32.totalorder %s2705_s18, 0 }
   0xf   : > { %s142_s28 = sshll.u32 %s5079_s0, 4  ;;  %s3192_s29 = smov [#allocation2]   ;;  %s143_s28 = int_to_ptr.vmem [resolvable:$true] %s142_s28 }
  0x10   : > { %p3031_p12 = pneg %p131_p10  ;;  %166 = sbr.rel (%p131_p10) target bundleno = 831 (0x33f), region = 32 }
  0x12   : > { %p3032_p13 = pnand %p3039_p11, %p3031_p12 }
  0x14   : > { %3034 = dma.vmem_to_smem (!%p3032_p13), %s143_s28, 64, %s3192_s29, [#allocation4]  }
  0x15   : > { %3161 = dma.done.wait (%p3039_p11), [#allocation4], 64  }
  0x16   : > { %3163 = vsyncadd (%p3039_p11), [#allocation4], 4294967232 }
  0x17   : > { %173 = sfence }
  0x18   : > { %v2719_v0 = vld [vmem:[%s5081_s2 + $0x8] sm:$0xff]  ;;  %p192_p0 = scmp.lt.s32.totalorder %s3182_s15, 1  ;;  %s306_s5 = sld [smem:[#allocation2]]  ;;  %v2784_v1 = vld [vmem:[%s5081_s2 + $0x10] sm:$0xff]  ;;  %v2817_v2 = vld [vmem:[%s5081_s2 + $0x18] sm:$0xff]  ;;  %vm907_vm0 = vcmask 1046528  }
  0x19   : > { %3021 = vmatpush.msra.mxu1 %v2719_v0  ;;  %3022 = vmatpush.msra.mxu2 %v2719_v0  ;;  %s2714_s6 = sld [smem:[#allocation2 + $0x80]]  ;;  %v858_v3 = vld [vmem:[%s5081_s2] sm:$0xff]  ;;  %vm990_vm1 = vcmask 64512   ;;  %vm1345_vm2 = vcmask 1045504   ;;  %s3020_s28 = sshll.u32 %s3182_s15, 8 }
  0x1a   : > { %s193_s19 = scalar_select %p192_p0, %s3182_s15, 1  ;;  %3023 = vmatpush.msra.mxu3 %v2719_v0  ;;  %1070 = vmatpush.msra.mxu0 %v2719_v0  ;;  %v2850_v47 = vld [vmem:[%s5081_s2 + $0x20] sm:$0xff] }
  0x1b   : > { %1507 = vmatpush.msrb.mxu2 %v2784_v1  ;;  %s2715_s21 = sld [smem:[#allocation2 + $0x100]]  ;;  %1247 = vmatpush.msrb.mxu1 %v858_v3  ;;  %s3128_s11 = scalar_lea.hbm %s5082_s3, 512 }
  0x1c   : > { %1660 = vmatpush.msrb.mxu3 %v2817_v2  ;;  %s3024_s23 = smul.u32 432, %s193_s19  ;;  %s2716_s26 = sld [smem:[#allocation2 + $0x1]]  ;;  %1817 = vmatpush.msrb.mxu0 %v2850_v47 }
  0x1d   : > { %s2717_s27 = sld [smem:[#allocation2 + $0x81]] }
  0x1e   : > { %s3290_s30 = scalar_lea.vmem %s5080_s1, %s3024_s23  ;;  %s2718_s4 = sld [smem:[#allocation2 + $0x101]]  ;;  %v3294_v6 = vstv %s306_s5 }
  0x1f   : > { %v210_v4 = vld [vmem:[%s3290_s30 + $0x60] sm:$0xff]  ;;  %v211_v5 = vld [vmem:[%s3290_s30 + $0x68] sm:$0xff]  ;;  %v3297_v10 = vstv %s2714_s6  ;;  %v212_v0 = vld [vmem:[%s3290_s30 + $0x70] sm:$0x3]  ;;  %s189_s23 = sand.u32 1, %s3174_s13  }
  0x20   : > { %v222_v7 = vld [vmem:[%s3290_s30 + $0xc0] sm:$0xff]  ;;  %v264_v8 = vmax.f32 %v210_v4, 0.0  ;;  %v265_v9 = vmax.f32 %v211_v5, 0.0  ;;  %v223_v11 = vld [vmem:[%s3290_s30 + $0xc8] sm:$0xff]  ;;  %s2602_s15 = scalar_lea.sflag [#allocation3], %s189_s23 }
  0x21   : > { %v276_v12 = vmax.f32 %v222_v7, 0.0  ;;  %v234_v13 = vld [vmem:[%s3290_s30 + $0x120] sm:$0xff]  ;;  %v235_v14 = vld [vmem:[%s3290_s30 + $0x128] sm:$0xff]  ;;  %v3302_v15 = vstv %s2715_s21  ;;  %v277_v16 = vmax.f32 %v223_v11, 0.0  ;;  %v224_v11 = vld [vmem:[%s3290_s30 + $0xd0] sm:$0x3] }
  0x22   : > { %v288_v17 = vmax.f32 %v234_v13, 0.0  ;;  %v289_v18 = vmax.f32 %v235_v14, 0.0  ;;  %v322_v19 = vmin.f32 %v264_v8, %v3294_v6  ;;  %v323_v20 = vmin.f32 %v265_v9, %v3294_v6 }
  0x23   : > { %v3306_v21 = vstv %s2716_s26  ;;  %v334_v22 = vmin.f32 %v276_v12, %v3294_v6  ;;  %v3311_v25 = vstv %s2717_s27  ;;  %v335_v26 = vmin.f32 %v277_v16, %v3294_v6  ;;  %s2712_s26 = sshll.u32 %s189_s23, 8 }
  0x24   : > { %v598_v23 = vmin.f32 %v264_v8, %v3306_v21  ;;  %v599_v24 = vmin.f32 %v265_v9, %v3306_v21  ;;  %v377_v27 = vmul.f32 %v3297_v10, %v322_v19  ;;  %v378_v28 = vmul.f32 %v3297_v10, %v323_v20  ;;  %s4814_s27 = scalar_lea.vmem [#allocation5], %s2712_s26 }
  0x25   : > { %v3316_v29 = vstv %s2718_s4  ;;  %v389_v30 = vmul.f32 %v3297_v10, %v334_v22  ;;  %v390_v33 = vmul.f32 %v3297_v10, %v335_v26  ;;  %v610_v34 = vmin.f32 %v276_v12, %v3306_v21  ;;  %s2616_s4 = scalar_lea.hbm %s5082_s3, %s3020_s28  ;;  %s2617_s5 = sshll.u32 %s4814_s27, 4  ;;  %s2618_s5 = int_to_ptr.vmem [resolvable:$true] %s2617_s5 }
  0x26   : > { %v653_v31 = vmul.f32 %v3311_v25, %v598_v23  ;;  %v654_v32 = vmul.f32 %v3311_v25, %v599_v24  ;;  %v431_v35 = vfloor.f32 %v377_v27  ;;  %v432_v36 = vfloor.f32 %v378_v28  ;;  %s2619_s6 = sshll.u32 %s2616_s4, 4  ;;  %s2620_s6 = int_to_ptr.hbm [resolvable:$true] %s2619_s6 }
  0x27   : > { %v443_v37 = vfloor.f32 %v389_v30  ;;  %v611_v38 = vmin.f32 %v277_v16, %v3306_v21  ;;  %v444_v41 = vfloor.f32 %v390_v33  ;;  %v665_v42 = vmul.f32 %v3311_v25, %v610_v34  ;;  %s3122_s7 = sshra.s32 %s2620_s6, 4  ;;  %s3123_s7 = int_to_ptr.hbm [resolvable:$true] %s3122_s7 }
  0x28   : > { %v707_v39 = vfloor.f32 %v653_v31  ;;  %v708_v40 = vfloor.f32 %v654_v32  ;;  %v486_v43 = vmul.f32 %v3302_v15, %v431_v35  ;;  %v487_v44 = vmul.f32 %v3302_v15, %v432_v36  ;;  %s3124_s8 = scalar_lea.hbm %s3123_s7, 256  ;;  %p3129_p5 = scmp.lt.s32.totalorder %s3123_s7, %s5082_s3 }
  0x29   : > { %v498_v45 = vmul.f32 %v3302_v15, %v443_v37  ;;  %v666_v46 = vmul.f32 %v3311_v25, %v611_v38  ;;  %v499_v50 = vmul.f32 %v3302_v15, %v444_v41  ;;  %v719_v51 = vfloor.f32 %v665_v42  ;;  %p3125_p1 = scmp.ne.s32.totalorder %s3123_s7, %s3124_s8  ;;  %p3130_p6 = scmp.lt.s32.totalorder %s3128_s11, %s3124_s8 }
  0x2a   : > { %v762_v48 = vmul.f32 %v3316_v29, %v707_v39  ;;  %v763_v49 = vmul.f32 %v3316_v29, %v708_v40  ;;  %v346_v53 = vmin.f32 %v288_v17, %v3294_v6  ;;  %v347_v54 = vmin.f32 %v289_v18, %v3294_v6 }
  0x2b   : > { %v720_v52 = vfloor.f32 %v666_v46  ;;  %v622_v55 = vmin.f32 %v288_v17, %v3306_v21  ;;  %v774_v58 = vmul.f32 %v3316_v29, %v719_v51  ;;  %v623_v59 = vmin.f32 %v289_v18, %v3306_v21  ;;  %v198_v17 = vld [vmem:[%s3290_s30] sm:$0xff]  ;;  %v199_v18 = vld [vmem:[%s3290_s30 + $0x8] sm:$0xff]  ;;  %p3126_p2 = pnand %p3125_p1, %p3255_p4  ;;  %p3131_p7 = por %p3130_p6, %p3129_p5 }
  0x2c   : > { %v3338_v56 = vadd.f32 %v762_v48, %v486_v43  ;;  %v3340_v57 = vadd.f32 %v763_v49, %v487_v44  ;;  %v401_v61 = vmul.f32 %v3297_v10, %v346_v53  ;;  %v402_v62 = vmul.f32 %v3297_v10, %v347_v54 }
  0x2d   : > { %v775_v60 = vmul.f32 %v3316_v29, %v720_v52  ;;  %v677_v63 = vmul.f32 %v3311_v25, %v622_v55  ;;  %v3351_v3 = vadd.f32 %v774_v58, %v498_v45  ;;  %v678_v4 = vmul.f32 %v3311_v25, %v623_v59  ;;  %p3127_p3 = pneg %p3126_p2 }
  0x2e   : > { %v928_v1 = vrot.slane %v3338_v56, 1  ;;  %v929_v2 = vrot.slane %v3340_v57, 1  ;;  %v455_v7 = vfloor.f32 %v401_v61  ;;  %v456_v8 = vfloor.f32 %v402_v62 }
  0x2f   : > { %5217 = vst [vmem:[#allocation8_spill] sm:$0xff] %v3351_v3  ;;  %v3354_v5 = vadd.f32 %v775_v60, %v499_v50  ;;  %v731_v9 = vfloor.f32 %v677_v63  ;;  %v948_v13 = vrot.slane %v3351_v3, 1  ;;  %v732_v14 = vfloor.f32 %v678_v4  ;;  %v236_v50 = vld [vmem:[%s3290_s30 + $0x130] sm:$0x3]  ;;  %v214_v4 = vld [vmem:[%s3290_s30 + $0x80] sm:$0xff]  ;;  %p3132_p9 = pnand %p3131_p7, %p3127_p3 }
  0x30   : > { %v3360_v12 = vsel %vm907_vm0, %v928_v1, %v929_v2  ;;  %v266_v16 = vmax.f32 %v212_v0, 0.0  ;;  %v510_v20 = vmul.f32 %v3302_v15, %v455_v7  ;;  %v511_v22 = vmul.f32 %v3302_v15, %v456_v8  ;;  %v213_v1 = vld [vmem:[%s3290_s30 + $0x78] sm:$0xff] }
  0x31   : > { %5218 = vst [vmem:[#allocation9_spill] sm:$0xff] %v3354_v5  ;;  %2728 = vmatmul.msk.f32.vlgmr.msra.gmra.mxu1 %vm990_vm1, %v3360_v12  ;;  %v949_v19 = vrot.slane %v3354_v5, 1  ;;  %v786_v23 = vmul.f32 %v3316_v29, %v731_v9  ;;  %v787_v24 = vmul.f32 %v3316_v29, %v732_v14  ;;  %v278_v28 = vmax.f32 %v224_v11, 0.0 }
  0x32   : > { %v324_v26 = vmin.f32 %v266_v16, %v3294_v6  ;;  %v600_v27 = vmin.f32 %v266_v16, %v3306_v21  ;;  %v252_v32 = vmax.f32 %v198_v17, 0.0  ;;  %v253_v33 = vmax.f32 %v199_v18, 0.0 }
  0x33   : > { %v3377_v30 = vsel %vm907_vm0, %v948_v13, %v949_v19  ;;  %v3379_v31 = vadd.f32 %v786_v23, %v510_v20  ;;  %v3383_v34 = vadd.f32 %v787_v24, %v511_v22  ;;  %v336_v37 = vmin.f32 %v278_v28, %v3294_v6 }
  0x34   : > { %5219 = vst [vmem:[#allocation10_spill] sm:$0xff] %v3377_v30  ;;  %2736 = vmatmul.msk.f32.vlgmr.msra.gmra.mxu2 %vm990_vm1, %v3377_v30  ;;  %v379_v35 = vmul.f32 %v3297_v10, %v324_v26  ;;  %v655_v36 = vmul.f32 %v3311_v25, %v600_v27  ;;  %v612_v39 = vmin.f32 %v278_v28, %v3306_v21  ;;  %v290_v0 = vmax.f32 %v236_v50, 0.0 }
  0x35   : > { %5220 = vst [vmem:[#allocation11_spill] sm:$0xff] %v3379_v31  ;;  %v968_v38 = vrot.slane %v3379_v31, 1  ;;  %v310_v40 = vmin.f32 %v252_v32, %v3294_v6  ;;  %v311_v41 = vmin.f32 %v253_v33, %v3294_v6  ;;  %v969_v42 = vrot.slane %v3383_v34, 1 }
  0x36   : > { %5221 = vst [vmem:[#allocation12_spill] sm:$0xff] %v3383_v34  ;;  %v433_v43 = vfloor.f32 %v379_v35  ;;  %v709_v44 = vfloor.f32 %v655_v36  ;;  %v391_v45 = vmul.f32 %v3297_v10, %v336_v37  ;;  %v667_v46 = vmul.f32 %v3311_v25, %v612_v39 }
  0x37   : > { %v365_v47 = vmul.f32 %v3297_v10, %v310_v40  ;;  %v366_v48 = vmul.f32 %v3297_v10, %v311_v41  ;;  %v586_v49 = vmin.f32 %v252_v32, %v3306_v21  ;;  %v3402_v51 = vsel %vm907_vm0, %v968_v38, %v969_v42 }
  0x38   : > { %5222 = vst [vmem:[#allocation13_spill] sm:$0xff] %v3402_v51  ;;  %v488_v52 = vmul.f32 %v3302_v15, %v433_v43  ;;  %v764_v53 = vmul.f32 %v3316_v29, %v709_v44  ;;  %v445_v54 = vfloor.f32 %v391_v45  ;;  %2744 = vmatmul.msk.f32.vlgmr.msra.gmra.mxu3 %vm990_vm1, %v3402_v51  ;;  %v721_v55 = vfloor.f32 %v667_v46  ;;  %v225_v45 = vld [vmem:[%s3290_s30 + $0xd8] sm:$0xff]  ;;  %v226_v46 = vld [vmem:[%s3290_s30 + $0xe0] sm:$0xff] }
  0x39   : > { %v419_v58 = vfloor.f32 %v365_v47  ;;  %v420_v59 = vfloor.f32 %v366_v48  ;;  %v587_v60 = vmin.f32 %v253_v33, %v3306_v21  ;;  %v641_v63 = vmul.f32 %v3311_v25, %v586_v49 }
  0x3a   : > { %v3409_v61 = vadd.f32 %v764_v53, %v488_v52  ;;  %v500_v62 = vmul.f32 %v3302_v15, %v445_v54  ;;  %v776_v7 = vmul.f32 %v3316_v29, %v721_v55  ;;  %v348_v16 = vmin.f32 %v290_v0, %v3294_v6 }
  0x3b   : > { %v474_v8 = vmul.f32 %v3302_v15, %v419_v58  ;;  %v475_v9 = vmul.f32 %v3302_v15, %v420_v59  ;;  %v642_v11 = vmul.f32 %v3311_v25, %v587_v60  ;;  %v695_v14 = vfloor.f32 %v641_v63 }
  0x3c   : > { %v931_v13 = vrot.slane %v3409_v61, 1  ;;  %v624_v17 = vmin.f32 %v290_v0, %v3306_v21  ;;  %v3422_v18 = vadd.f32 %v776_v7, %v500_v62  ;;  %v267_v22 = vmax.f32 %v213_v1, 0.0  ;;  %v200_v62 = vld [vmem:[%s3290_s30 + $0x10] sm:$0x3] }
  0x3d   : > { %v696_v20 = vfloor.f32 %v642_v11  ;;  %v268_v23 = vmax.f32 %v214_v4, 0.0  ;;  %v750_v26 = vmul.f32 %v3316_v29, %v695_v14  ;;  %v403_v27 = vmul.f32 %v3297_v10, %v348_v16 }
  0x3e   : > { %v3427_v24 = vsel %vm907_vm0, %v929_v2, %v931_v13  ;;  %v679_v28 = vmul.f32 %v3311_v25, %v624_v17  ;;  %v951_v32 = vrot.slane %v3422_v18, 1  ;;  %v325_v35 = vmin.f32 %v267_v22, %v3294_v6 }
  0x3f   : > { %5223 = vst [vmem:[#allocation14_spill] sm:$0xff] %v3427_v24  ;;  %2729 = vmatmul.msk.f32.gmra.mxu1 %vm990_vm1, %v3427_v24  ;;  %v751_v33 = vmul.f32 %v3316_v29, %v696_v20  ;;  %v326_v2 = vmin.f32 %v268_v23, %v3294_v6  ;;  %v3438_v36 = vadd.f32 %v750_v26, %v474_v8  ;;  %v457_v37 = vfloor.f32 %v403_v27 }
  0x40   : > { %v733_v38 = vfloor.f32 %v679_v28  ;;  %v601_v39 = vmin.f32 %v267_v22, %v3306_v21  ;;  %v3444_v40 = vsel %vm907_vm0, %v949_v19, %v951_v32  ;;  %v380_v43 = vmul.f32 %v3297_v10, %v325_v35 }
  0x41   : > { %5224 = vst [vmem:[#allocation15_spill] sm:$0xff] %v3444_v40  ;;  %v3446_v41 = vadd.f32 %v751_v33, %v475_v9  ;;  %v381_v44 = vmul.f32 %v3297_v10, %v326_v2  ;;  %2737 = vmatmul.msk.f32.gmra.mxu2 %vm990_vm1, %v3444_v40  ;;  %v908_v47 = vrot.slane %v3438_v36, 1  ;;  %v512_v48 = vmul.f32 %v3302_v15, %v457_v37 }
  0x42   : > { %v788_v49 = vmul.f32 %v3316_v29, %v733_v38  ;;  %v602_v19 = vmin.f32 %v268_v23, %v3306_v21  ;;  %v434_v52 = vfloor.f32 %v380_v43  ;;  %v656_v54 = vmul.f32 %v3311_v25, %v601_v39  ;;  %v237_v38 = vld [vmem:[%s3290_s30 + $0x138] sm:$0xff] }
  0x43   : > { %v909_v50 = vrot.slane %v3446_v41, 1  ;;  %v435_v53 = vfloor.f32 %v381_v44  ;;  %v279_v59 = vmax.f32 %v225_v45, 0.0  ;;  %v280_v60 = vmax.f32 %v226_v46, 0.0  ;;  %v238_v46 = vld [vmem:[%s3290_s30 + $0x140] sm:$0xff] }
  0x44   : > { %v3460_v55 = vadd.f32 %v788_v49, %v512_v48  ;;  %v657_v58 = vmul.f32 %v3311_v25, %v602_v19  ;;  %v489_v0 = vmul.f32 %v3302_v15, %v434_v52  ;;  %v710_v4 = vfloor.f32 %v656_v54 }
  0x45   : > { %v910_v63 = vsel %vm907_vm0, %v908_v47, %v909_v50  ;;  %v490_v1 = vmul.f32 %v3302_v15, %v435_v53  ;;  %v337_v9 = vmin.f32 %v279_v59, %v3294_v6  ;;  %v338_v11 = vmin.f32 %v280_v60, %v3294_v6  ;;  %v215_v47 = vld [vmem:[%s3290_s30 + $0x88] sm:$0x3] }
  0x46   : > { %5225 = vst [vmem:[#allocation16_spill] sm:$0xff] %v3460_v55  ;;  %2720 = vmatmul.msk.f32.vlgmr.msra.gmra.mxu0 %vm990_vm1, %v910_v63  ;;  %v971_v7 = vrot.slane %v3460_v55, 1  ;;  %v711_v8 = vfloor.f32 %v657_v58  ;;  %v765_v13 = vmul.f32 %v3316_v29, %v710_v4  ;;  %v613_v14 = vmin.f32 %v279_v59, %v3306_v21 }
  0x47   : > { %v614_v16 = vmin.f32 %v280_v60, %v3306_v21  ;;  %v254_v17 = vmax.f32 %v200_v62, 0.0  ;;  %v392_v23 = vmul.f32 %v3297_v10, %v337_v9  ;;  %v393_v26 = vmul.f32 %v3297_v10, %v338_v11 }
  0x48   : > { %v3479_v20 = vsel %vm907_vm0, %v969_v42, %v971_v7  ;;  %v766_v22 = vmul.f32 %v3316_v29, %v711_v8  ;;  %v3486_v27 = vadd.f32 %v765_v13, %v489_v0  ;;  %v668_v28 = vmul.f32 %v3311_v25, %v613_v14 }
  0x49   : > { %5226 = vst [vmem:[#allocation17_spill] sm:$0xff] %v3479_v20  ;;  %2745 = vmatmul.msk.f32.gmra.mxu3 %vm990_vm1, %v3479_v20  ;;  %v669_v32 = vmul.f32 %v3311_v25, %v614_v16  ;;  %v312_v42 = vmin.f32 %v254_v17, %v3294_v6  ;;  %v446_v35 = vfloor.f32 %v392_v23  ;;  %v447_v2 = vfloor.f32 %v393_v26 }
  0x4a   : > { %5227 = vst [vmem:[#allocation18_spill] sm:$0xff] %v3486_v27  ;;  %v3491_v33 = vadd.f32 %v766_v22, %v490_v1  ;;  %v588_v37 = vmin.f32 %v254_v17, %v3306_v21  ;;  %v933_v39 = vrot.slane %v3486_v27, 1  ;;  %v722_v43 = vfloor.f32 %v668_v28 }
  0x4b   : > { %v723_v44 = vfloor.f32 %v669_v32  ;;  %v367_v45 = vmul.f32 %v3297_v10, %v312_v42  ;;  %v501_v49 = vmul.f32 %v3302_v15, %v446_v35  ;;  %v502_v19 = vmul.f32 %v3302_v15, %v447_v2  ;;  %v227_v35 = vld [vmem:[%s3290_s30 + $0xe8] sm:$0x3] }
  0x4c   : > { %5228 = vst [vmem:[#allocation19_spill] sm:$0xff] %v3491_v33  ;;  %v934_v48 = vrot.slane %v3491_v33, 1  ;;  %v643_v52 = vmul.f32 %v3311_v25, %v588_v37  ;;  %v777_v53 = vmul.f32 %v3316_v29, %v722_v43  ;;  %v291_v59 = vmax.f32 %v237_v38, 0.0 }
  0x4d   : > { %v778_v54 = vmul.f32 %v3316_v29, %v723_v44  ;;  %v421_v58 = vfloor.f32 %v367_v45  ;;  %v292_v63 = vmax.f32 %v238_v46, 0.0  ;;  %v269_v0 = vmax.f32 %v215_v47, 0.0 }
  0x4e   : > { %v3508_v60 = vsel %vm907_vm0, %v933_v39, %v934_v48  ;;  %v697_v62 = vfloor.f32 %v643_v52  ;;  %v3512_v1 = vadd.f32 %v777_v53, %v501_v49  ;;  %v349_v8 = vmin.f32 %v291_v59, %v3294_v6  ;;  %v201_v53 = vld [vmem:[%s3290_s30 + $0x18] sm:$0xff] }
  0x4f   : > { %5229 = vst [vmem:[#allocation20_spill] sm:$0xff] %v3508_v60  ;;  %2730 = vmatmul.msk.f32.gmra.mxu1 %vm990_vm1, %v3508_v60  ;;  %v3514_v4 = vadd.f32 %v778_v54, %v502_v19  ;;  %v476_v7 = vmul.f32 %v3302_v15, %v421_v58  ;;  %v350_v11 = vmin.f32 %v292_v63, %v3294_v6  ;;  %v281_v52 = vmax.f32 %v227_v35, 0.0  ;;  %v202_v54 = vld [vmem:[%s3290_s30 + $0x20] sm:$0xff] }
  0x50   : > { %5230 = vst [vmem:[#allocation21_spill] sm:$0xff] %v3512_v1  ;;  %v752_v9 = vmul.f32 %v3316_v29, %v697_v62  ;;  %v625_v13 = vmin.f32 %v291_v59, %v3306_v21  ;;  %v626_v14 = vmin.f32 %v292_v63, %v3306_v21  ;;  %v953_v16 = vrot.slane %v3512_v1, 1 }
  0x51   : > { %5231 = vst [vmem:[#allocation22_spill] sm:$0xff] %v3514_v4  ;;  %v954_v17 = vrot.slane %v3514_v4, 1  ;;  %v404_v22 = vmul.f32 %v3297_v10, %v349_v8  ;;  %v327_v23 = vmin.f32 %v269_v0, %v3294_v6  ;;  %v405_v28 = vmul.f32 %v3297_v10, %v350_v11 }
  0x52   : > { %v3526_v26 = vadd.f32 %v752_v9, %v476_v7  ;;  %v680_v32 = vmul.f32 %v3311_v25, %v625_v13  ;;  %v681_v42 = vmul.f32 %v3311_v25, %v626_v14  ;;  %v603_v39 = vmin.f32 %v269_v0, %v3306_v21  ;;  %v239_v0 = vld [vmem:[%s3290_s30 + $0x148] sm:$0x3] }
  0x53   : > { %v3535_v2 = vsel %vm907_vm0, %v953_v16, %v954_v17  ;;  %v458_v37 = vfloor.f32 %v404_v22  ;;  %v382_v38 = vmul.f32 %v3297_v10, %v327_v23  ;;  %v459_v44 = vfloor.f32 %v405_v28 }
  0x54   : > { %5232 = vst [vmem:[#allocation23_spill] sm:$0xff] %v3535_v2  ;;  %2738 = vmatmul.msk.f32.gmra.mxu2 %vm990_vm1, %v3535_v2  ;;  %v911_v43 = vrot.slane %v3526_v26, 1  ;;  %v734_v45 = vfloor.f32 %v680_v32  ;;  %v735_v46 = vfloor.f32 %v681_v42  ;;  %v658_v19 = vmul.f32 %v3311_v25, %v603_v39 }
  0x55   : > { %v513_v47 = vmul.f32 %v3302_v15, %v458_v37  ;;  %v436_v49 = vfloor.f32 %v382_v38  ;;  %v514_v59 = vmul.f32 %v3302_v15, %v459_v44  ;;  %v339_v9 = vmin.f32 %v281_v52, %v3294_v6 }
  0x56   : > { %v912_v58 = vsel %vm907_vm0, %v909_v50, %v911_v43  ;;  %v789_v62 = vmul.f32 %v3316_v29, %v734_v45  ;;  %v790_v63 = vmul.f32 %v3316_v29, %v735_v46  ;;  %v712_v8 = vfloor.f32 %v658_v19 }
  0x57   : > { %2721 = vmatmul.msk.f32.gmra.mxu0 %vm990_vm1, %v912_v58  ;;  %v491_v7 = vmul.f32 %v3302_v15, %v436_v49  ;;  %v615_v11 = vmin.f32 %v281_v52, %v3306_v21  ;;  %v255_v50 = vmax.f32 %v201_v53, 0.0  ;;  %v256_v16 = vmax.f32 %v202_v54, 0.0 }
  0x58   : > { %v3557_v13 = vadd.f32 %v789_v62, %v513_v47  ;;  %v3559_v14 = vadd.f32 %v790_v63, %v514_v59  ;;  %v767_v22 = vmul.f32 %v3316_v29, %v712_v8  ;;  %v394_v23 = vmul.f32 %v3297_v10, %v339_v9 }
  0x59   : > { %v670_v28 = vmul.f32 %v3311_v25, %v615_v11  ;;  %v293_v32 = vmax.f32 %v239_v0, 0.0  ;;  %v313_v37 = vmin.f32 %v255_v50, %v3294_v6  ;;  %v314_v38 = vmin.f32 %v256_v16, %v3294_v6 }
  0x5a   : > { %5233 = vst [vmem:[#allocation24_spill] sm:$0xff] %v3557_v13  ;;  %v973_v42 = vrot.slane %v3557_v13, 1  ;;  %v974_v35 = vrot.slane %v3559_v14, 1  ;;  %v3568_v39 = vadd.f32 %v767_v22, %v491_v7  ;;  %v448_v43 = vfloor.f32 %v394_v23  ;;  %v216_v7 = vld [vmem:[%s3290_s30 + $0x90] sm:$0xff] }
  0x5b   : > { %5234 = vst [vmem:[#allocation25_spill] sm:$0xff] %v3559_v14  ;;  %v724_v44 = vfloor.f32 %v670_v28  ;;  %v589_v45 = vmin.f32 %v255_v50, %v3306_v21  ;;  %v368_v47 = vmul.f32 %v3297_v10, %v313_v37  ;;  %v369_v49 = vmul.f32 %v3297_v10, %v314_v38  ;;  %v228_v22 = vld [vmem:[%s3290_s30 + $0xf0] sm:$0xff] }
  0x5c   : > { %v3574_v46 = vsel %vm907_vm0, %v973_v42, %v974_v35  ;;  %v590_v19 = vmin.f32 %v256_v16, %v3306_v21  ;;  %v936_v52 = vrot.slane %v3568_v39, 1  ;;  %v503_v53 = vmul.f32 %v3302_v15, %v448_v43  ;;  %v217_v16 = vld [vmem:[%s3290_s30 + $0x98] sm:$0xff]  ;;  %v204_v14 = vld [vmem:[%s3290_s30 + $0x30] sm:$0xff] }
  0x5d   : > { %5235 = vst [vmem:[#allocation26_spill] sm:$0xff] %v3574_v46  ;;  %2746 = vmatmul.msk.f32.gmra.mxu3 %vm990_vm1, %v3574_v46  ;;  %v779_v54 = vmul.f32 %v3316_v29, %v724_v44  ;;  %v644_v58 = vmul.f32 %v3311_v25, %v589_v45  ;;  %v422_v59 = vfloor.f32 %v368_v47  ;;  %v423_v62 = vfloor.f32 %v369_v49 }
  0x5e   : > { %v645_v63 = vmul.f32 %v3311_v25, %v590_v19  ;;  %v351_v0 = vmin.f32 %v293_v32, %v3294_v6  ;;  %v3591_v8 = vsel %vm907_vm0, %v934_v48, %v936_v52  ;;  %v627_v50 = vmin.f32 %v293_v32, %v3306_v21 }
  0x5f   : > { %5236 = vst [vmem:[#allocation27_spill] sm:$0xff] %v3591_v8  ;;  %v3593_v9 = vadd.f32 %v779_v54, %v503_v53  ;;  %v698_v11 = vfloor.f32 %v644_v58  ;;  %2731 = vmatmul.msk.f32.gmra.mxu1 %vm990_vm1, %v3591_v8  ;;  %v477_v23 = vmul.f32 %v3302_v15, %v422_v59  ;;  %v478_v28 = vmul.f32 %v3302_v15, %v423_v62  ;;  %v229_v58 = vld [vmem:[%s3290_s30 + $0xf8] sm:$0xff] }
  0x60   : > { %v699_v42 = vfloor.f32 %v645_v63  ;;  %v406_v37 = vmul.f32 %v3297_v10, %v351_v0  ;;  %v682_v43 = vmul.f32 %v3311_v25, %v627_v50  ;;  %v270_v32 = vmax.f32 %v216_v7, 0.0 }
  0x61   : > { %5237 = vst [vmem:[#allocation28_spill] sm:$0xff] %v3593_v9  ;;  %v956_v48 = vrot.slane %v3593_v9, 1  ;;  %v753_v38 = vmul.f32 %v3316_v29, %v698_v11  ;;  %v271_v47 = vmax.f32 %v217_v16, 0.0  ;;  %v282_v49 = vmax.f32 %v228_v22, 0.0  ;;  %v233_v9 = vld [vmem:[%s3290_s30 + $0x118] sm:$0x3] }
  0x62   : > { %v754_v44 = vmul.f32 %v3316_v29, %v699_v42  ;;  %v460_v45 = vfloor.f32 %v406_v37  ;;  %v736_v53 = vfloor.f32 %v682_v43  ;;  %v328_v54 = vmin.f32 %v270_v32, %v3294_v6 }
  0x63   : > { %v3610_v19 = vsel %vm907_vm0, %v954_v17, %v956_v48  ;;  %v3612_v52 = vadd.f32 %v753_v38, %v477_v23  ;;  %v329_v63 = vmin.f32 %v271_v47, %v3294_v6  ;;  %v604_v0 = vmin.f32 %v270_v32, %v3306_v21 }
  0x64   : > { %5238 = vst [vmem:[#allocation29_spill] sm:$0xff] %v3610_v19  ;;  %2739 = vmatmul.msk.f32.gmra.mxu2 %vm990_vm1, %v3610_v19  ;;  %v3618_v59 = vadd.f32 %v754_v44, %v478_v28  ;;  %v515_v62 = vmul.f32 %v3302_v15, %v460_v45  ;;  %v791_v7 = vmul.f32 %v3316_v29, %v736_v53  ;;  %v283_v28 = vmax.f32 %v229_v58, 0.0 }
  0x65   : > { %v913_v17 = vrot.slane %v3612_v52, 1  ;;  %v383_v11 = vmul.f32 %v3297_v10, %v328_v54  ;;  %v605_v50 = vmin.f32 %v271_v47, %v3306_v21  ;;  %v384_v22 = vmul.f32 %v3297_v10, %v329_v63 }
  0x66   : > { %v5083_v16 = vrot.slane %v3618_v59, 1  ;;  %v659_v23 = vmul.f32 %v3311_v25, %v604_v0  ;;  %v3630_v42 = vadd.f32 %v791_v7, %v515_v62  ;;  %v340_v38 = vmin.f32 %v282_v49, %v3294_v6  ;;  %v203_v62 = vld [vmem:[%s3290_s30 + $0x28] sm:$0x3] }
  0x67   : > { %v437_v37 = vfloor.f32 %v383_v11  ;;  %v660_v48 = vmul.f32 %v3311_v25, %v605_v50  ;;  %v438_v32 = vfloor.f32 %v384_v22  ;;  %v341_v45 = vmin.f32 %v283_v28, %v3294_v6  ;;  %v240_v11 = vld [vmem:[%s3290_s30 + $0x150] sm:$0xff] }
  0x68   : > { %5239 = vst [vmem:[#allocation30_spill] sm:$0xff] %v3630_v42  ;;  %v3637_v43 = vsel %vm907_vm0, %v913_v17, %v5083_v16  ;;  %v713_v44 = vfloor.f32 %v659_v23  ;;  %v976_v47 = vrot.slane %v3630_v42, 1  ;;  %v395_v58 = vmul.f32 %v3297_v10, %v340_v38 }
  0x69   : > { %2722 = vmatmul.msk.f32.gmra.mxu0 %vm990_vm1, %v3637_v43  ;;  %v492_v53 = vmul.f32 %v3302_v15, %v437_v37  ;;  %v714_v54 = vfloor.f32 %v660_v48  ;;  %v493_v63 = vmul.f32 %v3302_v15, %v438_v32  ;;  %v396_v17 = vmul.f32 %v3297_v10, %v341_v45 }
  0x6a   : > { %v768_v0 = vmul.f32 %v3316_v29, %v713_v44  ;;  %v616_v7 = vmin.f32 %v282_v49, %v3306_v21  ;;  %v3654_v50 = vsel %vm907_vm0, %v974_v35, %v976_v47  ;;  %v449_v23 = vfloor.f32 %v395_v58  ;;  %v241_v44 = vld [vmem:[%s3290_s30 + $0x158] sm:$0xff] }
  0x6b   : > { %5240 = vst [vmem:[#allocation31_spill] sm:$0xff] %v3654_v50  ;;  %v769_v22 = vmul.f32 %v3316_v29, %v714_v54  ;;  %v617_v37 = vmin.f32 %v283_v28, %v3306_v21  ;;  %2747 = vmatmul.msk.f32.gmra.mxu3 %vm990_vm1, %v3654_v50  ;;  %v450_v38 = vfloor.f32 %v396_v17  ;;  %v257_v49 = vmax.f32 %v203_v62, 0.0  ;;  %v230_v50 = vld [vmem:[%s3290_s30 + $0x100] sm:$0x3] }
  0x6c   : > { %v3660_v48 = vadd.f32 %v768_v0, %v492_v53  ;;  %v671_v32 = vmul.f32 %v3311_v25, %v616_v7  ;;  %v504_v35 = vmul.f32 %v3302_v15, %v449_v23  ;;  %v294_v54 = vmax.f32 %v240_v11, 0.0 }
  0x6d   : > { %v3664_v45 = vadd.f32 %v769_v22, %v493_v63  ;;  %v672_v47 = vmul.f32 %v3311_v25, %v617_v37  ;;  %v505_v28 = vmul.f32 %v3302_v15, %v450_v38  ;;  %v315_v53 = vmin.f32 %v257_v49, %v3294_v6 }
  0x6e   : > { %5241 = vst [vmem:[#allocation32_spill] sm:$0xff] %v3660_v48  ;;  %v938_v58 = vrot.slane %v3660_v48, 1  ;;  %v725_v16 = vfloor.f32 %v671_v32  ;;  %v591_v62 = vmin.f32 %v257_v49, %v3306_v21  ;;  %v295_v7 = vmax.f32 %v241_v44, 0.0 }
  0x6f   : > { %5242 = vst [vmem:[#allocation33_spill] sm:$0xff] %v3664_v45  ;;  %v5084_v0 = vrot.slane %v3664_v45, 1  ;;  %v726_v17 = vfloor.f32 %v672_v47  ;;  %v370_v22 = vmul.f32 %v3297_v10, %v315_v53  ;;  %v352_v11 = vmin.f32 %v294_v54, %v3294_v6 }
  0x70   : > { %v780_v63 = vmul.f32 %v3316_v29, %v725_v16  ;;  %v628_v23 = vmin.f32 %v294_v54, %v3306_v21  ;;  %v646_v32 = vmul.f32 %v3311_v25, %v591_v62  ;;  %v353_v49 = vmin.f32 %v295_v7, %v3294_v6  ;;  %v218_v62 = vld [vmem:[%s3290_s30 + $0xa0] sm:$0x3] }
  0x71   : > { %v3680_v37 = vsel %vm907_vm0, %v938_v58, %v5084_v0  ;;  %v781_v38 = vmul.f32 %v3316_v29, %v726_v17  ;;  %v424_v44 = vfloor.f32 %v370_v22  ;;  %v407_v47 = vmul.f32 %v3297_v10, %v352_v11 }
  0x72   : > { %5243 = vst [vmem:[#allocation34_spill] sm:$0xff] %v3680_v37  ;;  %2732 = vmatmul.msk.f32.gmra.mxu1 %vm990_vm1, %v3680_v37  ;;  %v3687_v16 = vadd.f32 %v780_v63, %v504_v35  ;;  %v629_v54 = vmin.f32 %v295_v7, %v3306_v21  ;;  %v700_v58 = vfloor.f32 %v646_v32  ;;  %v408_v0 = vmul.f32 %v3297_v10, %v353_v49 }
  0x73   : > { %v3691_v53 = vadd.f32 %v781_v38, %v505_v28  ;;  %v683_v17 = vmul.f32 %v3311_v25, %v628_v23  ;;  %v479_v35 = vmul.f32 %v3302_v15, %v424_v44  ;;  %v461_v63 = vfloor.f32 %v407_v47 }
  0x74   : > { %5244 = vst [vmem:[#allocation35_spill] sm:$0xff] %v3687_v16  ;;  %v958_v42 = vrot.slane %v3687_v16, 1  ;;  %v684_v22 = vmul.f32 %v3311_v25, %v629_v54  ;;  %v755_v28 = vmul.f32 %v3316_v29, %v700_v58  ;;  %v462_v7 = vfloor.f32 %v408_v0 }
  0x75   : > { %5245 = vst [vmem:[#allocation36_spill] sm:$0xff] %v3691_v53  ;;  %v5092_v11 = vrot.slane %v3691_v53, 1  ;;  %v737_v38 = vfloor.f32 %v683_v17  ;;  %v516_v32 = vmul.f32 %v3302_v15, %v461_v63  ;;  %v272_v23 = vmax.f32 %v218_v62, 0.0  ;;  %v205_v63 = vld [vmem:[%s3290_s30 + $0x38] sm:$0xff] }
  0x76   : > { %v738_v49 = vfloor.f32 %v684_v22  ;;  %v284_v46 = vmax.f32 %v230_v50, 0.0  ;;  %v3709_v47 = vadd.f32 %v755_v28, %v479_v35  ;;  %v517_v54 = vmul.f32 %v3302_v15, %v462_v7 }
  0x77   : > { %v3707_v44 = vsel %vm907_vm0, %v958_v42, %v5092_v11  ;;  %v792_v58 = vmul.f32 %v3316_v29, %v737_v38  ;;  %v330_v17 = vmin.f32 %v272_v23, %v3294_v6  ;;  %v606_v50 = vmin.f32 %v272_v23, %v3306_v21 }
  0x78   : > { %5246 = vst [vmem:[#allocation37_spill] sm:$0xff] %v3707_v44  ;;  %2740 = vmatmul.msk.f32.gmra.mxu2 %vm990_vm1, %v3707_v44  ;;  %v793_v0 = vmul.f32 %v3316_v29, %v738_v49  ;;  %v342_v62 = vmin.f32 %v284_v46, %v3294_v6  ;;  %v916_v42 = vrot.slane %v3709_v47, 1  ;;  %v618_v22 = vmin.f32 %v284_v46, %v3306_v21 }
  0x79   : > { %v3721_v35 = vadd.f32 %v792_v58, %v516_v32  ;;  %v258_v28 = vmax.f32 %v204_v14, 0.0  ;;  %v385_v38 = vmul.f32 %v3297_v10, %v330_v17  ;;  %v661_v49 = vmul.f32 %v3311_v25, %v606_v50 }
  0x7a   : > { %v3724_v7 = vadd.f32 %v793_v0, %v517_v54  ;;  %v397_v23 = vmul.f32 %v3297_v10, %v342_v62  ;;  %v5249_v11 = vrot.slane %v3618_v59, 1  ;;  %v673_v46 = vmul.f32 %v3311_v25, %v618_v22 }
  0x7b   : > { %5247 = vst [vmem:[#allocation38_spill] sm:$0xff] %v3721_v35  ;;  %v978_v32 = vrot.slane %v3721_v35, 1  ;;  %v259_v14 = vmax.f32 %v205_v63, 0.0  ;;  %v439_v58 = vfloor.f32 %v385_v38  ;;  %v715_v0 = vfloor.f32 %v661_v49  ;;  %v219_v35 = vld [vmem:[%s3290_s30 + $0xa8] sm:$0xff] }
  0x7c   : > { %5248 = vst [vmem:[#allocation39_spill] sm:$0xff] %v3724_v7  ;;  %v3732_v13 = vsel %vm907_vm0, %v5249_v11, %v916_v42  ;;  %v5100_v54 = vrot.slane %v3724_v7, 1  ;;  %v451_v17 = vfloor.f32 %v397_v23  ;;  %v727_v50 = vfloor.f32 %v673_v46  ;;  %v242_v42 = vld [vmem:[%s3290_s30 + $0x160] sm:$0x3] }
  0x7d   : > { %2723 = vmatmul.msk.f32.gmra.mxu0 %vm990_vm1, %v3732_v13  ;;  %v316_v62 = vmin.f32 %v258_v28, %v3294_v6  ;;  %v317_v20 = vmin.f32 %v259_v14, %v3294_v6  ;;  %v592_v11 = vmin.f32 %v258_v28, %v3306_v21  ;;  %v494_v22 = vmul.f32 %v3302_v15, %v439_v58 }
  0x7e   : > { %v3747_v63 = vsel %vm907_vm0, %v978_v32, %v5100_v54  ;;  %v770_v38 = vmul.f32 %v3316_v29, %v715_v0  ;;  %v506_v49 = vmul.f32 %v3302_v15, %v451_v17  ;;  %v782_v23 = vmul.f32 %v3316_v29, %v727_v50 }
  0x7f   : > { %5250 = vst [vmem:[#allocation40_spill] sm:$0xff] %v3747_v63  ;;  %2748 = vmatmul.msk.f32.gmra.mxu3 %vm990_vm1, %v3747_v63  ;;  %v371_v28 = vmul.f32 %v3297_v10, %v316_v62  ;;  %v372_v46 = vmul.f32 %v3297_v10, %v317_v20  ;;  %v593_v55 = vmin.f32 %v259_v14, %v3306_v21  ;;  %v296_v54 = vmax.f32 %v242_v42, 0.0  ;;  %v220_v14 = vld [vmem:[%s3290_s30 + $0xb0] sm:$0xff] }
  0x80   : > { %v3758_v32 = vadd.f32 %v770_v38, %v494_v22  ;;  %v647_v58 = vmul.f32 %v3311_v25, %v592_v11  ;;  %v273_v0 = vmax.f32 %v219_v35, 0.0  ;;  %v3761_v51 = vadd.f32 %v782_v23, %v506_v49 }
  0x81   : > { %v425_v17 = vfloor.f32 %v371_v28  ;;  %v426_v34 = vfloor.f32 %v372_v46  ;;  %v648_v63 = vmul.f32 %v3311_v25, %v593_v55  ;;  %v354_v62 = vmin.f32 %v296_v54, %v3294_v6 }
  0x82   : > { %5251 = vst [vmem:[#allocation41_spill] sm:$0xff] %v3761_v51  ;;  %v941_v50 = vrot.slane %v3758_v32, 1  ;;  %v701_v31 = vfloor.f32 %v647_v58  ;;  %v630_v20 = vmin.f32 %v296_v54, %v3306_v21  ;;  %v961_v22 = vrot.slane %v3761_v51, 1 }
  0x83   : > { %v480_v11 = vmul.f32 %v3302_v15, %v425_v17  ;;  %v481_v35 = vmul.f32 %v3302_v15, %v426_v34  ;;  %v702_v42 = vfloor.f32 %v648_v63  ;;  %v5252_v38 = vrot.slane %v3664_v45, 1 }
  0x84   : > { %v756_v55 = vmul.f32 %v3316_v29, %v701_v31  ;;  %v409_v23 = vmul.f32 %v3297_v10, %v354_v62  ;;  %v685_v54 = vmul.f32 %v3311_v25, %v630_v20  ;;  %v5254_v28 = vrot.slane %v3691_v53, 1 }
  0x85   : > { %v3774_v49 = vsel %vm907_vm0, %v5252_v38, %v941_v50  ;;  %v757_v63 = vmul.f32 %v3316_v29, %v702_v42  ;;  %v274_v46 = vmax.f32 %v220_v14, 0.0  ;;  %v331_v58 = vmin.f32 %v273_v0, %v3294_v6  ;;  %v231_v14 = vld [vmem:[%s3290_s30 + $0x108] sm:$0xff] }
  0x86   : > { %5253 = vst [vmem:[#allocation42_spill] sm:$0xff] %v3774_v49  ;;  %2733 = vmatmul.msk.f32.gmra.mxu1 %vm990_vm1, %v3774_v49  ;;  %v3784_v34 = vsel %vm907_vm0, %v5254_v28, %v961_v22  ;;  %v3790_v31 = vadd.f32 %v756_v55, %v480_v11  ;;  %v463_v17 = vfloor.f32 %v409_v23  ;;  %v739_v50 = vfloor.f32 %v685_v54  ;;  %v232_v28 = vld [vmem:[%s3290_s30 + $0x110] sm:$0xff] }
  0x87   : > { %5255 = vst [vmem:[#allocation43_spill] sm:$0xff] %v3784_v34  ;;  %2741 = vmatmul.msk.f32.gmra.mxu2 %vm990_vm1, %v3784_v34  ;;  %v607_v62 = vmin.f32 %v273_v0, %v3306_v21  ;;  %v3793_v20 = vadd.f32 %v757_v63, %v481_v35  ;;  %v332_v38 = vmin.f32 %v274_v46, %v3294_v6  ;;  %v286_v44 = vmax.f32 %v232_v28, 0.0 }
  0x88   : > { %v386_v22 = vmul.f32 %v3297_v10, %v331_v58  ;;  %v608_v42 = vmin.f32 %v274_v46, %v3306_v21  ;;  %v918_v51 = vrot.slane %v3790_v31, 1  ;;  %v518_v34 = vmul.f32 %v3302_v15, %v463_v17 }
  0x89   : > { %v794_v11 = vmul.f32 %v3316_v29, %v739_v50  ;;  %v662_v55 = vmul.f32 %v3311_v25, %v607_v62  ;;  %v5116_v0 = vrot.slane %v3793_v20, 1  ;;  %v387_v35 = vmul.f32 %v3297_v10, %v332_v38 }
  0x8a   : > { %v440_v23 = vfloor.f32 %v386_v22  ;;  %v663_v54 = vmul.f32 %v3311_v25, %v608_v42  ;;  %v285_v58 = vmax.f32 %v231_v14, 0.0  ;;  %v344_v42 = vmin.f32 %v286_v44, %v3294_v6  ;;  %v206_v14 = vld [vmem:[%s3290_s30 + $0x40] sm:$0x3] }
  0x8b   : > { %v3807_v63 = vadd.f32 %v794_v11, %v518_v34  ;;  %v716_v46 = vfloor.f32 %v662_v55  ;;  %v3812_v17 = vsel %vm907_vm0, %v918_v51, %v5116_v0  ;;  %v441_v50 = vfloor.f32 %v387_v35  ;;  %v243_v35 = vld [vmem:[%s3290_s30 + $0x168] sm:$0xff] }
  0x8c   : > { %v495_v62 = vmul.f32 %v3302_v15, %v440_v23  ;;  %v717_v53 = vfloor.f32 %v663_v54  ;;  %2724 = vmatmul.msk.f32.gmra.mxu0 %vm990_vm1, %v3812_v17  ;;  %v343_v22 = vmin.f32 %v285_v58, %v3294_v6  ;;  %v619_v11 = vmin.f32 %v285_v58, %v3306_v21 }
  0x8d   : > { %5256 = vst [vmem:[#allocation44_spill] sm:$0xff] %v3807_v63  ;;  %v981_v38 = vrot.slane %v3807_v63, 1  ;;  %v771_v34 = vmul.f32 %v3316_v29, %v716_v46  ;;  %v496_v51 = vmul.f32 %v3302_v15, %v441_v50  ;;  %v620_v55 = vmin.f32 %v286_v44, %v3306_v21 }
  0x8e   : > { %v772_v28 = vmul.f32 %v3316_v29, %v717_v53  ;;  %v5257_v23 = vrot.slane %v3724_v7, 1  ;;  %v398_v0 = vmul.f32 %v3297_v10, %v343_v22  ;;  %v399_v63 = vmul.f32 %v3297_v10, %v344_v42  ;;  %v244_v7 = vld [vmem:[%s3290_s30 + $0x170] sm:$0xff] }
  0x8f   : > { %v3832_v46 = vadd.f32 %v771_v34, %v495_v62  ;;  %v674_v58 = vmul.f32 %v3311_v25, %v619_v11  ;;  %v675_v44 = vmul.f32 %v3311_v25, %v620_v55  ;;  %v260_v50 = vmax.f32 %v206_v14, 0.0  ;;  %v2916_v14 = vld [vmem:[%s5081_s2 + $0x30] sm:$0xff] }
  0x90   : > { %v3830_v54 = vsel %vm907_vm0, %v5257_v23, %v981_v38  ;;  %v3838_v53 = vadd.f32 %v772_v28, %v496_v51  ;;  %v452_v23 = vfloor.f32 %v398_v0  ;;  %v453_v62 = vfloor.f32 %v399_v63  ;;  %2126 = vmatpush.msra.mxu2 %v2916_v14 }
  0x91   : > { %5258 = vst [vmem:[#allocation45_spill] sm:$0xff] %v3830_v54  ;;  %2749 = vmatmul.msk.f32.gmra.mxu3 %vm990_vm1, %v3830_v54  ;;  %v943_v38 = vrot.slane %v3832_v46, 1  ;;  %v297_v34 = vmax.f32 %v243_v35, 0.0  ;;  %v728_v16 = vfloor.f32 %v674_v58  ;;  %v729_v42 = vfloor.f32 %v675_v44  ;;  %v221_v54 = vld [vmem:[%s3290_s30 + $0xb8] sm:$0x3] }
  0x92   : > { %5259 = vst [vmem:[#allocation46_spill] sm:$0xff] %v3832_v46  ;;  %v5124_v22 = vrot.slane %v3838_v53, 1  ;;  %v318_v19 = vmin.f32 %v260_v50, %v3294_v6  ;;  %v507_v51 = vmul.f32 %v3302_v15, %v452_v23  ;;  %v508_v28 = vmul.f32 %v3302_v15, %v453_v62 }
  0x93   : > { %5260 = vst [vmem:[#allocation47_spill] sm:$0xff] %v3838_v53  ;;  %v594_v11 = vmin.f32 %v260_v50, %v3306_v21  ;;  %v298_v55 = vmax.f32 %v244_v7, 0.0  ;;  %v783_v63 = vmul.f32 %v3316_v29, %v728_v16  ;;  %v784_v35 = vmul.f32 %v3316_v29, %v729_v42 }
  0x94   : > { %v3855_v0 = vsel %vm907_vm0, %v943_v38, %v5124_v22  ;;  %v373_v58 = vmul.f32 %v3297_v10, %v318_v19  ;;  %v355_v44 = vmin.f32 %v297_v34, %v3294_v6  ;;  %v631_v38 = vmin.f32 %v297_v34, %v3306_v21 }
  0x95   : > { %5261 = vst [vmem:[#allocation48_spill] sm:$0xff] %v3855_v0  ;;  %2734 = vmatmul.msk.f32.gmra.mxu1 %vm990_vm1, %v3855_v0  ;;  %v649_v7 = vmul.f32 %v3311_v25, %v594_v11  ;;  %v356_v50 = vmin.f32 %v298_v55, %v3294_v6  ;;  %v3866_v23 = vadd.f32 %v783_v63, %v507_v51  ;;  %v5266_v4 = vrot.slane %v3793_v20, 1 }
  0x96   : > { %v3868_v16 = vadd.f32 %v784_v35, %v508_v28  ;;  %v427_v62 = vfloor.f32 %v373_v58  ;;  %v632_v19 = vmin.f32 %v298_v55, %v3306_v21  ;;  %v410_v14 = vmul.f32 %v3297_v10, %v355_v44 }
  0x97   : > { %5262 = vst [vmem:[#allocation49_spill] sm:$0xff] %v3866_v23  ;;  %v703_v42 = vfloor.f32 %v649_v7  ;;  %v411_v22 = vmul.f32 %v3297_v10, %v356_v50  ;;  %v686_v11 = vmul.f32 %v3311_v25, %v631_v38  ;;  %v963_v2 = vrot.slane %v3866_v23, 1  ;;  %v207_v23 = vld [vmem:[%s3290_s30 + $0x48] sm:$0xff] }
  0x98   : > { %5263 = vst [vmem:[#allocation50_spill] sm:$0xff] %v3868_v16  ;;  %v5132_v34 = vrot.slane %v3868_v16, 1  ;;  %v482_v51 = vmul.f32 %v3302_v15, %v427_v62  ;;  %v687_v28 = vmul.f32 %v3311_v25, %v632_v19  ;;  %v464_v63 = vfloor.f32 %v410_v14 }
  0x99   : > { %v758_v55 = vmul.f32 %v3316_v29, %v703_v42  ;;  %v465_v35 = vfloor.f32 %v411_v22  ;;  %v740_v58 = vfloor.f32 %v686_v11  ;;  %v275_v50 = vmax.f32 %v221_v54, 0.0 }
  0x9a   : > { %v3884_v7 = vsel %vm907_vm0, %v963_v2, %v5132_v34  ;;  %v741_v44 = vfloor.f32 %v687_v28  ;;  %v287_v38 = vmax.f32 %v233_v9, 0.0  ;;  %v519_v19 = vmul.f32 %v3302_v15, %v464_v63  ;;  %v2949_v2 = vld [vmem:[%s5081_s2 + $0x38] sm:$0xff]  ;;  %v2883_v9 = vld [vmem:[%s5081_s2 + $0x28] sm:$0xff]  ;;  %v208_v28 = vld [vmem:[%s3290_s30 + $0x50] sm:$0xff] }
  0x9b   : > { %5264 = vst [vmem:[#allocation51_spill] sm:$0xff] %v3884_v7  ;;  %2742 = vmatmul.msk.f32.gmra.mxu2 %vm990_vm1, %v3884_v7  ;;  %v3889_v62 = vadd.f32 %v758_v55, %v482_v51  ;;  %v520_v22 = vmul.f32 %v3302_v15, %v465_v35  ;;  %v795_v42 = vmul.f32 %v3316_v29, %v740_v58  ;;  %v261_v58 = vmax.f32 %v207_v23, 0.0 }
  0x9c   : > { %v796_v54 = vmul.f32 %v3316_v29, %v741_v44  ;;  %v333_v14 = vmin.f32 %v275_v50, %v3294_v6  ;;  %v609_v11 = vmin.f32 %v275_v50, %v3306_v21  ;;  %v345_v51 = vmin.f32 %v287_v38, %v3294_v6  ;;  %2283 = vmatpush.msra.mxu3 %v2949_v2 }
  0x9d   : > { %v921_v55 = vrot.slane %v3889_v62, 1  ;;  %v3906_v63 = vadd.f32 %v795_v42, %v519_v19  ;;  %v621_v35 = vmin.f32 %v287_v38, %v3306_v21  ;;  %1973 = vmatpush.msra.mxu1 %v2883_v9  ;;  %v262_v23 = vmax.f32 %v208_v28, 0.0 }
  0x9e   : > { %v3909_v34 = vadd.f32 %v796_v54, %v520_v22  ;;  %v388_v44 = vmul.f32 %v3297_v10, %v333_v14  ;;  %v664_v7 = vmul.f32 %v3311_v25, %v609_v11  ;;  %v400_v50 = vmul.f32 %v3297_v10, %v345_v51 }
  0x9f   : > { %5265 = vst [vmem:[#allocation52_spill] sm:$0xff] %v3906_v63  ;;  %v3917_v2 = vsel %vm907_vm0, %v5266_v4, %v921_v55  ;;  %v983_v19 = vrot.slane %v3906_v63, 1  ;;  %v676_v38 = vmul.f32 %v3311_v25, %v621_v35  ;;  %v319_v11 = vmin.f32 %v261_v58, %v3294_v6  ;;  %v245_v55 = vld [vmem:[%s3290_s30 + $0x178] sm:$0x3] }
  0xa0   : > { %2725 = vmatmul.msk.f32.gmra.mxu0 %vm990_vm1, %v3917_v2  ;;  %v5139_v22 = vrot.slane %v3909_v34, 1  ;;  %v442_v42 = vfloor.f32 %v388_v44  ;;  %v718_v9 = vfloor.f32 %v664_v7  ;;  %v454_v54 = vfloor.f32 %v400_v50 }
  0xa1   : > { %v730_v14 = vfloor.f32 %v676_v38  ;;  %v320_v51 = vmin.f32 %v262_v23, %v3294_v6  ;;  %v595_v4 = vmin.f32 %v261_v58, %v3306_v21  ;;  %v374_v50 = vmul.f32 %v3297_v10, %v319_v11 }
  0xa2   : > { %v3931_v28 = vsel %vm907_vm0, %v983_v19, %v5139_v22  ;;  %v497_v35 = vmul.f32 %v3302_v15, %v442_v42  ;;  %v773_v63 = vmul.f32 %v3316_v29, %v718_v9  ;;  %v509_v7 = vmul.f32 %v3302_v15, %v454_v54  ;;  %v2982_v19 = vld [vmem:[%s5081_s2 + $0x40] sm:$0xff] }
  0xa3   : > { %5267 = vst [vmem:[#allocation53_spill] sm:$0xff] %v3931_v28  ;;  %2750 = vmatmul.msk.f32.gmra.mxu3 %vm990_vm1, %v3931_v28  ;;  %v785_v44 = vmul.f32 %v3316_v29, %v730_v14  ;;  %v375_v58 = vmul.f32 %v3297_v10, %v320_v51  ;;  %v596_v38 = vmin.f32 %v262_v23, %v3306_v21  ;;  %v299_v54 = vmax.f32 %v245_v55, 0.0 }
  0xa4   : > { %v3945_v42 = vadd.f32 %v773_v63, %v497_v35  ;;  %v650_v9 = vmul.f32 %v3311_v25, %v595_v4  ;;  %2439 = vmatpush.msra.mxu0 %v2982_v19  ;;  %v428_v14 = vfloor.f32 %v374_v50 }
  0xa5   : > { %v3948_v22 = vadd.f32 %v785_v44, %v509_v7  ;;  %v429_v28 = vfloor.f32 %v375_v58  ;;  %v651_v11 = vmul.f32 %v3311_v25, %v596_v38  ;;  %v357_v1 = vmin.f32 %v299_v54, %v3294_v6  ;;  %v209_v7 = vld [vmem:[%s3290_s30 + $0x58] sm:$0x3] }
  0xa6   : > { %v946_v51 = vrot.slane %v3945_v42, 1  ;;  %v704_v23 = vfloor.f32 %v650_v9  ;;  %v633_v40 = vmin.f32 %v299_v54, %v3306_v21  ;;  %v483_v35 = vmul.f32 %v3302_v15, %v428_v14 }
  0xa7   : > { %v966_v63 = vrot.slane %v3948_v22, 1  ;;  %v484_v4 = vmul.f32 %v3302_v15, %v429_v28  ;;  %v705_v55 = vfloor.f32 %v651_v11  ;;  %v5268_v44 = vrot.slane %v3838_v53, 1 }
  0xa8   : > { %v759_v58 = vmul.f32 %v3316_v29, %v704_v23  ;;  %v412_v38 = vmul.f32 %v3297_v10, %v357_v1  ;;  %v688_v19 = vmul.f32 %v3311_v25, %v633_v40  ;;  %v5270_v9 = vrot.slane %v3868_v16, 1 }
  0xa9   : > { %v3961_v50 = vsel %vm907_vm0, %v5268_v44, %v946_v51  ;;  %v760_v54 = vmul.f32 %v3316_v29, %v705_v55  ;;  %v263_v1 = vmax.f32 %v209_v7, 0.0  ;;  %v1346_v40 = vrot.slane %v3438_v36, 2 }
  0xaa   : > { %5269 = vst [vmem:[#allocation54_spill] sm:$0xff] %v3961_v50  ;;  %2735 = vmatmul.msk.f32.gmra.mxu1 %vm990_vm1, %v3961_v50  ;;  %v3971_v28 = vsel %vm907_vm0, %v5270_v9, %v966_v63  ;;  %v3976_v14 = vadd.f32 %v759_v58, %v483_v35  ;;  %v466_v11 = vfloor.f32 %v412_v38  ;;  %v742_v51 = vfloor.f32 %v688_v19 }
  0xab   : > { %5271 = vst [vmem:[#allocation55_spill] sm:$0xff] %v3971_v28  ;;  %2743 = vmatmul.msk.f32.gmra.mxu2 %vm990_vm1, %v3971_v28  ;;  %v3978_v23 = vadd.f32 %v760_v54, %v484_v4  ;;  %v1347_v44 = vrot.slane %v3446_v41, 2  ;;  %v321_v28 = vmin.f32 %v263_v1, %v3294_v6  ;;  %v597_v58 = vmin.f32 %v263_v1, %v3306_v21 }
  0xac   : > { %v923_v63 = vrot.slane %v3976_v14, 1  ;;  %v521_v9 = vmul.f32 %v3302_v15, %v466_v11  ;;  %v797_v55 = vmul.f32 %v3316_v29, %v742_v51 }
  0xad   : > { %v924_v35 = vrot.slane %v3978_v23, 1  ;;  %v376_v4 = vmul.f32 %v3297_v10, %v321_v28  ;;  %v1348_v19 = vsel %vm1345_vm2, %v1346_v40, %v1347_v44  ;;  %v652_v54 = vmul.f32 %v3311_v25, %v597_v58 }
  0xae   : > { %v3988_v7 = vadd.f32 %v797_v55, %v521_v9  ;;  %v5272_v9 = vrot.slane %v3909_v34, 1  ;;  %v1349_v55 = vrot.slane %v3526_v26, 2  ;;  %v1351_v26 = vrot.slane %v3612_v52, 2 }
  0xaf   : > { %v3992_v38 = vsel %vm907_vm0, %v923_v63, %v924_v35  ;;  %v430_v51 = vfloor.f32 %v376_v4  ;;  %v706_v1 = vfloor.f32 %v652_v54 }
  0xb0   : > { %2726 = vmatmul.msk.f32.gmra.mxu0 %vm990_vm1, %v3992_v38  ;;  %v986_v11 = vrot.slane %v3988_v7, 1 }
  0xb1   : > { %v485_v40 = vmul.f32 %v3302_v15, %v430_v51  ;;  %v761_v63 = vmul.f32 %v3316_v29, %v706_v1  ;;  %v1362_v51 = vrot.slane %v3978_v23, 2  ;;  %v4078_v1 = vpop.f32.mrf.mxu1 }
  0xb2   : > { %2752 = vmatmul.msk.f32.vlgmr.msrb.gmra.mxu1 %vm990_vm1, %v3438_v36  ;;  %v4004_v28 = vsel %vm907_vm0, %v5272_v9, %v986_v11  ;;  %v1350_v36 = vsel %vm1345_vm2, %v1347_v44, %v1349_v55  ;;  %v1361_v11 = vrot.slane %v3976_v14, 2 }
  0xb3   : > { %2785 = vmatmul.msk.f32.vlgmr.msrb.gmra.mxu2 %vm990_vm1, %v1348_v19  ;;  %2751 = vmatmul.msk.f32.gmra.mxu3 %vm990_vm1, %v4004_v28  ;;  %v815_v58 = vadd.f32 %v761_v63, %v485_v40  ;;  %v1352_v19 = vrot.slane %v3618_v59, 2 }
  0xb5   : > { %v926_v4 = vrot.slane %v815_v58, 1  ;;  %v4026_v44 = vsel %vm1345_vm2, %v1351_v26, %v1352_v19  ;;  %v1364_v9 = vrot.slane %v815_v58, 2  ;;  %v1366_v58 = vrot.slane %v3338_v56, 2 }
  0xb7   : > { %v4014_v54 = vsel %vm907_vm0, %v924_v35, %v926_v4  ;;  %v4089_v40 = vsel %vm1345_vm2, %v1362_v51, %v1364_v9  ;;  %v4091_v63 = vpop.f32.mrf.mxu2  ;;  %v1367_v4 = vrot.slane %v3340_v57, 2  ;;  %v1372_v9 = vrot.slane %v3491_v33, 2 }
  0xb8   : > { %2727 = vmatmul.msk.f32.gmra.mxu0 %vm990_vm1, %v4014_v54 }
  0xba   : > { %2753 = vmatmul.msk.f32.gmra.mxu1 %vm990_vm1, %v3446_v41  ;;  %v1354_v41 = vrot.slane %v3709_v47, 2 }
  0xbb   : > { %2786 = vmatmul.msk.f32.gmra.mxu2 %vm990_vm1, %v1350_v36  ;;  %2818 = vmatmul.msk.f32.vlgmr.msrb.gmra.mxu3 %vm990_vm1, %v3612_v52  ;;  %v4106_v36 = vsel %vm1345_vm2, %v1366_v58, %v1367_v4  ;;  %v4108_v26 = vpop.f32.mrf.mxu3 }
  0xbc   : > { %v4038_v35 = vsel %vm1345_vm2, %v1352_v19, %v1354_v41  ;;  %v4099_v55 = vpop.f32.mrf.mxu1  ;;  %5273 = vst [vmem:[#allocation56_spill] sm:$0xff] %v4106_v36 }
  0xbd   : > { %5274 = vst [vmem:[#allocation57_spill] sm:$0xff] %v4108_v26 }
  0xc0   : > { %2851 = vmatmul.msk.f32.vlgmr.msrb.gmra.mxu0 %vm990_vm1, %v3637_v43  ;;  %v1357_v43 = vrot.slane %v3793_v20, 2 }
  0xc2   : > { %2754 = vmatmul.msk.f32.gmra.mxu1 %vm990_vm1, %v3612_v52  ;;  %v1356_v52 = vrot.slane %v3790_v31, 2 }
  0xc3   : > { %2787 = vmatmul.msk.f32.gmra.mxu2 %vm990_vm1, %v4026_v44  ;;  %2819 = vmatmul.msk.f32.gmra.mxu3 %vm990_vm1, %v3618_v59  ;;  %v4112_v19 = vpop.f32.mrf.mxu0 }
  0xc4   : > { %v4051_v47 = vsel %vm1345_vm2, %v1356_v52, %v1357_v43  ;;  %v4114_v41 = vpop.f32.mrf.mxu2  ;;  %v1369_v52 = vrot.slane %v3409_v61, 2 }
  0xc8   : > { %2852 = vmatmul.msk.f32.gmra.mxu0 %vm990_vm1, %v3732_v13  ;;  %v1359_v13 = vrot.slane %v3889_v62, 2  ;;  %v4076_v62 = vsel %vm1345_vm2, %v1361_v11, %v1362_v51  ;;  %v1371_v51 = vrot.slane %v3486_v27, 2 }
  0xca   : > { %2755 = vmatmul.msk.f32.gmra.mxu1 %vm990_vm1, %v3618_v59  ;;  %v4063_v59 = vsel %vm1345_vm2, %v1357_v43, %v1359_v13  ;;  %v4126_v13 = vsel %vm1345_vm2, %v1367_v4, %v1369_v52  ;;  %v4147_v52 = vsel %vm1345_vm2, %v1371_v51, %v1372_v9 }
  0xcb   : > { %2788 = vmatmul.msk.f32.gmra.mxu2 %vm990_vm1, %v4038_v35  ;;  %2820 = vmatmul.msk.f32.gmra.mxu3 %vm990_vm1, %v3790_v31  ;;  %5275 = vst [vmem:[#allocation58_spill] sm:$0xff] %v4126_v13 }
  0xcc   : > { %v4123_v43 = vpop.f32.mrf.mxu1  ;;  %v4134_v11 = vpop.f32.mrf.mxu3  ;;  %5277 = vst [vmem:[#allocation60_spill] sm:$0xff] %v4147_v52 }
  0xcd   : > { %5276 = vst [vmem:[#allocation59_spill] sm:$0xff] %v4134_v11  ;;  %v1374_v11 = vrot.slane %v3568_v39, 2  ;;  %v1376_v39 = vrot.slane %v3660_v48, 2 }
  0xd0   : > { %2853 = vmatmul.msk.f32.gmra.mxu0 %vm990_vm1, %v3812_v17 }
  0xd2   : > { %2756 = vmatmul.msk.f32.gmra.mxu1 %vm990_vm1, %v3790_v31 }
  0xd3   : > { %2789 = vmatmul.msk.f32.gmra.mxu2 %vm990_vm1, %v4051_v47  ;;  %2821 = vmatmul.msk.f32.gmra.mxu3 %vm990_vm1, %v3793_v20 }
  0xd4   : > { %v4138_v61 = vpop.f32.mrf.mxu0 }
  0xd7   : > { %v4142_v58 = vpop.f32.mrf.mxu2 }
  0xd8   : > { %2854 = vmatmul.msk.f32.gmra.mxu0 %vm990_vm1, %v3917_v2 }
  0xda   : > { %2757 = vmatmul.msk.f32.gmra.mxu1 %vm990_vm1, %v3793_v20 }
  0xdb   : > { %2790 = vmatmul.msk.f32.gmra.mxu2 %vm990_vm1, %v4063_v59  ;;  %2822 = vmatmul.msk.f32.gmra.mxu3 %vm990_vm1, %v3976_v14 }
  0xdc   : > { %v4144_v4 = vpop.f32.mrf.mxu1 }
  0xe0   : > { %2855 = vmatmul.msk.f32.gmra.mxu0 %vm990_vm1, %v3992_v38  ;;  %v4158_v26 = vpop.f32.mrf.mxu3 }
  0xe1   : > { %5278 = vst [vmem:[#allocation61_spill] sm:$0xff] %v4158_v26  ;;  %v1377_v26 = vrot.slane %v3664_v45, 2 }
  0xe2   : > { %2758 = vmatmul.msk.f32.gmra.mxu1 %vm990_vm1, %v3976_v14 }
  0xe3   : > { %2791 = vmatmul.msk.f32.gmra.mxu2 %vm990_vm1, %v4076_v62  ;;  %2823 = vmatmul.msk.f32.gmra.mxu3 %vm990_vm1, %v3978_v23 }
  0xe7   : > { %v4162_v51 = vpop.f32.mrf.mxu2 }
  0xe8   : > { %2856 = vmatmul.msk.f32.gmra.mxu0 %vm990_vm1, %v4014_v54 }
  0xea   : > { %2759 = vmatmul.msk.f32.gmra.mxu1 %vm990_vm1, %v3978_v23 }
  0xeb   : > { %2792 = vmatmul.msk.f32.gmra.mxu2 %vm990_vm1, %v4089_v40  ;;  %2824 = vmatmul.msk.f32.gmra.mxu3 %vm990_vm1, %v3338_v56 }
  0xf0   : > { %2857 = vmatmul.msk.f32.gmra.mxu0 %vm990_vm1, %v3360_v12 }
  0xf2   : > { %2760 = vmatmul.msk.f32.gmra.mxu1 %vm990_vm1, %v3338_v56 }
  0xf3   : > { %2793 = vmatmul.msk.f32.gmra.mxu2 %vm990_vm1, %v4106_v36  ;;  %2825 = vmatmul.msk.f32.gmra.mxu3 %vm990_vm1, %v3340_v57 }
  0xf8   : > { %2858 = vmatmul.msk.f32.gmra.mxu0 %vm990_vm1, %v3427_v24  ;;  %v4165_v24 = vsel %vm1345_vm2, %v1372_v9, %v1374_v11  ;;  %v4179_v11 = vpop.f32.mrf.mxu3 }
  0xf9   : > { %5279 = vst [vmem:[#allocation62_spill] sm:$0xff] %v4165_v24 }
  0xfa   : > { %2761 = vmatmul.msk.f32.gmra.mxu1 %vm990_vm1, %v3340_v57  ;;  %5280 = vst [vmem:[#allocation63_spill] sm:$0xff] %v4179_v11  ;;  %v1379_v11 = vrot.slane %v3758_v32, 2  ;;  %v1381_v32 = vrot.slane %v3832_v46, 2 }
  0xfb   : > { %2794 = vmatmul.msk.f32.gmra.mxu2 %vm990_vm1, %v4126_v13  ;;  %2826 = vmatmul.msk.f32.gmra.mxu3 %vm990_vm1, %v3486_v27  ;;  %v4160_v13 = vpop.f32.mrf.mxu0 }
 0x100   : > { %2859 = vmatmul.msk.f32.gmra.mxu0 %vm990_vm1, %v3508_v60  ;;  %v4186_v60 = vpop.f32.mrf.mxu2 }
 0x102   : > { %2762 = vmatmul.msk.f32.gmra.mxu1 %vm990_vm1, %v3486_v27  ;;  %v4167_v27 = vpop.f32.mrf.mxu1 }
 0x103   : > { %2795 = vmatmul.msk.f32.gmra.mxu2 %vm990_vm1, %v4147_v52  ;;  %2827 = vmatmul.msk.f32.gmra.mxu3 %vm990_vm1, %v3491_v33  ;;  %v4181_v9 = vpop.f32.mrf.mxu0  ;;  %v4184_v52 = vsel %vm1345_vm2, %v1376_v39, %v1377_v26  ;;  %v4200_v39 = vsel %vm1345_vm2, %v1377_v26, %v1379_v11  ;;  %v1382_v26 = vrot.slane %v3838_v53, 2 }
 0x104   : > { %5281 = vst [vmem:[#allocation64_spill] sm:$0xff] %v4184_v52 }
 0x105   : > { %5282 = vst [vmem:[#allocation65_spill] sm:$0xff] %v4200_v39 }
 0x108   : > { %2860 = vmatmul.msk.f32.gmra.mxu0 %vm990_vm1, %v3591_v8  ;;  %v4202_v8 = vpop.f32.mrf.mxu3 }
 0x109   : > { %5283 = vst [vmem:[#allocation66_spill] sm:$0xff] %v4202_v8  ;;  %v4221_v8 = vsel %vm1345_vm2, %v1381_v32, %v1382_v26  ;;  %v1384_v32 = vrot.slane %v3945_v42, 2  ;;  %v1387_v42 = vrot.slane %v3354_v5, 2 }
 0x10a   : > { %2763 = vmatmul.msk.f32.gmra.mxu1 %vm990_vm1, %v3491_v33  ;;  %5285 = vst [vmem:[#allocation68_spill] sm:$0xff] %v4221_v8 }
 0x10b   : > { %2796 = vmatmul.msk.f32.gmra.mxu2 %vm990_vm1, %v4165_v24  ;;  %2828 = vmatmul.msk.f32.gmra.mxu3 %vm990_vm1, %v3660_v48  ;;  %v4194_v24 = vpop.f32.mrf.mxu1  ;;  %v4204_v33 = vpop.f32.mrf.mxu0 }
 0x110   : > { %2861 = vmatmul.msk.f32.gmra.mxu0 %vm990_vm1, %v3680_v37  ;;  %v4208_v37 = vpop.f32.mrf.mxu2 }
 0x111   : > { %5284 = vst [vmem:[#allocation67_spill] sm:$0xff] %v4208_v37 }
 0x112   : > { %2764 = vmatmul.msk.f32.gmra.mxu1 %vm990_vm1, %v3660_v48 }
 0x113   : > { %2797 = vmatmul.msk.f32.gmra.mxu2 %vm990_vm1, %v4184_v52  ;;  %2829 = vmatmul.msk.f32.gmra.mxu3 %vm990_vm1, %v3664_v45  ;;  %v4218_v11 = vpop.f32.mrf.mxu1 }
 0x118   : > { %2862 = vmatmul.msk.f32.gmra.mxu0 %vm990_vm1, %v3774_v49  ;;  %v4227_v49 = vpop.f32.mrf.mxu3 }
 0x119   : > { %5286 = vst [vmem:[#allocation69_spill] sm:$0xff] %v4227_v49  ;;  %v1386_v49 = vrot.slane %v3351_v3, 2 }
 0x11a   : > { %2765 = vmatmul.msk.f32.gmra.mxu1 %vm990_vm1, %v3664_v45 }
 0x11b   : > { %2798 = vmatmul.msk.f32.gmra.mxu2 %vm990_vm1, %v4200_v39  ;;  %2830 = vmatmul.msk.f32.gmra.mxu3 %vm990_vm1, %v3832_v46 }
 0x11d   : > { %v4233_v39 = vpop.f32.mrf.mxu0 }
 0x11e   : > { %v4235_v52 = vpop.f32.mrf.mxu2 }
 0x11f   : > { %5287 = vst [vmem:[#allocation70_spill] sm:$0xff] %v4235_v52  ;;  %v5296_v52 = vld [vmem:[#allocation22_spill] sm:$0xff] }
 0x120   : > { %2863 = vmatmul.msk.f32.gmra.mxu0 %vm990_vm1, %v3855_v0 }
 0x122   : > { %2766 = vmatmul.msk.f32.gmra.mxu1 %vm990_vm1, %v3832_v46  ;;  %v4241_v46 = vsel %vm1345_vm2, %v1382_v26, %v1384_v32 }
 0x123   : > { %2799 = vmatmul.msk.f32.gmra.mxu2 %vm990_vm1, %v4221_v8  ;;  %2831 = vmatmul.msk.f32.gmra.mxu3 %vm990_vm1, %v3838_v53  ;;  %5288 = vst [vmem:[#allocation71_spill] sm:$0xff] %v4241_v46 }
 0x126   : > { %v4253_v8 = vpop.f32.mrf.mxu3 }
 0x127   : > { %v4238_v45 = vpop.f32.mrf.mxu1  ;;  %5289 = vst [vmem:[#allocation72_spill] sm:$0xff] %v4253_v8  ;;  %v1389_v8 = vrot.slane %v3422_v18, 2  ;;  %v5295_v18 = vld [vmem:[#allocation21_spill] sm:$0xff] }
 0x128   : > { %2864 = vmatmul.msk.f32.gmra.mxu0 %vm990_vm1, %v3961_v50 }
 0x12a   : > { %2767 = vmatmul.msk.f32.gmra.mxu1 %vm990_vm1, %v3838_v53  ;;  %v4260_v53 = vsel %vm1345_vm2, %v1386_v49, %v1387_v42 }
 0x12b   : > { %2800 = vmatmul.msk.f32.gmra.mxu2 %vm990_vm1, %v4241_v46  ;;  %2832 = vmatmul.msk.f32.gmra.mxu3 %vm990_vm1, %v3351_v3  ;;  %5291 = vst [vmem:[#allocation74_spill] sm:$0xff] %v4260_v53 }
 0x12d   : > { %v4255_v26 = vpop.f32.mrf.mxu0 }
 0x12e   : > { %v4257_v32 = vpop.f32.mrf.mxu2 }
 0x12f   : > { %5290 = vst [vmem:[#allocation73_spill] sm:$0xff] %v4257_v32  ;;  %v1249_v0 = vpop.f32.mrf.mxu1  ;;  %v4276_v32 = vsel %vm1345_vm2, %v1387_v42, %v1389_v8  ;;  %v1392_v8 = vrot.slane %v5296_v52, 2 }
 0x130   : > { %2865 = vmatmul.msk.f32.gmra.mxu0 %vm990_vm1, %v3377_v30  ;;  %5293 = vst [vmem:[#allocation76_spill] sm:$0xff] %v4276_v32  ;;  %v1391_v30 = vrot.slane %v5295_v18, 2 }
 0x132   : > { %2768 = vmatmul.msk.f32.gmra.mxu1 %vm990_vm1, %v3351_v3  ;;  %v1250_v3 = vadd.f32 %v1249_v0, %v4112_v19 }
 0x133   : > { %2801 = vmatmul.msk.f32.gmra.mxu2 %vm990_vm1, %v4260_v53  ;;  %2833 = vmatmul.msk.f32.gmra.mxu3 %vm990_vm1, %v3354_v5  ;;  %v5294_v53 = vld [vmem:[#allocation15_spill] sm:$0xff] }
 0x135   : > { %v4273_v49 = vpop.f32.mrf.mxu0 }
 0x136   : > { %v1509_v46 = vpop.f32.mrf.mxu2  ;;  %v4271_v50 = vpop.f32.mrf.mxu3 }
 0x137   : > { %5292 = vst [vmem:[#allocation75_spill] sm:$0xff] %v4271_v50  ;;  %v1252_v48 = vpop.f32.mrf.mxu1  ;;  %v1605_v50 = vadd.f32 %v1509_v46, %v1250_v3  ;;  %v5300_v3 = vld [vmem:[#allocation23_spill] sm:$0xff] }
 0x138   : > { %2866 = vmatmul.msk.f32.gmra.mxu0 %vm990_vm1, %v5294_v53  ;;  %v4294_v53 = vsel %vm1345_vm2, %v1391_v30, %v1392_v8 }
 0x139   : > { %5299 = vst [vmem:[#allocation77_spill] sm:$0xff] %v4294_v53 }
 0x13a   : > { %2769 = vmatmul.msk.f32.gmra.mxu1 %vm990_vm1, %v3354_v5 }
 0x13b   : > { %2802 = vmatmul.msk.f32.gmra.mxu2 %vm990_vm1, %v4276_v32  ;;  %2834 = vmatmul.msk.f32.gmra.mxu3 %vm990_vm1, %v5295_v18  ;;  %v1253_v32 = vadd.f32 %v1252_v48, %v4138_v61 }
 0x13d   : > { %v4291_v5 = vpop.f32.mrf.mxu0 }
 0x13e   : > { %v1512_v42 = vpop.f32.mrf.mxu2  ;;  %v1662_v36 = vpop.f32.mrf.mxu3  ;;  %5298 = vst [vmem:[#allocation22_spill] sm:$0xff] %v4291_v5 }
 0x13f   : > { %v1255_v0 = vpop.f32.mrf.mxu1  ;;  %v4289_v19 = vadd.f32 %v1662_v36, %v1605_v50  ;;  %v1606_v46 = vadd.f32 %v1512_v42, %v1253_v32  ;;  %v5301_v50 = vld [vmem:[#allocation28_spill] sm:$0xff]  ;;  %v5306_v32 = vld [vmem:[#allocation35_spill] sm:$0xff] }
 0x140   : > { %2867 = vmatmul.msk.f32.gmra.mxu0 %vm990_vm1, %v5300_v3  ;;  %v1394_v36 = vrot.slane %v5301_v50, 2  ;;  %v1256_v3 = vadd.f32 %v1255_v0, %v4160_v13  ;;  %v5307_v50 = vld [vmem:[#allocation36_spill] sm:$0xff] }
 0x141   : > { %5297 = vst [vmem:[#allocation21_spill] sm:$0xff] %v4289_v19 }
 0x142   : > { %2770 = vmatmul.msk.f32.gmra.mxu1 %vm990_vm1, %v5295_v18  ;;  %v4311_v61 = vsel %vm1345_vm2, %v1392_v8, %v1394_v36  ;;  %v1397_v8 = vrot.slane %v5307_v50, 2 }
 0x143   : > { %2803 = vmatmul.msk.f32.gmra.mxu2 %vm990_vm1, %v4294_v53  ;;  %2835 = vmatmul.msk.f32.gmra.mxu3 %vm990_vm1, %v5296_v52  ;;  %5304 = vst [vmem:[#allocation79_spill] sm:$0xff] %v4311_v61  ;;  %v5305_v53 = vld [vmem:[#allocation29_spill] sm:$0xff] }
 0x145   : > { %v4308_v48 = vpop.f32.mrf.mxu0 }
 0x146   : > { %v1515_v5 = vpop.f32.mrf.mxu2  ;;  %v1665_v30 = vpop.f32.mrf.mxu3  ;;  %5303 = vst [vmem:[#allocation78_spill] sm:$0xff] %v4308_v48 }
 0x147   : > { %v1258_v19 = vpop.f32.mrf.mxu1  ;;  %v4306_v37 = vadd.f32 %v1665_v30, %v1606_v46  ;;  %v1607_v42 = vadd.f32 %v1515_v5, %v1256_v3  ;;  %v1396_v46 = vrot.slane %v5306_v32, 2  ;;  %v5311_v5 = vld [vmem:[#allocation37_spill] sm:$0xff] }
 0x148   : > { %2868 = vmatmul.msk.f32.gmra.mxu0 %vm990_vm1, %v5305_v53 }
 0x149   : > { %5302 = vst [vmem:[#allocation28_spill] sm:$0xff] %v4306_v37  ;;  %v4329_v37 = vsel %vm1345_vm2, %v1396_v46, %v1397_v8 }
 0x14a   : > { %2771 = vmatmul.msk.f32.gmra.mxu1 %vm990_vm1, %v5296_v52  ;;  %5310 = vst [vmem:[#allocation80_spill] sm:$0xff] %v4329_v37 }
 0x14b   : > { %2804 = vmatmul.msk.f32.gmra.mxu2 %vm990_vm1, %v4311_v61  ;;  %2836 = vmatmul.msk.f32.gmra.mxu3 %vm990_vm1, %v5306_v32  ;;  %v1259_v61 = vadd.f32 %v1258_v19, %v4181_v9 }
 0x14d   : > { %v4326_v48 = vpop.f32.mrf.mxu0 }
 0x14e   : > { %v1518_v36 = vpop.f32.mrf.mxu2  ;;  %v1668_v30 = vpop.f32.mrf.mxu3  ;;  %5309 = vst [vmem:[#allocation36_spill] sm:$0xff] %v4326_v48 }
 0x14f   : > { %v1261_v13 = vpop.f32.mrf.mxu1  ;;  %v4324_v0 = vadd.f32 %v1668_v30, %v1607_v42  ;;  %v1608_v3 = vadd.f32 %v1518_v36, %v1259_v61  ;;  %v5312_v42 = vld [vmem:[#allocation41_spill] sm:$0xff] }
 0x150   : > { %2869 = vmatmul.msk.f32.gmra.mxu0 %vm990_vm1, %v5311_v5  ;;  %v1399_v30 = vrot.slane %v5312_v42, 2  ;;  %v1262_v5 = vadd.f32 %v1261_v13, %v4204_v33  ;;  %v5317_v61 = vld [vmem:[#allocation49_spill] sm:$0xff] }
 0x151   : > { %5308 = vst [vmem:[#allocation35_spill] sm:$0xff] %v4324_v0 }
 0x152   : > { %2772 = vmatmul.msk.f32.gmra.mxu1 %vm990_vm1, %v5306_v32  ;;  %v4346_v19 = vsel %vm1345_vm2, %v1397_v8, %v1399_v30  ;;  %v1402_v8 = vrot.slane %v3868_v16, 2 }
 0x153   : > { %2805 = vmatmul.msk.f32.gmra.mxu2 %vm990_vm1, %v4329_v37  ;;  %2837 = vmatmul.msk.f32.gmra.mxu3 %vm990_vm1, %v5307_v50  ;;  %5315 = vst [vmem:[#allocation82_spill] sm:$0xff] %v4346_v19  ;;  %v5316_v37 = vld [vmem:[#allocation43_spill] sm:$0xff] }
 0x155   : > { %v4343_v9 = vpop.f32.mrf.mxu0 }
 0x156   : > { %v1521_v48 = vpop.f32.mrf.mxu2  ;;  %v1671_v46 = vpop.f32.mrf.mxu3  ;;  %5314 = vst [vmem:[#allocation81_spill] sm:$0xff] %v4343_v9 }
 0x157   : > { %v1264_v0 = vpop.f32.mrf.mxu1  ;;  %v4341_v53 = vadd.f32 %v1671_v46, %v1608_v3  ;;  %v1609_v36 = vadd.f32 %v1521_v48, %v1262_v5  ;;  %v1401_v3 = vrot.slane %v5317_v61, 2  ;;  %v5321_v48 = vld [vmem:[#allocation51_spill] sm:$0xff] }
 0x158   : > { %2870 = vmatmul.msk.f32.gmra.mxu0 %vm990_vm1, %v5316_v37  ;;  %v1265_v42 = vadd.f32 %v1264_v0, %v4233_v39  ;;  %v1404_v39 = vrot.slane %v3948_v22, 2  ;;  %v5326_v22 = vld [vmem:[#allocation11_spill] sm:$0xff] }
 0x159   : > { %5313 = vst [vmem:[#allocation41_spill] sm:$0xff] %v4341_v53 }
 0x15a   : > { %2773 = vmatmul.msk.f32.gmra.mxu1 %vm990_vm1, %v5307_v50 }
 0x15b   : > { %2806 = vmatmul.msk.f32.gmra.mxu2 %vm990_vm1, %v4346_v19  ;;  %2838 = vmatmul.msk.f32.gmra.mxu3 %vm990_vm1, %v5317_v61  ;;  %v4365_v19 = vsel %vm1345_vm2, %v1401_v3, %v1402_v8 }
 0x15c   : > { %5320 = vst [vmem:[#allocation84_spill] sm:$0xff] %v4365_v19 }
 0x15d   : > { %v4362_v53 = vpop.f32.mrf.mxu0 }
 0x15e   : > { %v1524_v33 = vpop.f32.mrf.mxu2  ;;  %v1674_v13 = vpop.f32.mrf.mxu3  ;;  %5319 = vst [vmem:[#allocation83_spill] sm:$0xff] %v4362_v53  ;;  %v4382_v53 = vsel %vm1345_vm2, %v1402_v8, %v1404_v39 }
 0x15f   : > { %v1610_v30 = vadd.f32 %v1524_v33, %v1265_v42  ;;  %v1267_v46 = vpop.f32.mrf.mxu1  ;;  %v4360_v9 = vadd.f32 %v1674_v13, %v1609_v36  ;;  %5324 = vst [vmem:[#allocation87_spill] sm:$0xff] %v4382_v53 }
 0x160   : > { %2871 = vmatmul.msk.f32.gmra.mxu0 %vm990_vm1, %v5321_v48  ;;  %v1268_v0 = vadd.f32 %v1267_v46, %v4255_v26  ;;  %v1406_v26 = vrot.slane %v5326_v22, 2 }
 0x161   : > { %5318 = vst [vmem:[#allocation49_spill] sm:$0xff] %v4360_v9  ;;  %v5325_v9 = vld [vmem:[#allocation55_spill] sm:$0xff] }
 0x162   : > { %2774 = vmatmul.msk.f32.gmra.mxu1 %vm990_vm1, %v5317_v61 }
 0x163   : > { %2807 = vmatmul.msk.f32.gmra.mxu2 %vm990_vm1, %v4365_v19  ;;  %2839 = vmatmul.msk.f32.gmra.mxu3 %vm990_vm1, %v3868_v16 }
 0x165   : > { %v4379_v13 = vpop.f32.mrf.mxu0 }
 0x166   : > { %v1527_v5 = vpop.f32.mrf.mxu2  ;;  %v1677_v36 = vpop.f32.mrf.mxu3  ;;  %5323 = vst [vmem:[#allocation86_spill] sm:$0xff] %v4379_v13 }
 0x167   : > { %v1611_v3 = vadd.f32 %v1527_v5, %v1268_v0  ;;  %v1270_v42 = vpop.f32.mrf.mxu1  ;;  %v4377_v33 = vadd.f32 %v1677_v36, %v1610_v30  ;;  %v5327_v30 = vld [vmem:[#allocation12_spill] sm:$0xff] }
 0x168   : > { %2872 = vmatmul.msk.f32.gmra.mxu0 %vm990_vm1, %v5325_v9  ;;  %v1407_v46 = vrot.slane %v5327_v30, 2  ;;  %v1271_v0 = vadd.f32 %v1270_v42, %v4273_v49  ;;  %v5332_v49 = vld [vmem:[#allocation16_spill] sm:$0xff] }
 0x169   : > { %5322 = vst [vmem:[#allocation85_spill] sm:$0xff] %v4377_v33 }
 0x16a   : > { %2775 = vmatmul.msk.f32.gmra.mxu1 %vm990_vm1, %v3868_v16  ;;  %v4400_v9 = vsel %vm1345_vm2, %v1406_v26, %v1407_v46 }
 0x16b   : > { %2808 = vmatmul.msk.f32.gmra.mxu2 %vm990_vm1, %v4382_v53  ;;  %2840 = vmatmul.msk.f32.gmra.mxu3 %vm990_vm1, %v5326_v22  ;;  %5330 = vst [vmem:[#allocation90_spill] sm:$0xff] %v4400_v9  ;;  %v5331_v53 = vld [vmem:[#allocation13_spill] sm:$0xff] }
 0x16d   : > { %v4397_v33 = vpop.f32.mrf.mxu0 }
 0x16e   : > { %v1530_v8 = vpop.f32.mrf.mxu2  ;;  %v1680_v39 = vpop.f32.mrf.mxu3  ;;  %5329 = vst [vmem:[#allocation89_spill] sm:$0xff] %v4397_v33 }
 0x16f   : > { %v1612_v5 = vadd.f32 %v1530_v8, %v1271_v0  ;;  %v1273_v36 = vpop.f32.mrf.mxu1  ;;  %v4395_v13 = vadd.f32 %v1680_v39, %v1611_v3  ;;  %v1409_v3 = vrot.slane %v5332_v49, 2  ;;  %v5337_v49 = vld [vmem:[#allocation24_spill] sm:$0xff] }
 0x170   : > { %2873 = vmatmul.msk.f32.gmra.mxu0 %vm990_vm1, %v5331_v53 }
 0x171   : > { %5328 = vst [vmem:[#allocation88_spill] sm:$0xff] %v4395_v13  ;;  %v4416_v33 = vsel %vm1345_vm2, %v1407_v46, %v1409_v3  ;;  %v1274_v13 = vadd.f32 %v1273_v36, %v4078_v1 }
 0x172   : > { %2776 = vmatmul.msk.f32.gmra.mxu1 %vm990_vm1, %v5326_v22  ;;  %5335 = vst [vmem:[#allocation92_spill] sm:$0xff] %v4416_v33 }
 0x173   : > { %2809 = vmatmul.msk.f32.gmra.mxu2 %vm990_vm1, %v4400_v9  ;;  %2841 = vmatmul.msk.f32.gmra.mxu3 %vm990_vm1, %v5327_v30  ;;  %v5336_v9 = vld [vmem:[#allocation17_spill] sm:$0xff] }
 0x175   : > { %v4413_v26 = vpop.f32.mrf.mxu0 }
 0x176   : > { %v1533_v42 = vpop.f32.mrf.mxu2  ;;  %v1683_v0 = vpop.f32.mrf.mxu3  ;;  %5334 = vst [vmem:[#allocation91_spill] sm:$0xff] %v4413_v26  ;;  %v5338_v26 = vld [vmem:[#allocation25_spill] sm:$0xff] }
 0x177   : > { %v1276_v8 = vpop.f32.mrf.mxu1  ;;  %v4411_v39 = vadd.f32 %v1683_v0, %v1612_v5  ;;  %v1613_v5 = vadd.f32 %v1533_v42, %v1274_v13  ;;  %v1411_v0 = vrot.slane %v5337_v49, 2  ;;  %v1412_v46 = vrot.slane %v5338_v26, 2  ;;  %v5342_v13 = vld [vmem:[#allocation26_spill] sm:$0xff] }
 0x178   : > { %2874 = vmatmul.msk.f32.gmra.mxu0 %vm990_vm1, %v5336_v9 }
 0x179   : > { %5333 = vst [vmem:[#allocation16_spill] sm:$0xff] %v4411_v39  ;;  %v4434_v9 = vsel %vm1345_vm2, %v1411_v0, %v1412_v46 }
 0x17a   : > { %2777 = vmatmul.msk.f32.gmra.mxu1 %vm990_vm1, %v5327_v30  ;;  %5341 = vst [vmem:[#allocation95_spill] sm:$0xff] %v4434_v9 }
 0x17b   : > { %2810 = vmatmul.msk.f32.gmra.mxu2 %vm990_vm1, %v4416_v33  ;;  %2842 = vmatmul.msk.f32.gmra.mxu3 %vm990_vm1, %v5337_v49  ;;  %v1277_v33 = vadd.f32 %v1276_v8, %v4099_v55 }
 0x17d   : > { %v4431_v53 = vpop.f32.mrf.mxu0 }
 0x17e   : > { %v1536_v3 = vpop.f32.mrf.mxu2  ;;  %v1686_v39 = vpop.f32.mrf.mxu3  ;;  %5340 = vst [vmem:[#allocation94_spill] sm:$0xff] %v4431_v53 }
 0x17f   : > { %v1279_v1 = vpop.f32.mrf.mxu1  ;;  %v4429_v36 = vadd.f32 %v1686_v39, %v1613_v5  ;;  %v1614_v42 = vadd.f32 %v1536_v3, %v1277_v33  ;;  %v5343_v39 = vld [vmem:[#allocation30_spill] sm:$0xff]  ;;  %v5347_v33 = vld [vmem:[#allocation31_spill] sm:$0xff] }
 0x180   : > { %2875 = vmatmul.msk.f32.gmra.mxu0 %vm990_vm1, %v5342_v13  ;;  %v1414_v5 = vrot.slane %v5343_v39, 2  ;;  %v5348_v3 = vld [vmem:[#allocation38_spill] sm:$0xff] }
 0x181   : > { %5339 = vst [vmem:[#allocation93_spill] sm:$0xff] %v4429_v36  ;;  %v1416_v39 = vrot.slane %v5348_v3, 2 }
 0x182   : > { %2778 = vmatmul.msk.f32.gmra.mxu1 %vm990_vm1, %v5337_v49  ;;  %v4451_v49 = vsel %vm1345_vm2, %v1412_v46, %v1414_v5  ;;  %v5349_v46 = vld [vmem:[#allocation39_spill] sm:$0xff] }
 0x183   : > { %2811 = vmatmul.msk.f32.gmra.mxu2 %vm990_vm1, %v4434_v9  ;;  %2843 = vmatmul.msk.f32.gmra.mxu3 %vm990_vm1, %v5338_v26  ;;  %5346 = vst [vmem:[#allocation97_spill] sm:$0xff] %v4451_v49  ;;  %v1280_v9 = vadd.f32 %v1279_v1, %v4123_v43  ;;  %v1417_v5 = vrot.slane %v5349_v46, 2  ;;  %v246_v1 = vld [vmem:[%s3290_s30 + $0x180] sm:$0xff] }
 0x185   : > { %v4448_v8 = vpop.f32.mrf.mxu0 }
 0x186   : > { %v1539_v53 = vpop.f32.mrf.mxu2  ;;  %v1689_v0 = vpop.f32.mrf.mxu3  ;;  %5345 = vst [vmem:[#allocation96_spill] sm:$0xff] %v4448_v8 }
 0x187   : > { %v1282_v36 = vpop.f32.mrf.mxu1  ;;  %v4446_v55 = vadd.f32 %v1689_v0, %v1614_v42  ;;  %v1615_v42 = vadd.f32 %v1539_v53, %v1280_v9  ;;  %v300_v53 = vmax.f32 %v246_v1, 0.0  ;;  %v5353_v9 = vld [vmem:[#allocation40_spill] sm:$0xff] }
 0x188   : > { %2876 = vmatmul.msk.f32.gmra.mxu0 %vm990_vm1, %v5347_v33  ;;  %v4470_v33 = vsel %vm1345_vm2, %v1416_v39, %v1417_v5  ;;  %v5354_v39 = vld [vmem:[#allocation44_spill] sm:$0xff] }
 0x189   : > { %5344 = vst [vmem:[#allocation30_spill] sm:$0xff] %v4446_v55  ;;  %v634_v1 = vmin.f32 %v300_v53, %v3306_v21 }
 0x18a   : > { %2779 = vmatmul.msk.f32.gmra.mxu1 %vm990_vm1, %v5338_v26  ;;  %5352 = vst [vmem:[#allocation100_spill] sm:$0xff] %v4470_v33  ;;  %v1283_v26 = vadd.f32 %v1282_v36, %v4144_v4  ;;  %v358_v4 = vmin.f32 %v300_v53, %v3294_v6  ;;  %v5358_v53 = vld [vmem:[#allocation45_spill] sm:$0xff] }
 0x18b   : > { %2812 = vmatmul.msk.f32.gmra.mxu2 %vm990_vm1, %v4451_v49  ;;  %2844 = vmatmul.msk.f32.gmra.mxu3 %vm990_vm1, %v5348_v3  ;;  %v247_v49 = vld [vmem:[%s3290_s30 + $0x188] sm:$0xff] }
 0x18d   : > { %v4467_v13 = vpop.f32.mrf.mxu0 }
 0x18e   : > { %v1542_v0 = vpop.f32.mrf.mxu2  ;;  %v1692_v8 = vpop.f32.mrf.mxu3  ;;  %5351 = vst [vmem:[#allocation99_spill] sm:$0xff] %v4467_v13  ;;  %v1419_v13 = vrot.slane %v5354_v39, 2 }
 0x18f   : > { %v1285_v43 = vpop.f32.mrf.mxu1  ;;  %v4465_v55 = vadd.f32 %v1692_v8, %v1615_v42  ;;  %v301_v8 = vmax.f32 %v247_v49, 0.0  ;;  %v1616_v42 = vadd.f32 %v1542_v0, %v1283_v26  ;;  %v248_v0 = vld [vmem:[%s3290_s30 + $0x190] sm:$0x3] }
 0x190   : > { %2877 = vmatmul.msk.f32.gmra.mxu0 %vm990_vm1, %v5353_v9  ;;  %v4491_v49 = vsel %vm1345_vm2, %v1417_v5, %v1419_v13  ;;  %v1286_v39 = vadd.f32 %v1285_v43, %v4167_v27  ;;  %v1422_v13 = vrot.slane %v3909_v34, 2  ;;  %v689_v5 = vmul.f32 %v3311_v25, %v634_v1 }
 0x191   : > { %5350 = vst [vmem:[#allocation98_spill] sm:$0xff] %v4465_v55  ;;  %v359_v9 = vmin.f32 %v301_v8, %v3294_v6  ;;  %v635_v26 = vmin.f32 %v301_v8, %v3306_v21 }
 0x192   : > { %2780 = vmatmul.msk.f32.gmra.mxu1 %vm990_vm1, %v5348_v3  ;;  %5357 = vst [vmem:[#allocation102_spill] sm:$0xff] %v4491_v49  ;;  %v743_v19 = vfloor.f32 %v689_v5 }
 0x193   : > { %2813 = vmatmul.msk.f32.gmra.mxu2 %vm990_vm1, %v4470_v33  ;;  %2845 = vmatmul.msk.f32.gmra.mxu3 %vm990_vm1, %v5349_v46  ;;  %v413_v33 = vmul.f32 %v3297_v10, %v358_v4  ;;  %v414_v8 = vmul.f32 %v3297_v10, %v359_v9  ;;  %v690_v43 = vmul.f32 %v3311_v25, %v635_v26  ;;  %v302_v4 = vmax.f32 %v248_v0, 0.0  ;;  %v5361_v0 = vld [vmem:[#allocation53_spill] sm:$0xff] }
 0x195   : > { %v4488_v22 = vpop.f32.mrf.mxu0  ;;  %v468_v48 = vfloor.f32 %v414_v8  ;;  %v744_v9 = vfloor.f32 %v690_v43  ;;  %v360_v37 = vmin.f32 %v302_v4, %v3294_v6 }
 0x196   : > { %v1545_v55 = vpop.f32.mrf.mxu2  ;;  %v1695_v36 = vpop.f32.mrf.mxu3  ;;  %5356 = vst [vmem:[#allocation101_spill] sm:$0xff] %v4488_v22 }
 0x197   : > { %v1288_v3 = vpop.f32.mrf.mxu1  ;;  %v4486_v30 = vadd.f32 %v1695_v36, %v1616_v42  ;;  %v5359_v42 = vld [vmem:[#allocation52_spill] sm:$0xff]  ;;  %v1617_v27 = vadd.f32 %v1545_v55, %v1286_v39  ;;  %v636_v55 = vmin.f32 %v302_v4, %v3306_v21  ;;  %v1424_v39 = vrot.slane %v3988_v7, 2 }
 0x198   : > { %2878 = vmatmul.msk.f32.gmra.mxu0 %vm990_vm1, %v5358_v53  ;;  %v1421_v36 = vrot.slane %v5359_v42, 2  ;;  %v1289_v26 = vadd.f32 %v1288_v3, %v4194_v24  ;;  %v799_v3 = vmul.f32 %v3316_v29, %v744_v9  ;;  %v415_v5 = vmul.f32 %v3297_v10, %v360_v37 }
 0x199   : > { %5355 = vst [vmem:[#allocation44_spill] sm:$0xff] %v4486_v30  ;;  %v691_v8 = vmul.f32 %v3311_v25, %v636_v55 }
 0x19a   : > { %2781 = vmatmul.msk.f32.gmra.mxu1 %vm990_vm1, %v5349_v46  ;;  %v467_v46 = vfloor.f32 %v413_v33  ;;  %v798_v33 = vmul.f32 %v3316_v29, %v743_v19  ;;  %v4538_v19 = vsel %vm1345_vm2, %v1422_v13, %v1424_v39 }
 0x19b   : > { %2814 = vmatmul.msk.f32.gmra.mxu2 %vm990_vm1, %v4491_v49  ;;  %2846 = vmatmul.msk.f32.gmra.mxu3 %vm990_vm1, %v5359_v42  ;;  %v4511_v49 = vsel %vm1345_vm2, %v1421_v36, %v1422_v13  ;;  %v523_v36 = vmul.f32 %v3302_v15, %v468_v48  ;;  %v745_v9 = vfloor.f32 %v691_v8 }
 0x19d   : > { %v4515_v1 = vpop.f32.mrf.mxu0 }
 0x19e   : > { %v1548_v22 = vpop.f32.mrf.mxu2  ;;  %v1698_v30 = vpop.f32.mrf.mxu3  ;;  %5360 = vst [vmem:[#allocation52_spill] sm:$0xff] %v4515_v1  ;;  %v4544_v1 = vadd.f32 %v799_v3, %v523_v36 }
 0x19f   : > { %v1291_v53 = vpop.f32.mrf.mxu1  ;;  %v4513_v16 = vadd.f32 %v1698_v30, %v1617_v27  ;;  %v522_v30 = vmul.f32 %v3302_v15, %v467_v46  ;;  %v1618_v24 = vadd.f32 %v1548_v22, %v1289_v26  ;;  %v469_v22 = vfloor.f32 %v415_v5 }
 0x1a0   : > { %2879 = vmatmul.msk.f32.gmra.mxu0 %vm990_vm1, %v5361_v0  ;;  %v1292_v37 = vadd.f32 %v1291_v53, %v4218_v11  ;;  %v1792_v26 = vrot.slane %v4544_v1, 1  ;;  %v800_v11 = vmul.f32 %v3316_v29, %v745_v9 }
 0x1a1   : > { %v4535_v4 = vadd.f32 %v798_v33, %v522_v30  ;;  %v524_v30 = vmul.f32 %v3302_v15, %v469_v22 }
 0x1a2   : > { %2782 = vmatmul.msk.f32.gmra.mxu1 %vm990_vm1, %v5359_v42 }
 0x1a3   : > { %2815 = vmatmul.msk.f32.gmra.mxu2 %vm990_vm1, %v4511_v49  ;;  %2847 = vmatmul.msk.f32.gmra.mxu3 %vm990_vm1, %v3909_v34  ;;  %v1791_v13 = vrot.slane %v4535_v4, 1  ;;  %v4566_v5 = vadd.f32 %v800_v11, %v524_v30 }
 0x1a5   : > { %v4542_v48 = vpop.f32.mrf.mxu0  ;;  %v4564_v3 = vsel %vm907_vm0, %v1791_v13, %v1792_v26 }
 0x1a6   : > { %v1551_v27 = vpop.f32.mrf.mxu2  ;;  %v1701_v43 = vpop.f32.mrf.mxu3 }
 0x1a7   : > { %v1294_v46 = vpop.f32.mrf.mxu1  ;;  %v4540_v7 = vadd.f32 %v1701_v43, %v1618_v24  ;;  %v1619_v55 = vadd.f32 %v1551_v27, %v1292_v37  ;;  %v1794_v43 = vrot.slane %v4566_v5, 1 }
 0x1a8   : > { %2880 = vmatmul.msk.f32.gmra.mxu0 %vm990_vm1, %v4004_v28  ;;  %v1295_v8 = vadd.f32 %v1294_v46, %v4238_v45 }
 0x1aa   : > { %2783 = vmatmul.msk.f32.gmra.mxu1 %vm990_vm1, %v3909_v34 }
 0x1ab   : > { %2816 = vmatmul.msk.f32.gmra.mxu2 %vm990_vm1, %v4538_v19  ;;  %2848 = vmatmul.msk.f32.gmra.mxu3 %vm990_vm1, %v4535_v4 }
 0x1ad   : > { %v4561_v24 = vpop.f32.mrf.mxu0 }
 0x1ae   : > { %v1554_v53 = vpop.f32.mrf.mxu2  ;;  %v1704_v33 = vpop.f32.mrf.mxu3 }
 0x1af   : > { %v1297_v39 = vpop.f32.mrf.mxu1  ;;  %v4559_v36 = vadd.f32 %v1704_v33, %v1619_v55  ;;  %v1620_v27 = vadd.f32 %v1554_v53, %v1295_v8 }
 0x1b0   : > { %2881 = vmatmul.msk.f32.gmra.mxu0 %vm990_vm1, %v4564_v3  ;;  %v1298_v46 = vadd.f32 %v1297_v39, %v4091_v63 }
 0x1b2   : > { %2884 = vmatmul.msk.f32.vlgmr.msra.gmra.mxu1 %vm990_vm1, %v4026_v44  ;;  %v4583_v44 = vsel %vm907_vm0, %v1792_v26, %v1794_v43 }
 0x1b3   : > { %2917 = vmatmul.msk.f32.vlgmr.msra.gmra.mxu2 %vm990_vm1, %v3790_v31  ;;  %2849 = vmatmul.msk.f32.gmra.mxu3 %vm990_vm1, %v4544_v1 }
 0x1b5   : > { %v4580_v45 = vpop.f32.mrf.mxu0 }
 0x1b6   : > { %v1557_v22 = vpop.f32.mrf.mxu2  ;;  %v1707_v9 = vpop.f32.mrf.mxu3 }
 0x1b7   : > { %v1300_v37 = vpop.f32.mrf.mxu1  ;;  %v4578_v13 = vadd.f32 %v1707_v9, %v1620_v27  ;;  %v1621_v31 = vadd.f32 %v1557_v22, %v1298_v46 }
 0x1b8   : > { %2882 = vmatmul.msk.f32.gmra.mxu0 %vm990_vm1, %v4583_v44  ;;  %v1301_v63 = vadd.f32 %v1300_v37, %v4114_v41 }
 0x1ba   : > { %2885 = vmatmul.msk.f32.gmra.mxu1 %vm990_vm1, %v4038_v35 }
 0x1bb   : > { %2918 = vmatmul.msk.f32.gmra.mxu2 %vm990_vm1, %v3793_v20  ;;  %2950 = vmatmul.msk.f32.vlgmr.msra.gmra.mxu3 %vm990_vm1, %v3812_v17 }
 0x1bd   : > { %v4596_v53 = vpop.f32.mrf.mxu0 }
 0x1be   : > { %v1560_v55 = vpop.f32.mrf.mxu2  ;;  %v1710_v30 = vpop.f32.mrf.mxu3 }
 0x1bf   : > { %v1303_v11 = vpop.f32.mrf.mxu1  ;;  %v4594_v26 = vadd.f32 %v1710_v30, %v1621_v31  ;;  %v1622_v20 = vadd.f32 %v1560_v55, %v1301_v63  ;;  %v5363_v63 = vld [vmem:[#allocation56_spill] sm:$0xff] }
 0x1c0   : > { %2983 = vmatmul.msk.f32.vlgmr.msra.gmra.mxu0 %vm990_vm1, %v4051_v47  ;;  %v1304_v41 = vadd.f32 %v1303_v11, %v4142_v58 }
 0x1c2   : > { %2886 = vmatmul.msk.f32.gmra.mxu1 %vm990_vm1, %v4051_v47 }
 0x1c3   : > { %2919 = vmatmul.msk.f32.gmra.mxu2 %vm990_vm1, %v3976_v14  ;;  %2951 = vmatmul.msk.f32.gmra.mxu3 %vm990_vm1, %v3917_v2 }
 0x1c5   : > { %v4609_v8 = vpop.f32.mrf.mxu0 }
 0x1c6   : > { %v1563_v17 = vpop.f32.mrf.mxu2  ;;  %v1713_v35 = vpop.f32.mrf.mxu3 }
 0x1c7   : > { %v1306_v33 = vpop.f32.mrf.mxu1  ;;  %v4607_v39 = vadd.f32 %v1713_v35, %v1622_v20  ;;  %v1623_v2 = vadd.f32 %v1563_v17, %v1304_v41 }
 0x1c8   : > { %2984 = vmatmul.msk.f32.gmra.mxu0 %vm990_vm1, %v4063_v59  ;;  %v1307_v58 = vadd.f32 %v1306_v33, %v4162_v51 }
 0x1ca   : > { %2887 = vmatmul.msk.f32.gmra.mxu1 %vm990_vm1, %v4063_v59 }
 0x1cb   : > { %2920 = vmatmul.msk.f32.gmra.mxu2 %vm990_vm1, %v3978_v23  ;;  %2952 = vmatmul.msk.f32.gmra.mxu3 %vm990_vm1, %v3992_v38 }
 0x1cd   : > { %v4622_v22 = vpop.f32.mrf.mxu0 }
 0x1ce   : > { %v1566_v14 = vpop.f32.mrf.mxu2  ;;  %v1716_v47 = vpop.f32.mrf.mxu3 }
 0x1cf   : > { %v1309_v27 = vpop.f32.mrf.mxu1  ;;  %v4620_v43 = vadd.f32 %v1716_v47, %v1623_v2  ;;  %v1624_v23 = vadd.f32 %v1566_v14, %v1307_v58  ;;  %v5366_v2 = vld [vmem:[#allocation70_spill] sm:$0xff]  ;;  %v5369_v58 = vld [vmem:[#allocation20_spill] sm:$0xff] }
 0x1d0   : > { %2985 = vmatmul.msk.f32.gmra.mxu0 %vm990_vm1, %v4076_v62  ;;  %v1310_v51 = vadd.f32 %v1309_v27, %v4186_v60  ;;  %v5362_v60 = vld [vmem:[#allocation67_spill] sm:$0xff]  ;;  %v5367_v47 = vld [vmem:[#allocation58_spill] sm:$0xff] }
 0x1d1   : > { %v5368_v27 = vld [vmem:[#allocation19_spill] sm:$0xff] }
 0x1d2   : > { %2888 = vmatmul.msk.f32.gmra.mxu1 %vm990_vm1, %v4076_v62 }
 0x1d3   : > { %2921 = vmatmul.msk.f32.gmra.mxu2 %vm990_vm1, %v3338_v56  ;;  %2953 = vmatmul.msk.f32.gmra.mxu3 %vm990_vm1, %v4014_v54 }
 0x1d5   : > { %v4635_v46 = vpop.f32.mrf.mxu0 }
 0x1d6   : > { %v1569_v38 = vpop.f32.mrf.mxu2  ;;  %v1719_v59 = vpop.f32.mrf.mxu3 }
 0x1d7   : > { %v1312_v9 = vpop.f32.mrf.mxu1  ;;  %v4633_v37 = vadd.f32 %v1719_v59, %v1624_v23  ;;  %v1625_v56 = vadd.f32 %v1569_v38, %v1310_v51 }
 0x1d8   : > { %2986 = vmatmul.msk.f32.gmra.mxu0 %vm990_vm1, %v4089_v40  ;;  %v1313_v11 = vadd.f32 %v1312_v9, %v5362_v60  ;;  %v5372_v60 = vld [vmem:[#allocation32_spill] sm:$0xff] }
 0x1da   : > { %2889 = vmatmul.msk.f32.gmra.mxu1 %vm990_vm1, %v4089_v40 }
 0x1db   : > { %2922 = vmatmul.msk.f32.gmra.mxu2 %vm990_vm1, %v3340_v57  ;;  %2954 = vmatmul.msk.f32.gmra.mxu3 %vm990_vm1, %v3360_v12  ;;  %v5364_v57 = vld [vmem:[#allocation18_spill] sm:$0xff] }
 0x1dc   : > { %v5365_v12 = vld [vmem:[#allocation14_spill] sm:$0xff] }
 0x1dd   : > { %v4648_v30 = vpop.f32.mrf.mxu0 }
 0x1de   : > { %v1572_v54 = vpop.f32.mrf.mxu2  ;;  %v1722_v62 = vpop.f32.mrf.mxu3 }
 0x1df   : > { %v1315_v31 = vpop.f32.mrf.mxu1  ;;  %v4646_v55 = vadd.f32 %v1722_v62, %v1625_v56  ;;  %v1626_v40 = vadd.f32 %v1572_v54, %v1313_v11  ;;  %v5370_v54 = vld [vmem:[#allocation73_spill] sm:$0xff]  ;;  %v5373_v11 = vld [vmem:[#allocation27_spill] sm:$0xff] }
 0x1e0   : > { %2987 = vmatmul.msk.f32.gmra.mxu0 %vm990_vm1, %v5363_v63  ;;  %v1316_v14 = vadd.f32 %v1315_v31, %v5366_v2  ;;  %v5371_v31 = vld [vmem:[#allocation60_spill] sm:$0xff] }
 0x1e2   : > { %2890 = vmatmul.msk.f32.gmra.mxu1 %vm990_vm1, %v5363_v63 }
 0x1e3   : > { %2923 = vmatmul.msk.f32.gmra.mxu2 %vm990_vm1, %v5364_v57  ;;  %2955 = vmatmul.msk.f32.gmra.mxu3 %vm990_vm1, %v5365_v12 }
 0x1e5   : > { %v4661_v41 = vpop.f32.mrf.mxu0 }
 0x1e6   : > { %v1575_v20 = vpop.f32.mrf.mxu2  ;;  %v1725_v17 = vpop.f32.mrf.mxu3 }
 0x1e7   : > { %v1318_v35 = vpop.f32.mrf.mxu1  ;;  %v4659_v33 = vadd.f32 %v1725_v17, %v1626_v40  ;;  %v1627_v23 = vadd.f32 %v1575_v20, %v1316_v14  ;;  %v5375_v14 = vld [vmem:[#allocation62_spill] sm:$0xff] }
 0x1e8   : > { %2988 = vmatmul.msk.f32.gmra.mxu0 %vm990_vm1, %v5367_v47  ;;  %v1319_v62 = vadd.f32 %v1318_v35, %v5370_v54  ;;  %v5374_v35 = vld [vmem:[#allocation57_spill] sm:$0xff] }
 0x1ea   : > { %2891 = vmatmul.msk.f32.gmra.mxu1 %vm990_vm1, %v5367_v47  ;;  %v5376_v47 = vld [vmem:[#allocation33_spill] sm:$0xff] }
 0x1eb   : > { %2924 = vmatmul.msk.f32.gmra.mxu2 %vm990_vm1, %v5368_v27  ;;  %2956 = vmatmul.msk.f32.gmra.mxu3 %vm990_vm1, %v5369_v58  ;;  %v5377_v27 = vld [vmem:[#allocation34_spill] sm:$0xff] }
 0x1ed   : > { %v4674_v56 = vpop.f32.mrf.mxu0 }
 0x1ee   : > { %v1578_v38 = vpop.f32.mrf.mxu2  ;;  %v1728_v59 = vpop.f32.mrf.mxu3 }
 0x1ef   : > { %v1321_v9 = vpop.f32.mrf.mxu1  ;;  %v4672_v51 = vadd.f32 %v1728_v59, %v1627_v23  ;;  %v1628_v63 = vadd.f32 %v1578_v38, %v1319_v62 }
 0x1f0   : > { %2989 = vmatmul.msk.f32.gmra.mxu0 %vm990_vm1, %v5371_v31  ;;  %v1322_v2 = vadd.f32 %v1321_v9, %v5374_v35  ;;  %v5378_v9 = vld [vmem:[#allocation59_spill] sm:$0xff] }
 0x1f2   : > { %2892 = vmatmul.msk.f32.gmra.mxu1 %vm990_vm1, %v5371_v31 }
 0x1f3   : > { %2925 = vmatmul.msk.f32.gmra.mxu2 %vm990_vm1, %v5372_v60  ;;  %2957 = vmatmul.msk.f32.gmra.mxu3 %vm990_vm1, %v5373_v11  ;;  %v5379_v60 = vld [vmem:[#allocation64_spill] sm:$0xff]  ;;  %v5380_v11 = vld [vmem:[#allocation46_spill] sm:$0xff] }
 0x1f5   : > { %v4687_v17 = vpop.f32.mrf.mxu0 }
 0x1f6   : > { %v1581_v57 = vpop.f32.mrf.mxu2  ;;  %v1731_v12 = vpop.f32.mrf.mxu3 }
 0x1f7   : > { %v1324_v40 = vpop.f32.mrf.mxu1  ;;  %v4685_v20 = vadd.f32 %v1731_v12, %v1628_v63  ;;  %v1629_v58 = vadd.f32 %v1581_v57, %v1322_v2  ;;  %v5381_v63 = vld [vmem:[#allocation42_spill] sm:$0xff] }
 0x1f8   : > { %2990 = vmatmul.msk.f32.gmra.mxu0 %vm990_vm1, %v5375_v14  ;;  %v1325_v31 = vadd.f32 %v1324_v40, %v5378_v9  ;;  %v5382_v40 = vld [vmem:[#allocation61_spill] sm:$0xff]  ;;  %v5385_v9 = vld [vmem:[#allocation48_spill] sm:$0xff] }
 0x1fa   : > { %2893 = vmatmul.msk.f32.gmra.mxu1 %vm990_vm1, %v5375_v14 }
 0x1fb   : > { %2926 = vmatmul.msk.f32.gmra.mxu2 %vm990_vm1, %v5376_v47  ;;  %2958 = vmatmul.msk.f32.gmra.mxu3 %vm990_vm1, %v5377_v27 }
 0x1fd   : > { %v4700_v62 = vpop.f32.mrf.mxu0 }
 0x1fe   : > { %v1584_v23 = vpop.f32.mrf.mxu2  ;;  %v1734_v38 = vpop.f32.mrf.mxu3 }
 0x1ff   : > { %v1327_v59 = vpop.f32.mrf.mxu1  ;;  %v4698_v54 = vadd.f32 %v1734_v38, %v1629_v58  ;;  %v1630_v57 = vadd.f32 %v1584_v23, %v1325_v31  ;;  %v5383_v58 = vld [vmem:[#allocation65_spill] sm:$0xff]  ;;  %v5384_v38 = vld [vmem:[#allocation47_spill] sm:$0xff] }
 0x200   : > { %2991 = vmatmul.msk.f32.gmra.mxu0 %vm990_vm1, %v5379_v60  ;;  %v1328_v27 = vadd.f32 %v1327_v59, %v5382_v40  ;;  %v5388_v59 = vld [vmem:[#allocation63_spill] sm:$0xff]  ;;  %v5389_v40 = vld [vmem:[#allocation68_spill] sm:$0xff] }
 0x202   : > { %2894 = vmatmul.msk.f32.gmra.mxu1 %vm990_vm1, %v5379_v60 }
 0x203   : > { %2927 = vmatmul.msk.f32.gmra.mxu2 %vm990_vm1, %v5380_v11  ;;  %2959 = vmatmul.msk.f32.gmra.mxu3 %vm990_vm1, %v5381_v63 }
 0x205   : > { %v4713_v47 = vpop.f32.mrf.mxu0 }
 0x206   : > { %v1587_v12 = vpop.f32.mrf.mxu2  ;;  %v1737_v35 = vpop.f32.mrf.mxu3 }
 0x207   : > { %v1330_v2 = vpop.f32.mrf.mxu1  ;;  %v4711_v14 = vadd.f32 %v1737_v35, %v1630_v57  ;;  %v1631_v23 = vadd.f32 %v1587_v12, %v1328_v27 }
 0x208   : > { %2992 = vmatmul.msk.f32.gmra.mxu0 %vm990_vm1, %v5383_v58  ;;  %v1331_v35 = vadd.f32 %v1330_v2, %v5388_v59  ;;  %v5394_v2 = vld [vmem:[#allocation66_spill] sm:$0xff] }
 0x20a   : > { %2895 = vmatmul.msk.f32.gmra.mxu1 %vm990_vm1, %v5383_v58  ;;  %v5390_v58 = vld [vmem:[#allocation8_spill] sm:$0xff] }
 0x20b   : > { %2928 = vmatmul.msk.f32.gmra.mxu2 %vm990_vm1, %v5384_v38  ;;  %2960 = vmatmul.msk.f32.gmra.mxu3 %vm990_vm1, %v5385_v9  ;;  %v5391_v38 = vld [vmem:[#allocation54_spill] sm:$0xff] }
 0x20d   : > { %v4726_v57 = vpop.f32.mrf.mxu0 }
 0x20e   : > { %v1590_v31 = vpop.f32.mrf.mxu2  ;;  %v1740_v60 = vpop.f32.mrf.mxu3  ;;  %5387 = vst [vmem:[#allocation67_spill] sm:$0xff] %v4726_v57 }
 0x20f   : > { %v1333_v11 = vpop.f32.mrf.mxu1  ;;  %v4724_v63 = vadd.f32 %v1740_v60, %v1631_v23  ;;  %v1632_v12 = vadd.f32 %v1590_v31, %v1331_v35 }
 0x210   : > { %2993 = vmatmul.msk.f32.gmra.mxu0 %vm990_vm1, %v5389_v40  ;;  %v1334_v59 = vadd.f32 %v1333_v11, %v5394_v2  ;;  %v5399_v11 = vld [vmem:[#allocation69_spill] sm:$0xff] }
 0x211   : > { %5386 = vst [vmem:[#allocation53_spill] sm:$0xff] %v4724_v63  ;;  %v5395_v63 = vld [vmem:[#allocation71_spill] sm:$0xff] }
 0x212   : > { %2896 = vmatmul.msk.f32.gmra.mxu1 %vm990_vm1, %v5389_v40  ;;  %v5396_v40 = vld [vmem:[#allocation9_spill] sm:$0xff] }
 0x213   : > { %2929 = vmatmul.msk.f32.gmra.mxu2 %vm990_vm1, %v5390_v58  ;;  %2961 = vmatmul.msk.f32.gmra.mxu3 %vm990_vm1, %v5391_v38  ;;  %v5397_v58 = vld [vmem:[#allocation10_spill] sm:$0xff] }
 0x215   : > { %v4739_v57 = vpop.f32.mrf.mxu0 }
 0x216   : > { %v1593_v27 = vpop.f32.mrf.mxu2  ;;  %v1743_v9 = vpop.f32.mrf.mxu3  ;;  %5393 = vst [vmem:[#allocation18_spill] sm:$0xff] %v4739_v57 }
 0x217   : > { %v1336_v23 = vpop.f32.mrf.mxu1  ;;  %v4737_v60 = vadd.f32 %v1743_v9, %v1632_v12  ;;  %v1633_v31 = vadd.f32 %v1593_v27, %v1334_v59 }
 0x218   : > { %2994 = vmatmul.msk.f32.gmra.mxu0 %vm990_vm1, %v5395_v63  ;;  %v1337_v2 = vadd.f32 %v1336_v23, %v5399_v11  ;;  %v5404_v23 = vld [vmem:[#allocation72_spill] sm:$0xff] }
 0x219   : > { %5392 = vst [vmem:[#allocation56_spill] sm:$0xff] %v4737_v60  ;;  %v5400_v60 = vld [vmem:[#allocation74_spill] sm:$0xff] }
 0x21a   : > { %2897 = vmatmul.msk.f32.gmra.mxu1 %vm990_vm1, %v5395_v63  ;;  %v5401_v63 = vld [vmem:[#allocation15_spill] sm:$0xff] }
 0x21b   : > { %2930 = vmatmul.msk.f32.gmra.mxu2 %vm990_vm1, %v5396_v40  ;;  %2962 = vmatmul.msk.f32.gmra.mxu3 %vm990_vm1, %v5397_v58 }
 0x21d   : > { %v4752_v57 = vpop.f32.mrf.mxu0 }
 0x21e   : > { %v1596_v35 = vpop.f32.mrf.mxu2  ;;  %v1746_v38 = vpop.f32.mrf.mxu3  ;;  %5398 = vst [vmem:[#allocation14_spill] sm:$0xff] %v4752_v57  ;;  %v5405_v57 = vld [vmem:[#allocation76_spill] sm:$0xff] }
 0x21f   : > { %v1339_v12 = vpop.f32.mrf.mxu1  ;;  %v4750_v9 = vadd.f32 %v1746_v38, %v1633_v31  ;;  %v1634_v27 = vadd.f32 %v1596_v35, %v1337_v2 }
 0x220   : > { %2995 = vmatmul.msk.f32.gmra.mxu0 %vm990_vm1, %v5400_v60  ;;  %v1340_v11 = vadd.f32 %v1339_v12, %v5404_v23  ;;  %v5409_v12 = vld [vmem:[#allocation75_spill] sm:$0xff] }
 0x222   : > { %2898 = vmatmul.msk.f32.gmra.mxu1 %vm990_vm1, %v5400_v60 }
 0x223   : > { %2931 = vmatmul.msk.f32.gmra.mxu2 %vm990_vm1, %v5295_v18  ;;  %2963 = vmatmul.msk.f32.gmra.mxu3 %vm990_vm1, %v5401_v63  ;;  %v5406_v18 = vld [vmem:[#allocation23_spill] sm:$0xff] }
 0x225   : > { %v4765_v38 = vpop.f32.mrf.mxu0 }
 0x226   : > { %v1599_v59 = vpop.f32.mrf.mxu2  ;;  %v1749_v40 = vpop.f32.mrf.mxu3  ;;  %5403 = vst [vmem:[#allocation58_spill] sm:$0xff] %v4765_v38  ;;  %v5410_v38 = vld [vmem:[#allocation77_spill] sm:$0xff] }
 0x227   : > { %v1342_v58 = vpop.f32.mrf.mxu1  ;;  %v4763_v31 = vadd.f32 %v1749_v40, %v1634_v27  ;;  %v1635_v60 = vadd.f32 %v1599_v59, %v1340_v11 }
 0x228   : > { %2996 = vmatmul.msk.f32.gmra.mxu0 %vm990_vm1, %v5405_v57  ;;  %v1343_v23 = vadd.f32 %v1342_v58, %v5409_v12 }
 0x229   : > { %5402 = vst [vmem:[#allocation70_spill] sm:$0xff] %v4763_v31 }
 0x22a   : > { %2899 = vmatmul.msk.f32.gmra.mxu1 %vm990_vm1, %v5405_v57 }
 0x22b   : > { %2932 = vmatmul.msk.f32.gmra.mxu2 %vm990_vm1, %v5296_v52  ;;  %2964 = vmatmul.msk.f32.gmra.mxu3 %vm990_vm1, %v5406_v18  ;;  %v5411_v52 = vld [vmem:[#allocation29_spill] sm:$0xff] }
 0x22d   : > { %v4778_v40 = vpop.f32.mrf.mxu0 }
 0x22e   : > { %v1602_v35 = vpop.f32.mrf.mxu2  ;;  %v1752_v2 = vpop.f32.mrf.mxu3  ;;  %5408 = vst [vmem:[#allocation20_spill] sm:$0xff] %v4778_v40 }
 0x22f   : > { %v1975_v63 = vpop.f32.mrf.mxu1  ;;  %v4776_v27 = vadd.f32 %v1752_v2, %v1635_v60  ;;  %v1636_v57 = vadd.f32 %v1602_v35, %v1343_v23  ;;  %v5412_v60 = vld [vmem:[#allocation21_spill] sm:$0xff]  ;;  %v5413_v2 = vld [vmem:[#allocation22_spill] sm:$0xff] }
 0x230   : > { %2997 = vmatmul.msk.f32.gmra.mxu0 %vm990_vm1, %v5410_v38  ;;  %v1915_v58 = vadd.f32 %v5413_v2, %v5412_v60 }
 0x231   : > { %5407 = vst [vmem:[#allocation19_spill] sm:$0xff] %v4776_v27 }
 0x232   : > { %2900 = vmatmul.msk.f32.gmra.mxu1 %vm990_vm1, %v5410_v38  ;;  %v2071_v27 = vadd.f32 %v1975_v63, %v1915_v58  ;;  %v5416_v38 = vld [vmem:[#allocation79_spill] sm:$0xff]  ;;  %v5418_v63 = vld [vmem:[#allocation28_spill] sm:$0xff] }
 0x233   : > { %2933 = vmatmul.msk.f32.gmra.mxu2 %vm990_vm1, %v5306_v32  ;;  %2965 = vmatmul.msk.f32.gmra.mxu3 %vm990_vm1, %v5411_v52  ;;  %v5417_v32 = vld [vmem:[#allocation37_spill] sm:$0xff] }
 0x235   : > { %v4793_v40 = vpop.f32.mrf.mxu0 }
 0x236   : > { %v2128_v59 = vpop.f32.mrf.mxu2  ;;  %v1755_v11 = vpop.f32.mrf.mxu3  ;;  %5415 = vst [vmem:[#allocation60_spill] sm:$0xff] %v4793_v40 }
 0x237   : > { %v1978_v18 = vpop.f32.mrf.mxu1  ;;  %v4791_v12 = vadd.f32 %v1755_v11, %v1636_v57  ;;  %v2224_v35 = vadd.f32 %v2128_v59, %v2071_v27  ;;  %v5419_v11 = vld [vmem:[#allocation78_spill] sm:$0xff] }
 0x238   : > { %2998 = vmatmul.msk.f32.gmra.mxu0 %vm990_vm1, %v5416_v38  ;;  %v1916_v60 = vadd.f32 %v5419_v11, %v5418_v63 }
 0x239   : > { %5414 = vst [vmem:[#allocation73_spill] sm:$0xff] %v4791_v12  ;;  %v5420_v12 = vld [vmem:[#allocation80_spill] sm:$0xff] }
 0x23a   : > { %2901 = vmatmul.msk.f32.gmra.mxu1 %vm990_vm1, %v5416_v38  ;;  %v2072_v40 = vadd.f32 %v1978_v18, %v1916_v60 }
 0x23b   : > { %2934 = vmatmul.msk.f32.gmra.mxu2 %vm990_vm1, %v5307_v50  ;;  %2966 = vmatmul.msk.f32.gmra.mxu3 %vm990_vm1, %v5417_v32  ;;  %v5421_v50 = vld [vmem:[#allocation43_spill] sm:$0xff] }
 0x23d   : > { %v2441_v58 = vpop.f32.mrf.mxu0 }
 0x23e   : > { %v2131_v23 = vpop.f32.mrf.mxu2  ;;  %v2285_v52 = vpop.f32.mrf.mxu3 }
 0x23f   : > { %v1981_v57 = vpop.f32.mrf.mxu1  ;;  %v2381_v2 = vadd.f32 %v2285_v52, %v2224_v35  ;;  %v2225_v27 = vadd.f32 %v2131_v23, %v2072_v40  ;;  %v5422_v35 = vld [vmem:[#allocation35_spill] sm:$0xff]  ;;  %v5423_v52 = vld [vmem:[#allocation36_spill] sm:$0xff] }
 0x240   : > { %2999 = vmatmul.msk.f32.gmra.mxu0 %vm990_vm1, %v5420_v12  ;;  %v1917_v63 = vadd.f32 %v5423_v52, %v5422_v35  ;;  %v5426_v40 = vld [vmem:[#allocation51_spill] sm:$0xff] }
 0x241   : > { %v2537_v38 = vadd.f32 %v2441_v58, %v2381_v2  ;;  %v5425_v58 = vld [vmem:[#allocation50_spill] sm:$0xff] }
 0x242   : > { %2902 = vmatmul.msk.f32.gmra.mxu1 %vm990_vm1, %v5420_v12  ;;  %v2073_v60 = vadd.f32 %v1981_v57, %v1917_v63  ;;  %v5427_v57 = vld [vmem:[#allocation41_spill] sm:$0xff] }
 0x243   : > { %2935 = vmatmul.msk.f32.gmra.mxu2 %vm990_vm1, %v5317_v61  ;;  %2569 = vst [vmem:[%s4814_s27] sm:$0xff] %v2537_v38  ;;  %2967 = vmatmul.msk.f32.gmra.mxu3 %vm990_vm1, %v5421_v50  ;;  %v5424_v61 = vld [vmem:[#allocation82_spill] sm:$0xff] }
 0x245   : > { %v2444_v12 = vpop.f32.mrf.mxu0 }
 0x246   : > { %v2134_v59 = vpop.f32.mrf.mxu2  ;;  %v2288_v18 = vpop.f32.mrf.mxu3 }
 0x247   : > { %v1984_v32 = vpop.f32.mrf.mxu1  ;;  %v2382_v11 = vadd.f32 %v2288_v18, %v2225_v27  ;;  %v2226_v23 = vadd.f32 %v2134_v59, %v2073_v60  ;;  %v5428_v18 = vld [vmem:[#allocation81_spill] sm:$0xff]  ;;  %v5431_v59 = vld [vmem:[#allocation55_spill] sm:$0xff] }
 0x248   : > { %3000 = vmatmul.msk.f32.gmra.mxu0 %vm990_vm1, %v5424_v61  ;;  %v1918_v35 = vadd.f32 %v5428_v18, %v5427_v57 }
 0x249   : > { %v2538_v2 = vadd.f32 %v2444_v12, %v2382_v11 }
 0x24a   : > { %2903 = vmatmul.msk.f32.gmra.mxu1 %vm990_vm1, %v5424_v61  ;;  %v2074_v11 = vadd.f32 %v1984_v32, %v1918_v35  ;;  %v5429_v61 = vld [vmem:[#allocation84_spill] sm:$0xff]  ;;  %v5432_v32 = vld [vmem:[#allocation49_spill] sm:$0xff] }
 0x24b   : > { %2936 = vmatmul.msk.f32.gmra.mxu2 %vm990_vm1, %v5425_v58  ;;  %2570 = vst [vmem:[%s4814_s27 + $0x8] sm:$0xff] %v2538_v2  ;;  %2968 = vmatmul.msk.f32.gmra.mxu3 %vm990_vm1, %v5426_v40  ;;  %v5430_v2 = vld [vmem:[#allocation11_spill] sm:$0xff] }
 0x24d   : > { %v2447_v63 = vpop.f32.mrf.mxu0 }
 0x24e   : > { %v2137_v38 = vpop.f32.mrf.mxu2  ;;  %v2291_v50 = vpop.f32.mrf.mxu3 }
 0x24f   : > { %v1987_v27 = vpop.f32.mrf.mxu1  ;;  %v2383_v52 = vadd.f32 %v2291_v50, %v2226_v23  ;;  %v2227_v60 = vadd.f32 %v2137_v38, %v2074_v11  ;;  %v5433_v50 = vld [vmem:[#allocation83_spill] sm:$0xff]  ;;  %v5436_v38 = vld [vmem:[#allocation13_spill] sm:$0xff] }
 0x250   : > { %3001 = vmatmul.msk.f32.gmra.mxu0 %vm990_vm1, %v5429_v61  ;;  %v1919_v57 = vadd.f32 %v5433_v50, %v5432_v32 }
 0x251   : > { %v2539_v12 = vadd.f32 %v2447_v63, %v2383_v52 }
 0x252   : > { %2904 = vmatmul.msk.f32.gmra.mxu1 %vm990_vm1, %v5429_v61  ;;  %v2075_v52 = vadd.f32 %v1987_v27, %v1919_v57  ;;  %v5434_v61 = vld [vmem:[#allocation87_spill] sm:$0xff]  ;;  %v5437_v27 = vld [vmem:[#allocation85_spill] sm:$0xff] }
 0x253   : > { %2937 = vmatmul.msk.f32.gmra.mxu2 %vm990_vm1, %v5430_v2  ;;  %2571 = vst [vmem:[%s4814_s27 + $0x10] sm:$0xff] %v2539_v12  ;;  %2969 = vmatmul.msk.f32.gmra.mxu3 %vm990_vm1, %v5431_v59  ;;  %v5435_v12 = vld [vmem:[#allocation12_spill] sm:$0xff] }
 0x255   : > { %v2450_v35 = vpop.f32.mrf.mxu0 }
 0x256   : > { %v2140_v58 = vpop.f32.mrf.mxu2  ;;  %v2294_v40 = vpop.f32.mrf.mxu3 }
 0x257   : > { %v1990_v23 = vpop.f32.mrf.mxu1  ;;  %v2384_v18 = vadd.f32 %v2294_v40, %v2227_v60  ;;  %v2228_v11 = vadd.f32 %v2140_v58, %v2075_v52  ;;  %v5438_v40 = vld [vmem:[#allocation86_spill] sm:$0xff]  ;;  %v5441_v58 = vld [vmem:[#allocation17_spill] sm:$0xff] }
 0x258   : > { %3002 = vmatmul.msk.f32.gmra.mxu0 %vm990_vm1, %v5434_v61  ;;  %v1920_v32 = vadd.f32 %v5438_v40, %v5437_v27 }
 0x259   : > { %v2540_v63 = vadd.f32 %v2450_v35, %v2384_v18 }
 0x25a   : > { %2905 = vmatmul.msk.f32.gmra.mxu1 %vm990_vm1, %v5434_v61  ;;  %v2076_v18 = vadd.f32 %v1990_v23, %v1920_v32  ;;  %v5439_v61 = vld [vmem:[#allocation90_spill] sm:$0xff]  ;;  %v5442_v23 = vld [vmem:[#allocation88_spill] sm:$0xff] }
 0x25b   : > { %2938 = vmatmul.msk.f32.gmra.mxu2 %vm990_vm1, %v5435_v12  ;;  %2572 = vst [vmem:[%s4814_s27 + $0x18] sm:$0xff] %v2540_v63  ;;  %2970 = vmatmul.msk.f32.gmra.mxu3 %vm990_vm1, %v5436_v38  ;;  %v5440_v63 = vld [vmem:[#allocation24_spill] sm:$0xff] }
 0x25d   : > { %v2453_v57 = vpop.f32.mrf.mxu0 }
 0x25e   : > { %v2143_v2 = vpop.f32.mrf.mxu2  ;;  %v2297_v59 = vpop.f32.mrf.mxu3 }
 0x25f   : > { %v1993_v60 = vpop.f32.mrf.mxu1  ;;  %v2385_v50 = vadd.f32 %v2297_v59, %v2228_v11  ;;  %v2229_v52 = vadd.f32 %v2143_v2, %v2076_v18  ;;  %v5443_v59 = vld [vmem:[#allocation89_spill] sm:$0xff]  ;;  %v5446_v2 = vld [vmem:[#allocation26_spill] sm:$0xff] }
 0x260   : > { %3003 = vmatmul.msk.f32.gmra.mxu0 %vm990_vm1, %v5439_v61  ;;  %v1921_v27 = vadd.f32 %v5443_v59, %v5442_v23 }
 0x261   : > { %v2541_v35 = vadd.f32 %v2453_v57, %v2385_v50 }
 0x262   : > { %2906 = vmatmul.msk.f32.gmra.mxu1 %vm990_vm1, %v5439_v61  ;;  %v2077_v50 = vadd.f32 %v1993_v60, %v1921_v27  ;;  %v5444_v61 = vld [vmem:[#allocation92_spill] sm:$0xff] }
 0x263   : > { %2939 = vmatmul.msk.f32.gmra.mxu2 %vm990_vm1, %v5440_v63  ;;  %2573 = vst [vmem:[%s4814_s27 + $0x20] sm:$0xff] %v2541_v35  ;;  %2971 = vmatmul.msk.f32.gmra.mxu3 %vm990_vm1, %v5441_v58  ;;  %v5445_v35 = vld [vmem:[#allocation25_spill] sm:$0xff]  ;;  %v5447_v60 = vld [vmem:[#allocation16_spill] sm:$0xff] }
 0x265   : > { %v2456_v32 = vpop.f32.mrf.mxu0 }
 0x266   : > { %v2146_v12 = vpop.f32.mrf.mxu2  ;;  %v2300_v38 = vpop.f32.mrf.mxu3 }
 0x267   : > { %v1996_v11 = vpop.f32.mrf.mxu1  ;;  %v2386_v40 = vadd.f32 %v2300_v38, %v2229_v52  ;;  %v2230_v18 = vadd.f32 %v2146_v12, %v2077_v50  ;;  %v5448_v38 = vld [vmem:[#allocation91_spill] sm:$0xff] }
 0x268   : > { %3004 = vmatmul.msk.f32.gmra.mxu0 %vm990_vm1, %v5444_v61  ;;  %v1922_v23 = vadd.f32 %v5448_v38, %v5447_v60  ;;  %v5451_v12 = vld [vmem:[#allocation31_spill] sm:$0xff] }
 0x269   : > { %v2542_v57 = vadd.f32 %v2456_v32, %v2386_v40 }
 0x26a   : > { %2907 = vmatmul.msk.f32.gmra.mxu1 %vm990_vm1, %v5444_v61  ;;  %v2078_v40 = vadd.f32 %v1996_v11, %v1922_v23  ;;  %v5449_v61 = vld [vmem:[#allocation95_spill] sm:$0xff]  ;;  %v5452_v11 = vld [vmem:[#allocation93_spill] sm:$0xff] }
 0x26b   : > { %2940 = vmatmul.msk.f32.gmra.mxu2 %vm990_vm1, %v5445_v35  ;;  %2574 = vst [vmem:[%s4814_s27 + $0x28] sm:$0xff] %v2542_v57  ;;  %2972 = vmatmul.msk.f32.gmra.mxu3 %vm990_vm1, %v5446_v2  ;;  %v5450_v57 = vld [vmem:[#allocation38_spill] sm:$0xff] }
 0x26d   : > { %v2459_v27 = vpop.f32.mrf.mxu0 }
 0x26e   : > { %v2149_v63 = vpop.f32.mrf.mxu2  ;;  %v2303_v58 = vpop.f32.mrf.mxu3 }
 0x26f   : > { %v1999_v52 = vpop.f32.mrf.mxu1  ;;  %v2387_v59 = vadd.f32 %v2303_v58, %v2230_v18  ;;  %v2231_v50 = vadd.f32 %v2149_v63, %v2078_v40  ;;  %v5453_v58 = vld [vmem:[#allocation94_spill] sm:$0xff]  ;;  %v5456_v63 = vld [vmem:[#allocation40_spill] sm:$0xff] }
 0x270   : > { %3005 = vmatmul.msk.f32.gmra.mxu0 %vm990_vm1, %v5449_v61  ;;  %v1923_v60 = vadd.f32 %v5453_v58, %v5452_v11 }
 0x271   : > { %v2543_v32 = vadd.f32 %v2459_v27, %v2387_v59 }
 0x272   : > { %2908 = vmatmul.msk.f32.gmra.mxu1 %vm990_vm1, %v5449_v61  ;;  %v2079_v59 = vadd.f32 %v1999_v52, %v1923_v60  ;;  %v5454_v61 = vld [vmem:[#allocation97_spill] sm:$0xff]  ;;  %v5457_v52 = vld [vmem:[#allocation30_spill] sm:$0xff] }
 0x273   : > { %2941 = vmatmul.msk.f32.gmra.mxu2 %vm990_vm1, %v5450_v57  ;;  %2575 = vst [vmem:[%s4814_s27 + $0x30] sm:$0xff] %v2543_v32  ;;  %2973 = vmatmul.msk.f32.gmra.mxu3 %vm990_vm1, %v5451_v12  ;;  %v5455_v32 = vld [vmem:[#allocation39_spill] sm:$0xff] }
 0x275   : > { %v2462_v23 = vpop.f32.mrf.mxu0 }
 0x276   : > { %v2152_v35 = vpop.f32.mrf.mxu2  ;;  %v2306_v2 = vpop.f32.mrf.mxu3 }
 0x277   : > { %v2002_v18 = vpop.f32.mrf.mxu1  ;;  %v2388_v38 = vadd.f32 %v2306_v2, %v2231_v50  ;;  %v2232_v40 = vadd.f32 %v2152_v35, %v2079_v59  ;;  %v5458_v2 = vld [vmem:[#allocation96_spill] sm:$0xff]  ;;  %v5460_v35 = vld [vmem:[#allocation45_spill] sm:$0xff] }
 0x278   : > { %3006 = vmatmul.msk.f32.gmra.mxu0 %vm990_vm1, %v5454_v61  ;;  %v1924_v11 = vadd.f32 %v5458_v2, %v5457_v52 }
 0x279   : > { %v2544_v27 = vadd.f32 %v2462_v23, %v2388_v38 }
 0x27a   : > { %2909 = vmatmul.msk.f32.gmra.mxu1 %vm990_vm1, %v5454_v61  ;;  %v2080_v38 = vadd.f32 %v2002_v18, %v1924_v11  ;;  %v5459_v61 = vld [vmem:[#allocation100_spill] sm:$0xff]  ;;  %v249_v11 = vld [vmem:[%s3290_s30 + $0x198] sm:$0xff] }
 0x27b   : > { %2942 = vmatmul.msk.f32.gmra.mxu2 %vm990_vm1, %v5455_v32  ;;  %2576 = vst [vmem:[%s4814_s27 + $0x38] sm:$0xff] %v2544_v27  ;;  %2974 = vmatmul.msk.f32.gmra.mxu3 %vm990_vm1, %v5456_v63  ;;  %v5461_v63 = vld [vmem:[#allocation98_spill] sm:$0xff] }
 0x27d   : > { %v2465_v60 = vpop.f32.mrf.mxu0 }
 0x27e   : > { %v2155_v57 = vpop.f32.mrf.mxu2  ;;  %v2309_v12 = vpop.f32.mrf.mxu3 }
 0x27f   : > { %v2005_v50 = vpop.f32.mrf.mxu1  ;;  %v2389_v58 = vadd.f32 %v2309_v12, %v2232_v40  ;;  %v2233_v59 = vadd.f32 %v2155_v57, %v2080_v38  ;;  %v5462_v40 = vld [vmem:[#allocation99_spill] sm:$0xff]  ;;  %v303_v57 = vmax.f32 %v249_v11, 0.0 }
 0x280   : > { %3007 = vmatmul.msk.f32.gmra.mxu0 %vm990_vm1, %v5459_v61  ;;  %v1925_v12 = vadd.f32 %v5462_v40, %v5461_v63  ;;  %v5464_v40 = vld [vmem:[#allocation44_spill] sm:$0xff] }
 0x281   : > { %v2545_v23 = vadd.f32 %v2465_v60, %v2389_v58  ;;  %v637_v63 = vmin.f32 %v303_v57, %v3306_v21 }
 0x282   : > { %2910 = vmatmul.msk.f32.gmra.mxu1 %vm990_vm1, %v5459_v61  ;;  %v2081_v58 = vadd.f32 %v2005_v50, %v1925_v12  ;;  %v5463_v61 = vld [vmem:[#allocation102_spill] sm:$0xff]  ;;  %v5465_v12 = vld [vmem:[#allocation101_spill] sm:$0xff] }
 0x283   : > { %2943 = vmatmul.msk.f32.gmra.mxu2 %vm990_vm1, %v5359_v42  ;;  %2577 = vst [vmem:[%s4814_s27 + $0x40] sm:$0xff] %v2545_v23  ;;  %2975 = vmatmul.msk.f32.gmra.mxu3 %vm990_vm1, %v5460_v35  ;;  %v250_v42 = vld [vmem:[%s3290_s30 + $0x1a0] sm:$0xff] }
 0x284   : > { %v304_v23 = vmax.f32 %v250_v42, 0.0  ;;  %v692_v42 = vmul.f32 %v3311_v25, %v637_v63 }
 0x285   : > { %v2468_v2 = vpop.f32.mrf.mxu0 }
 0x286   : > { %v2158_v27 = vpop.f32.mrf.mxu2  ;;  %v2312_v32 = vpop.f32.mrf.mxu3  ;;  %v362_v11 = vmin.f32 %v304_v23, %v3294_v6 }
 0x287   : > { %v2008_v18 = vpop.f32.mrf.mxu1  ;;  %v2390_v52 = vadd.f32 %v2312_v32, %v2233_v59  ;;  %v2234_v38 = vadd.f32 %v2158_v27, %v2081_v58  ;;  %v361_v32 = vmin.f32 %v303_v57, %v3294_v6  ;;  %v251_v58 = vld [vmem:[%s3290_s30 + $0x1a8] sm:$0x3] }
 0x288   : > { %3008 = vmatmul.msk.f32.gmra.mxu0 %vm990_vm1, %v5463_v61  ;;  %v417_v57 = vmul.f32 %v3297_v10, %v362_v11 }
 0x289   : > { %v2546_v60 = vadd.f32 %v2468_v2, %v2390_v52  ;;  %v1926_v52 = vadd.f32 %v5465_v12, %v5464_v40 }
 0x28a   : > { %2911 = vmatmul.msk.f32.gmra.mxu1 %vm990_vm1, %v5463_v61  ;;  %v416_v61 = vmul.f32 %v3297_v10, %v361_v32  ;;  %v5466_v32 = vld [vmem:[#allocation52_spill] sm:$0xff] }
 0x28b   : > { %2944 = vmatmul.msk.f32.gmra.mxu2 %vm990_vm1, %v3909_v34  ;;  %2578 = vst [vmem:[%s4814_s27 + $0x48] sm:$0xff] %v2546_v60  ;;  %2976 = vmatmul.msk.f32.gmra.mxu3 %vm990_vm1, %v5361_v0  ;;  %v638_v0 = vmin.f32 %v304_v23, %v3306_v21  ;;  %v2082_v60 = vadd.f32 %v2008_v18, %v1926_v52  ;;  %v305_v23 = vmax.f32 %v251_v58, 0.0  ;;  %v746_v52 = vfloor.f32 %v692_v42 }
 0x28c   : > { %v470_v12 = vfloor.f32 %v416_v61 }
 0x28d   : > { %v2471_v2 = vpop.f32.mrf.mxu0 }
 0x28e   : > { %v2161_v50 = vpop.f32.mrf.mxu2  ;;  %v2315_v35 = vpop.f32.mrf.mxu3 }
 0x28f   : > { %v2011_v59 = vpop.f32.mrf.mxu1  ;;  %v2391_v34 = vadd.f32 %v2315_v35, %v2234_v38  ;;  %v2235_v18 = vadd.f32 %v2161_v50, %v2082_v60  ;;  %v693_v38 = vmul.f32 %v3311_v25, %v638_v0  ;;  %v639_v50 = vmin.f32 %v305_v23, %v3306_v21 }
 0x290   : > { %3009 = vmatmul.msk.f32.gmra.mxu0 %vm990_vm1, %v4511_v49  ;;  %v801_v60 = vmul.f32 %v3316_v29, %v746_v52  ;;  %v1947_v21 = vrot.slane %v4535_v4, 2 }
 0x291   : > { %v2547_v27 = vadd.f32 %v2471_v2, %v2391_v34  ;;  %v1927_v34 = vadd.f32 %v5466_v32, %v4513_v16  ;;  %v747_v31 = vfloor.f32 %v693_v38  ;;  %v525_v16 = vmul.f32 %v3302_v15, %v470_v12 }
 0x292   : > { %2912 = vmatmul.msk.f32.gmra.mxu1 %vm990_vm1, %v4511_v49  ;;  %v694_v42 = vmul.f32 %v3311_v25, %v639_v50  ;;  %v1950_v25 = vrot.slane %v4566_v5, 2 }
 0x293   : > { %2945 = vmatmul.msk.f32.gmra.mxu2 %vm990_vm1, %v4535_v4  ;;  %2579 = vst [vmem:[%s4814_s27 + $0x50] sm:$0xff] %v2547_v27  ;;  %2977 = vmatmul.msk.f32.gmra.mxu3 %vm990_vm1, %v4004_v28  ;;  %v471_v27 = vfloor.f32 %v417_v57  ;;  %v363_v28 = vmin.f32 %v305_v23, %v3294_v6  ;;  %v2083_v11 = vadd.f32 %v2011_v59, %v1927_v34  ;;  %v1948_v59 = vrot.slane %v4544_v1, 2 }
 0x294   : > { %v855_v23 = vadd.f32 %v801_v60, %v525_v16  ;;  %v748_v52 = vfloor.f32 %v694_v42 }
 0x295   : > { %v2474_v2 = vpop.f32.mrf.mxu0  ;;  %v526_v58 = vmul.f32 %v3302_v15, %v471_v27  ;;  %v418_v61 = vmul.f32 %v3297_v10, %v363_v28  ;;  %v1929_v28 = vadd.f32 %v4561_v24, %v4559_v36 }
 0x296   : > { %v2164_v35 = vpop.f32.mrf.mxu2  ;;  %v2318_v40 = vpop.f32.mrf.mxu3 }
 0x297   : > { %v2014_v49 = vpop.f32.mrf.mxu1  ;;  %v2392_v63 = vadd.f32 %v2318_v40, %v2235_v18  ;;  %v2236_v6 = vadd.f32 %v2164_v35, %v2083_v11  ;;  %v472_v12 = vfloor.f32 %v418_v61 }
 0x298   : > { %3010 = vmatmul.msk.f32.gmra.mxu0 %vm990_vm1, %v4538_v19 }
 0x299   : > { %v2548_v0 = vadd.f32 %v2474_v2, %v2392_v63  ;;  %v527_v34 = vmul.f32 %v3302_v15, %v472_v12 }
 0x29a   : > { %2913 = vmatmul.msk.f32.gmra.mxu1 %vm990_vm1, %v4538_v19  ;;  %v802_v19 = vmul.f32 %v3316_v29, %v747_v31 }
 0x29b   : > { %2946 = vmatmul.msk.f32.gmra.mxu2 %vm990_vm1, %v4544_v1  ;;  %2580 = vst [vmem:[%s4814_s27 + $0x58] sm:$0xff] %v2548_v0  ;;  %2978 = vmatmul.msk.f32.gmra.mxu3 %vm990_vm1, %v4564_v3  ;;  %v1928_v3 = vadd.f32 %v4542_v48, %v4540_v7  ;;  %v1949_v1 = vsel %vm1345_vm2, %v1947_v21, %v1948_v59  ;;  %v2257_v7 = vrot.slane %v855_v23, 1 }
 0x29c   : > { %v856_v40 = vadd.f32 %v802_v19, %v526_v58  ;;  %v1930_v58 = vadd.f32 %v4580_v45, %v4578_v13  ;;  %v1931_v13 = vadd.f32 %v4596_v53, %v4594_v26 }
 0x29d   : > { %v2477_v4 = vpop.f32.mrf.mxu0  ;;  %v2084_v31 = vadd.f32 %v2014_v49, %v1928_v3  ;;  %v803_v49 = vmul.f32 %v3316_v29, %v748_v52  ;;  %v2413_v29 = vrot.slane %v855_v23, 2 }
 0x29e   : > { %v2167_v18 = vpop.f32.mrf.mxu2  ;;  %v2321_v57 = vpop.f32.mrf.mxu3  ;;  %v2258_v48 = vrot.slane %v856_v40, 1  ;;  %v2414_v36 = vrot.slane %v856_v40, 2 }
 0x29f   : > { %v2017_v38 = vpop.f32.mrf.mxu1  ;;  %v2393_v35 = vadd.f32 %v2321_v57, %v2236_v6  ;;  %v2237_v10 = vadd.f32 %v2167_v18, %v2084_v31  ;;  %v857_v5 = vadd.f32 %v803_v49, %v527_v34 }
 0x2a0   : > { %3011 = vmatmul.msk.f32.gmra.mxu0 %vm990_vm1, %v1949_v1  ;;  %v2259_v0 = vsel %vm907_vm0, %v2257_v7, %v2258_v48  ;;  %v2085_v16 = vadd.f32 %v2017_v38, %v1929_v28  ;;  %v2415_v42 = vsel %vm1345_vm2, %v2413_v29, %v2414_v36 }
 0x2a1   : > { %v2549_v32 = vadd.f32 %v2477_v4, %v2393_v35  ;;  %v2260_v24 = vrot.slane %v857_v5, 1  ;;  %v2416_v3 = vrot.slane %v857_v5, 2 }
 0x2a2   : > { %2914 = vmatmul.msk.f32.gmra.mxu1 %vm990_vm1, %v1949_v1 }
 0x2a3   : > { %2947 = vmatmul.msk.f32.gmra.mxu2 %vm990_vm1, %v855_v23  ;;  %2581 = vst [vmem:[%s4814_s27 + $0x60] sm:$0xff] %v2549_v32  ;;  %2979 = vmatmul.msk.f32.gmra.mxu3 %vm990_vm1, %v4583_v44  ;;  %v1951_v44 = vsel %vm1345_vm2, %v1948_v59, %v1950_v25  ;;  %v2261_v18 = vsel %vm907_vm0, %v2258_v48, %v2260_v24 }
 0x2a4   : > { %v2417_v12 = vsel %vm1345_vm2, %v2414_v36, %v2416_v3  ;;  %v1932_v48 = vadd.f32 %v4609_v8, %v4607_v39 }
 0x2a5   : > { %v2480_v11 = vpop.f32.mrf.mxu0 }
 0x2a6   : > { %v2170_v63 = vpop.f32.mrf.mxu2  ;;  %v2324_v2 = vpop.f32.mrf.mxu3 }
 0x2a7   : > { %v2020_v27 = vpop.f32.mrf.mxu1  ;;  %v2394_v50 = vadd.f32 %v2324_v2, %v2237_v10  ;;  %v2238_v15 = vadd.f32 %v2170_v63, %v2085_v16 }
 0x2a8   : > { %3012 = vmatmul.msk.f32.gmra.mxu0 %vm990_vm1, %v1951_v44  ;;  %v2086_v57 = vadd.f32 %v2020_v27, %v1930_v58  ;;  %v1935_v58 = vadd.f32 %v4648_v30, %v4646_v55 }
 0x2a9   : > { %v2550_v60 = vadd.f32 %v2480_v11, %v2394_v50  ;;  %v1933_v50 = vadd.f32 %v4622_v22, %v4620_v43 }
 0x2aa   : > { %2915 = vmatmul.msk.f32.gmra.mxu1 %vm990_vm1, %v1951_v44 }
 0x2ab   : > { %2948 = vmatmul.msk.f32.gmra.mxu2 %vm990_vm1, %v856_v40  ;;  %2582 = vst [vmem:[%s4814_s27 + $0x68] sm:$0xff] %v2550_v60  ;;  %2980 = vmatmul.msk.f32.gmra.mxu3 %vm990_vm1, %v2259_v0 }
 0x2ad   : > { %v2483_v61 = vpop.f32.mrf.mxu0 }
 0x2ae   : > { %v2173_v6 = vpop.f32.mrf.mxu2  ;;  %v2327_v21 = vpop.f32.mrf.mxu3 }
 0x2af   : > { %v2023_v59 = vpop.f32.mrf.mxu1  ;;  %v2395_v19 = vadd.f32 %v2327_v21, %v2238_v15  ;;  %v2239_v23 = vadd.f32 %v2173_v6, %v2086_v57  ;;  %v1934_v15 = vadd.f32 %v4635_v46, %v4633_v37 }
 0x2b0   : > { %3013 = vmatmul.msk.f32.gmra.mxu0 %vm990_vm1, %v2415_v42  ;;  %v2087_v52 = vadd.f32 %v2023_v59, %v1931_v13 }
 0x2b1   : > { %v2551_v38 = vadd.f32 %v2483_v61, %v2395_v19 }
 0x2b3   : > { %2583 = vst [vmem:[%s4814_s27 + $0x70] sm:$0xff] %v2551_v38  ;;  %2981 = vmatmul.msk.f32.gmra.mxu3 %vm990_vm1, %v2261_v18 }
 0x2b5   : > { %v2486_v40 = vpop.f32.mrf.mxu0 }
 0x2b6   : > { %v2176_v35 = vpop.f32.mrf.mxu2  ;;  %v2330_v4 = vpop.f32.mrf.mxu3 }
 0x2b7   : > { %v2026_v1 = vpop.f32.mrf.mxu1  ;;  %v2396_v45 = vadd.f32 %v2330_v4, %v2239_v23  ;;  %v2240_v32 = vadd.f32 %v2176_v35, %v2087_v52  ;;  %v1936_v23 = vadd.f32 %v4661_v41, %v4659_v33 }
 0x2b8   : > { %3014 = vmatmul.msk.f32.gmra.mxu0 %vm990_vm1, %v2417_v12  ;;  %v2088_v53 = vadd.f32 %v2026_v1, %v1932_v48 }
 0x2b9   : > { %v2552_v31 = vadd.f32 %v2486_v40, %v2396_v45  ;;  %v1937_v40 = vadd.f32 %v4674_v56, %v4672_v51 }
 0x2bb   : > { %2584 = vst [vmem:[%s4814_s27 + $0x78] sm:$0xff] %v2552_v31 }
 0x2bd   : > { %v2489_v26 = vpop.f32.mrf.mxu0 }
 0x2be   : > { %v2179_v10 = vpop.f32.mrf.mxu2  ;;  %v2333_v25 = vpop.f32.mrf.mxu3 }
 0x2bf   : > { %v2029_v7 = vpop.f32.mrf.mxu1  ;;  %v2397_v34 = vadd.f32 %v2333_v25, %v2240_v32  ;;  %v2241_v63 = vadd.f32 %v2179_v10, %v2088_v53 }
 0x2c0   : > { %v2089_v0 = vadd.f32 %v2029_v7, %v1933_v50  ;;  %v1938_v7 = vadd.f32 %v4687_v17, %v4685_v20 }
 0x2c1   : > { %v2553_v49 = vadd.f32 %v2489_v26, %v2397_v34 }
 0x2c3   : > { %2585 = vst [vmem:[%s4814_s27 + $0x80] sm:$0xff] %v2553_v49 }
 0x2c5   : > { %v2492_v44 = vpop.f32.mrf.mxu0 }
 0x2c6   : > { %v2182_v2 = vpop.f32.mrf.mxu2  ;;  %v2336_v27 = vpop.f32.mrf.mxu3 }
 0x2c7   : > { %v2032_v28 = vpop.f32.mrf.mxu1  ;;  %v2398_v11 = vadd.f32 %v2336_v27, %v2241_v63  ;;  %v2242_v16 = vadd.f32 %v2182_v2, %v2089_v0  ;;  %v1939_v2 = vadd.f32 %v4700_v62, %v4698_v54 }
 0x2c8   : > { %v2090_v24 = vadd.f32 %v2032_v28, %v1934_v15 }
 0x2c9   : > { %v2554_v5 = vadd.f32 %v2492_v44, %v2398_v11 }
 0x2cb   : > { %2586 = vst [vmem:[%s4814_s27 + $0x88] sm:$0xff] %v2554_v5  ;;  %v1940_v5 = vadd.f32 %v4713_v47, %v4711_v14 }
 0x2cd   : > { %v2495_v36 = vpop.f32.mrf.mxu0 }
 0x2ce   : > { %v2185_v39 = vpop.f32.mrf.mxu2  ;;  %v2339_v8 = vpop.f32.mrf.mxu3 }
 0x2cf   : > { %v2035_v60 = vpop.f32.mrf.mxu1  ;;  %v2399_v29 = vadd.f32 %v2339_v8, %v2242_v16  ;;  %v2243_v21 = vadd.f32 %v2185_v39, %v2090_v24  ;;  %v5468_v24 = vld [vmem:[#allocation67_spill] sm:$0xff] }
 0x2d0   : > { %v2091_v42 = vadd.f32 %v2035_v60, %v1935_v58 }
 0x2d1   : > { %v2555_v6 = vadd.f32 %v2495_v36, %v2399_v29  ;;  %v5467_v36 = vld [vmem:[#allocation53_spill] sm:$0xff] }
 0x2d3   : > { %2587 = vst [vmem:[%s4814_s27 + $0x90] sm:$0xff] %v2555_v6  ;;  %v1941_v6 = vadd.f32 %v5468_v24, %v5467_v36 }
 0x2d5   : > { %v2498_v61 = vpop.f32.mrf.mxu0 }
 0x2d6   : > { %v2188_v43 = vpop.f32.mrf.mxu2  ;;  %v2342_v22 = vpop.f32.mrf.mxu3 }
 0x2d7   : > { %v2038_v59 = vpop.f32.mrf.mxu1  ;;  %v2400_v19 = vadd.f32 %v2342_v22, %v2243_v21  ;;  %v2244_v57 = vadd.f32 %v2188_v43, %v2091_v42 }
 0x2d8   : > { %v2092_v4 = vadd.f32 %v2038_v59, %v1936_v23 }
 0x2d9   : > { %v2556_v18 = vadd.f32 %v2498_v61, %v2400_v19  ;;  %v5469_v19 = vld [vmem:[#allocation56_spill] sm:$0xff]  ;;  %v5470_v61 = vld [vmem:[#allocation18_spill] sm:$0xff] }
 0x2da   : > { %v1942_v42 = vadd.f32 %v5470_v61, %v5469_v19 }
 0x2db   : > { %2588 = vst [vmem:[%s4814_s27 + $0x98] sm:$0xff] %v2556_v18 }
 0x2dd   : > { %v2501_v35 = vpop.f32.mrf.mxu0 }
 0x2de   : > { %v2191_v37 = vpop.f32.mrf.mxu2  ;;  %v2345_v46 = vpop.f32.mrf.mxu3 }
 0x2df   : > { %v2041_v38 = vpop.f32.mrf.mxu1  ;;  %v2401_v3 = vadd.f32 %v2345_v46, %v2244_v57  ;;  %v2245_v13 = vadd.f32 %v2191_v37, %v2092_v4  ;;  %v5471_v4 = vld [vmem:[#allocation14_spill] sm:$0xff] }
 0x2e0   : > { %v2093_v31 = vadd.f32 %v2041_v38, %v1937_v40 }
 0x2e1   : > { %v2557_v1 = vadd.f32 %v2501_v35, %v2401_v3 }
 0x2e3   : > { %2589 = vst [vmem:[%s4814_s27 + $0xa0] sm:$0xff] %v2557_v1  ;;  %v1943_v1 = vadd.f32 %v5471_v4, %v4750_v9 }
 0x2e5   : > { %v2504_v52 = vpop.f32.mrf.mxu0 }
 0x2e6   : > { %v2194_v55 = vpop.f32.mrf.mxu2  ;;  %v2348_v30 = vpop.f32.mrf.mxu3 }
 0x2e7   : > { %v2044_v45 = vpop.f32.mrf.mxu1  ;;  %v2402_v12 = vadd.f32 %v2348_v30, %v2245_v13  ;;  %v2246_v10 = vadd.f32 %v2194_v55, %v2093_v31 }
 0x2e8   : > { %v2094_v26 = vadd.f32 %v2044_v45, %v1938_v7 }
 0x2e9   : > { %v2558_v32 = vadd.f32 %v2504_v52, %v2402_v12 }
 0x2eb   : > { %2590 = vst [vmem:[%s4814_s27 + $0xa8] sm:$0xff] %v2558_v32  ;;  %v5472_v32 = vld [vmem:[#allocation70_spill] sm:$0xff] }
 0x2ed   : > { %v2507_v34 = vpop.f32.mrf.mxu0 }
 0x2ee   : > { %v2197_v33 = vpop.f32.mrf.mxu2  ;;  %v2351_v41 = vpop.f32.mrf.mxu3 }
 0x2ef   : > { %v2047_v25 = vpop.f32.mrf.mxu1  ;;  %v2403_v48 = vadd.f32 %v2351_v41, %v2246_v10  ;;  %v2247_v49 = vadd.f32 %v2197_v33, %v2094_v26  ;;  %v5473_v10 = vld [vmem:[#allocation58_spill] sm:$0xff] }
 0x2f0   : > { %v2095_v50 = vadd.f32 %v2047_v25, %v1939_v2  ;;  %v1944_v33 = vadd.f32 %v5473_v10, %v5472_v32 }
 0x2f1   : > { %v2559_v53 = vadd.f32 %v2507_v34, %v2403_v48 }
 0x2f3   : > { %2591 = vst [vmem:[%s4814_s27 + $0xb0] sm:$0xff] %v2559_v53 }
 0x2f5   : > { %v2510_v28 = vpop.f32.mrf.mxu0 }
 0x2f6   : > { %v2200_v51 = vpop.f32.mrf.mxu2  ;;  %v2354_v56 = vpop.f32.mrf.mxu3 }
 0x2f7   : > { %v2050_v63 = vpop.f32.mrf.mxu1  ;;  %v2404_v27 = vadd.f32 %v2354_v56, %v2247_v49  ;;  %v2248_v44 = vadd.f32 %v2200_v51, %v2095_v50  ;;  %v5474_v49 = vld [vmem:[#allocation19_spill] sm:$0xff]  ;;  %v5475_v51 = vld [vmem:[#allocation20_spill] sm:$0xff] }
 0x2f8   : > { %v2096_v8 = vadd.f32 %v2050_v63, %v1940_v5  ;;  %v1945_v56 = vadd.f32 %v5475_v51, %v5474_v49 }
 0x2f9   : > { %v2560_v11 = vadd.f32 %v2510_v28, %v2404_v27 }
 0x2fb   : > { %2592 = vst [vmem:[%s4814_s27 + $0xb8] sm:$0xff] %v2560_v11 }
 0x2fd   : > { %v2513_v39 = vpop.f32.mrf.mxu0 }
 0x2fe   : > { %v2203_v20 = vpop.f32.mrf.mxu2  ;;  %v2357_v17 = vpop.f32.mrf.mxu3 }
 0x2ff   : > { %v2053_v0 = vpop.f32.mrf.mxu1  ;;  %v2405_v16 = vadd.f32 %v2357_v17, %v2248_v44  ;;  %v2249_v15 = vadd.f32 %v2203_v20, %v2096_v8  ;;  %v5476_v20 = vld [vmem:[#allocation73_spill] sm:$0xff]  ;;  %v5477_v17 = vld [vmem:[#allocation60_spill] sm:$0xff] }
 0x300   : > { %v2097_v22 = vadd.f32 %v2053_v0, %v1941_v6  ;;  %v1946_v0 = vadd.f32 %v5477_v17, %v5476_v20 }
 0x301   : > { %v2561_v60 = vadd.f32 %v2513_v39, %v2405_v16 }
 0x303   : > { %2593 = vst [vmem:[%s4814_s27 + $0xc0] sm:$0xff] %v2561_v60 }
 0x305   : > { %v2516_v43 = vpop.f32.mrf.mxu0 }
 0x306   : > { %v2206_v54 = vpop.f32.mrf.mxu2  ;;  %v2360_v62 = vpop.f32.mrf.mxu3 }
 0x307   : > { %v2056_v29 = vpop.f32.mrf.mxu1  ;;  %v2406_v21 = vadd.f32 %v2360_v62, %v2249_v15  ;;  %v2250_v58 = vadd.f32 %v2206_v54, %v2097_v22 }
 0x308   : > { %v2098_v46 = vadd.f32 %v2056_v29, %v1942_v42 }
 0x309   : > { %v2562_v59 = vadd.f32 %v2516_v43, %v2406_v21 }
 0x30b   : > { %2594 = vst [vmem:[%s4814_s27 + $0xc8] sm:$0xff] %v2562_v59 }
 0x30d   : > { %v2519_v57 = vpop.f32.mrf.mxu0 }
 0x30e   : > { %v2209_v14 = vpop.f32.mrf.mxu2  ;;  %v2363_v47 = vpop.f32.mrf.mxu3 }
 0x30f   : > { %v2407_v18 = vadd.f32 %v2363_v47, %v2250_v58  ;;  %v2059_v37 = vpop.f32.mrf.mxu1  ;;  %v2251_v23 = vadd.f32 %v2209_v14, %v2098_v46 }
 0x310   : > { %v2099_v30 = vadd.f32 %v2059_v37, %v1943_v1 }
 0x311   : > { %v2563_v38 = vadd.f32 %v2519_v57, %v2407_v18 }
 0x313   : > { %2595 = vst [vmem:[%s4814_s27 + $0xd0] sm:$0xff] %v2563_v38 }
 0x315   : > { %v2522_v55 = vpop.f32.mrf.mxu0 }
 0x316   : > { %v2212_v3 = vpop.f32.mrf.mxu2  ;;  %v2366_v35 = vpop.f32.mrf.mxu3 }
 0x317   : > { %v2408_v13 = vadd.f32 %v2366_v35, %v2251_v23  ;;  %v2062_v40 = vpop.f32.mrf.mxu1  ;;  %v2252_v12 = vadd.f32 %v2212_v3, %v2099_v30 }
 0x318   : > { %v2100_v7 = vadd.f32 %v2062_v40, %v1944_v33 }
 0x319   : > { %v2564_v45 = vadd.f32 %v2522_v55, %v2408_v13 }
 0x31b   : > { %2596 = vst [vmem:[%s4814_s27 + $0xd8] sm:$0xff] %v2564_v45 }
 0x31d   : > { %v2525_v25 = vpop.f32.mrf.mxu0 }
 0x31e   : > { %v2215_v52 = vpop.f32.mrf.mxu2  ;;  %v2369_v31 = vpop.f32.mrf.mxu3 }
 0x31f   : > { %v2409_v41 = vadd.f32 %v2369_v31, %v2252_v12  ;;  %v2253_v34 = vadd.f32 %v2215_v52, %v2100_v7  ;;  %v2065_v9 = vpop.f32.mrf.mxu1 }
 0x320   : > { %v2101_v27 = vadd.f32 %v2065_v9, %v1945_v56 }
 0x321   : > { %v2565_v48 = vadd.f32 %v2525_v25, %v2409_v41 }
 0x323   : > { %2597 = vst [vmem:[%s4814_s27 + $0xe0] sm:$0xff] %v2565_v48 }
 0x325   : > { %v2528_v2 = vpop.f32.mrf.mxu0 }
 0x326   : > { %v2372_v26 = vpop.f32.mrf.mxu3  ;;  %v2218_v53 = vpop.f32.mrf.mxu2 }
 0x327   : > { %v2410_v63 = vadd.f32 %v2372_v26, %v2253_v34  ;;  %v2254_v50 = vadd.f32 %v2218_v53, %v2101_v27  ;;  %v2068_v11 = vpop.f32.mrf.mxu1 }
 0x328   : > { %v2102_v8 = vadd.f32 %v2068_v11, %v1946_v0 }
 0x329   : > { %v2566_v28 = vadd.f32 %v2528_v2, %v2410_v63 }
 0x32b   : > { %2598 = vst [vmem:[%s4814_s27 + $0xe8] sm:$0xff] %v2566_v28 }
 0x32d   : > { %v2531_v16 = vpop.f32.mrf.mxu0 }
 0x32e   : > { %v2375_v44 = vpop.f32.mrf.mxu3  ;;  %v2221_v39 = vpop.f32.mrf.mxu2 }
 0x32f   : > { %v2411_v5 = vadd.f32 %v2375_v44, %v2254_v50  ;;  %v2255_v15 = vadd.f32 %v2221_v39, %v2102_v8 }
 0x331   : > { %v2567_v60 = vadd.f32 %v2531_v16, %v2411_v5 }
 0x333   : > { %2599 = vst [vmem:[%s4814_s27 + $0xf0] sm:$0xff] %v2567_v60 }
 0x335   : > { %v2534_v29 = vpop.f32.mrf.mxu0 }
 0x336   : > { %v2378_v54 = vpop.f32.mrf.mxu3 }
 0x337   : > { %v2412_v62 = vadd.f32 %v2378_v54, %v2255_v15 }
 0x339   : > { %v2568_v36 = vadd.f32 %v2534_v29, %v2412_v62 }
 0x33b   : > { %2600 = vst [vmem:[%s4814_s27 + $0xf8] sm:$0xff] %v2568_v36 }
 0x33c   : > { %3135 = shalt.err (!%p3132_p9)
}
 0x33d   : > { %s3193_s21 = smov 128   ;;  %s3194_s23 = smov 8  }
 0x33e   : > { %3029 = dma.vmem_to_hbm [thread:$0]  (%p3255_p4), %s2618_s5, 4096, %s2620_s6, %s2602_s15, %s3193_s21, %s3193_s21, %s3194_s23  }
 0x33f PF: > { %p3041_p10 = scmp.ge.s32.totalorder %s3190_s17, 2  ;;  %s2634_s26 = sand.u32 1, %s3170_s12  }
 0x340   : > { %s2635_s27 = scalar_lea.sflag [#allocation3], %s2634_s26 }
 0x341   : > { %p3036_p11 = pnand %p3041_p10, %p3262_p8 }
 0x343   : > { %p3037_p12 = pneg %p3036_p11 }
 0x345   : > { %3165 = dma.done.wait (%p3037_p12), %s2635_s27, 4096  }
 0x346   : > { %3167 = vsyncadd (%p3037_p12), %s2635_s27, 4294963200  ;;  %s17_s17 = sadd.s32 1, %s3190_s17   ;;  %s5478_s12 = smov %s3174_s13 }
 0x347   : > { %p14_p13 = scmp.ge.s32.totalorder %s17_s17, 4   ;;  %s5479_s13 = smov %s3178_s14 }
 0x348   : > { %s5480_s14 = smov %s3268_s25  ;;  %s5481_s15 = smov %s3186_s16 }
 0x349   : > { %s5482_s16 = smov %s5484_s20  ;;  %16 = sbr.rel (!%p14_p13) target bundleno = 5 (0x5), region = 80 }
 0x34e   :  { %2641 = vsyncpa [#allocation3], 1 }
 0x34f   :  { %2643 = vsyncpa [#allocation3 + $0x1], 1 }
 0x350   :  { %2644 = vsyncpa [#allocation4], 1 }
 0x351   :  { %2646 = vsyncpa [#allocation4 + $0x1], 1 }

</bundles_post_ra>
